<compile_context>
chip_gen: v7x
topology: tpu7x:2x2x1
jax: 0.10.0
libtpu: 0.0.40
codegen_flags: <defaults>
</compile_context>

<pallas_src>
import functools
import math

import jax
import jax.numpy as jnp
from jax.experimental import pallas as pl
from jax.experimental.pallas import tpu as pltpu

LANE = 128  # TPU lane width


def _round_up(x, m):
    return (x + m - 1) // m * m


def _cdiv(a, b):
    return (a + b - 1) // b


def _chip_budgets():
    """Chip-generation-aware (scoped VMEM limit, max output-time tile)."""
    vmem_cap = 0
    try:
        vmem_cap = int(getattr(pltpu.get_tpu_info(), "vmem_capacity_bytes", 0))
    except Exception:
        vmem_cap = 0
    if vmem_cap >= 96 * 1024 * 1024:      # v5e / v6e: 128 MiB VMEM
        return 96 * 1024 * 1024, 1024
    return 40 * 1024 * 1024, 512          # v7x (64 MiB) or unknown: conservative


VMEM_LIMIT, MAX_TIME_TILE = _chip_budgets()


def _pick_time_tile(n, t_out):
    """Output-time tile; guarantees (8,128) block legality and >=2 grid steps
    for dual-TensorCore chips when the batch axis alone cannot provide them."""
    tt = t_out if t_out <= MAX_TIME_TILE else MAX_TIME_TILE
    if n == 1 and tt == t_out and t_out >= 16:
        tt = _round_up(_cdiv(t_out, 2), 8)        # keep both TCs busy on v7x
    n_tt = _cdiv(t_out, tt)
    if n_tt > 1 and tt % 8 != 0:                  # safety net
        tt = _round_up(tt, 8)
        n_tt = _cdiv(t_out, tt)
    return tt, n_tt


# ----------------------------------------------------------------------------
# Pallas kernel 1: conv1d, taps folded into one MXU contraction
#   y = [x_win(tap0) | x_win(tap1) | ...] @ W_flat + b   (+ optional ReLUs)
# ----------------------------------------------------------------------------
def _conv_kernel(x_ref, w_ref, b_ref, o_ref, *, taps, dilation, tt, n_tt,
                 pre_relu, post_relu):
    if n_tt == 1:
        base = 0
    else:
        base = pl.multiple_of(pl.program_id(1) * tt, tt)
    span = tt + (taps - 1) * dilation
    win = x_ref[pl.ds(base, span), :]                       # (span, Cin_p) bf16
    if pre_relu:                                            # relu once on window
        win = jnp.maximum(win, jnp.zeros((), win.dtype))
    if taps == 1:
        xcat = win
    else:
        xcat = jnp.concatenate(
            [win[k * dilation:k * dilation + tt, :] for k in range(taps)],
            axis=-1)                                        # (tt, taps*Cin_p)
    y = jnp.dot(xcat, w_ref[...], preferred_element_type=jnp.float32)
    y = y + b_ref[...]
    if post_relu:
        y = jnp.maximum(y, 0.0)
    o_ref[...] = y.astype(o_ref.dtype)


def _conv_call(xp, w, b, *, taps, dilation, t_out, pre_relu=False,
               post_relu=False, out_dtype=jnp.bfloat16):
    """xp: (N, Tp, Cin_p) time-padded, lane-padded bf16.
    w: (taps*Cin_p, OutLanes) bf16 pre-packed.  b: (1, OutLanes) f32."""
    n, tp, cin_p = xp.shape
    out_lanes = w.shape[1]
    assert w.shape[0] == taps * cin_p
    tt, n_tt = _pick_time_tile(n, t_out)
    need = n_tt * tt + (taps - 1) * dilation     # every tap load in-bounds
    if need > tp:
        xp = jnp.pad(xp, ((0, 0), (0, need - tp), (0, 0)))
        tp = need

    kern = functools.partial(_conv_kernel, taps=taps, dilation=dilation, tt=tt,
                             n_tt=n_tt, pre_relu=pre_relu, post_relu=post_relu)
    flops = 2 * n * t_out * (taps * cin_p) * out_lanes
    bytes_acc = int(xp.size * 2 + w.size * 2 + b.size * 4
                    + n * t_out * out_lanes * jnp.dtype(out_dtype).itemsize)

    # TODO(synk): for very long sequences on v7x (64 MiB VMEM) the per-batch
    # time-resident input block should be halo-tiled along time and the
    # constant-index weight/bias operands single-buffered (pl.Buffered(1)).
    return pl.pallas_call(
        kern,
        out_shape=jax.ShapeDtypeStruct((n, t_out, out_lanes), out_dtype),
        grid=(n, n_tt),
        in_specs=[
            pl.BlockSpec((None, tp, cin_p), lambda i, j: (i, 0, 0)),   # resident over j
            pl.BlockSpec((taps * cin_p, out_lanes), lambda i, j: (0, 0)),
            pl.BlockSpec((1, out_lanes), lambda i, j: (0, 0)),
        ],
        out_specs=pl.BlockSpec((None, tt, out_lanes), lambda i, j: (i, j, 0)),
        compiler_params=pltpu.CompilerParams(
            dimension_semantics=("parallel", "parallel"),
            vmem_limit_bytes=VMEM_LIMIT),
        cost_estimate=pl.CostEstimate(flops=int(flops), transcendentals=0,
                                      bytes_accessed=bytes_acc),
    )(xp, w, b)


def conv1d_packed(x, layer, *, taps, dilation=1, padding=0, pre_relu=False,
                  post_relu=False, out_dtype=jnp.bfloat16):
    n, t, _ = x.shape
    t_out = t + 2 * padding - dilation * (taps - 1)
    xp = jnp.pad(x, ((0, 0), (padding, padding), (0, 0))) if padding else x
    return _conv_call(xp, layer["w"], layer["b"], taps=taps, dilation=dilation,
                      t_out=t_out, pre_relu=pre_relu, post_relu=post_relu,
                      out_dtype=out_dtype)


# ----------------------------------------------------------------------------
# Pallas kernel 2: fused ResNet block
#   out = x + conv1x1( relu( conv3_dil( relu(x) ) ) )      (norm=None)
# Intermediate h stays in registers/VMEM; both weights resident.
# ----------------------------------------------------------------------------
def _resblock_kernel(x_ref, w1_ref, b1_ref, w2_ref, b2_ref, o_ref, *,
                     dilation, tt, n_tt):
    if n_tt == 1:
        base = 0
    else:
        base = pl.multiple_of(pl.program_id(1) * tt, tt)
    span = tt + 2 * dilation
    win = x_ref[pl.ds(base, span), :]                       # (span, Cp) bf16
    skip = win[dilation:dilation + tt, :]                   # pre-activation x
    act = jnp.maximum(win, jnp.zeros((), win.dtype))        # relu(x) once
    xcat = jnp.concatenate(
        [act[k * dilation:k * dilation + tt, :] for k in range(3)], axis=-1)
    h = jnp.dot(xcat, w1_ref[...], preferred_element_type=jnp.float32)
    h = h + b1_ref[...]
    h = jnp.maximum(h, 0.0).astype(w2_ref.dtype)            # relu(h) -> bf16
    y = jnp.dot(h, w2_ref[...], preferred_element_type=jnp.float32)
    y = y + b2_ref[...] + skip.astype(jnp.float32)          # fused residual
    o_ref[...] = y.astype(o_ref.dtype)


def resblock_call(x, blk, *, dilation, out_dtype=jnp.bfloat16):
    n, t, cp = x.shape
    tt, n_tt = _pick_time_tile(n, t)
    right = n_tt * tt - t + dilation
    xp = jnp.pad(x, ((0, 0), (dilation, right), (0, 0)))
    tp = xp.shape[1]

    kern = functools.partial(_resblock_kernel, dilation=dilation, tt=tt, n_tt=n_tt)
    flops = 2 * n * t * cp * cp * 4                          # (3cp + cp) deep
    bytes_acc = int(xp.size * 2 + (3 * cp * cp + cp * cp) * 2 + 2 * cp * 4
                    + n * t * cp * 2)

    return pl.pallas_call(
        kern,
        out_shape=jax.ShapeDtypeStruct((n, t, cp), out_dtype),
        grid=(n, n_tt),
        in_specs=[
            pl.BlockSpec((None, tp, cp), lambda i, j: (i, 0, 0)),
            pl.BlockSpec((3 * cp, cp), lambda i, j: (0, 0)),
            pl.BlockSpec((1, cp), lambda i, j: (0, 0)),
            pl.BlockSpec((cp, cp), lambda i, j: (0, 0)),
            pl.BlockSpec((1, cp), lambda i, j: (0, 0)),
        ],
        out_specs=pl.BlockSpec((None, tt, cp), lambda i, j: (i, j, 0)),
        compiler_params=pltpu.CompilerParams(
            dimension_semantics=("parallel", "parallel"),
            vmem_limit_bytes=VMEM_LIMIT),
        cost_estimate=pl.CostEstimate(flops=int(flops), transcendentals=0,
                                      bytes_accessed=bytes_acc),
    )(xp, blk["w1"], blk["b1"], blk["w2"], blk["b2"])


# ----------------------------------------------------------------------------
# Pallas kernel 3: vector quantization (argmin over codes + in-kernel histogram)
# Processes `sub` sub-tiles of 128 rows per grid step so the index output is a
# dense (8,128) int32 block.  Dequantize + commit loss are a tiny XLA epilogue.
# ----------------------------------------------------------------------------
def _vq_kernel(x_ref, cbt_ref, c2_ref, idx_ref, hist_ref, *, m_valid, sub, rows):
    g = pl.program_id(0)
    cbt = cbt_ref[...]                                      # (Cp, Kc_p) bf16
    c2 = c2_ref[...]                                        # (1, Kc_p) f32
    for s in range(sub):                                    # unrolled (<= 8)
        x = x_ref[pl.ds(s * rows, rows), :]                 # (rows, Cp) f32
        # bf16 MXU scores, f32 combine.  Exact torch.argmin tie parity would
        # require a HIGHEST-precision f32 matmul here (documented trade-off).
        scores = jnp.dot(x.astype(cbt.dtype), cbt,
                         preferred_element_type=jnp.float32)
        x2 = jnp.sum(x * x, axis=1, keepdims=True)
        d = x2 - 2.0 * scores + c2                          # (rows, Kc_p)
        dmin = jnp.min(d, axis=1, keepdims=True)
        iota_k = jax.lax.broadcasted_iota(jnp.int32, d.shape, 1)
        # first index achieving the minimum (torch.argmin tie behaviour)
        idx = jnp.min(jnp.where(d <= dmin, iota_k, jnp.int32(2 ** 30)), axis=1)
        idx_ref[pl.ds(s, 1), :] = idx[None, :].astype(jnp.int32)
        # per-tile codeword histogram partial (masked past the real M)
        row0 = g * (sub * rows) + s * rows
        rowid = row0 + jax.lax.broadcasted_iota(jnp.int32, (rows, 1), 0)
        valid = (rowid < m_valid).astype(jnp.float32)
        onehot = (iota_k == idx[:, None]).astype(jnp.float32) * valid
        hist_ref[pl.ds(s, 1), :] = jnp.sum(onehot, axis=0)[None, :]


def vq_quantize(x_flat, vqp):
    """x_flat: (M, Cp) f32 channel-padded.  vqp: pre-packed codebook tensors.
    Returns (idx (M,) int32, counts (Kc_p,) f32)."""
    m, cp = x_flat.shape
    cbt, c2 = vqp["cbt"], vqp["c2"]
    kc_p = cbt.shape[1]
    rows = LANE
    sub = min(8, _cdiv(m, rows))
    group = sub * rows
    n_g = _cdiv(m, group)
    m_p = n_g * group
    xp = x_flat if m_p == m else jnp.pad(x_flat, ((0, m_p - m), (0, 0)))

    kern = functools.partial(_vq_kernel, m_valid=m, sub=sub, rows=rows)
    idx2, hist = pl.pallas_call(
        kern,
        out_shape=(
            jax.ShapeDtypeStruct((n_g * sub, rows), jnp.int32),
            jax.ShapeDtypeStruct((n_g, sub, kc_p), jnp.float32),
        ),
        grid=(n_g,),
        in_specs=[
            pl.BlockSpec((group, cp), lambda g: (g, 0)),
            pl.BlockSpec((cp, kc_p), lambda g: (0, 0)),     # codebook resident
            pl.BlockSpec((1, kc_p), lambda g: (0, 0)),
        ],
        out_specs=(
            pl.BlockSpec((sub, rows), lambda g: (g, 0)),    # dense idx blocks
            pl.BlockSpec((None, sub, kc_p), lambda g: (g, 0, 0)),
        ),
        compiler_params=pltpu.CompilerParams(
            dimension_semantics=("parallel",),
            vmem_limit_bytes=VMEM_LIMIT),
        cost_estimate=pl.CostEstimate(
            flops=int(2 * m_p * cp * kc_p), transcendentals=0,
            bytes_accessed=int(m_p * cp * 4 + cp * kc_p * 2 + kc_p * 4
                               + m_p * 4 + n_g * sub * kc_p * 4)),
    )(xp, cbt, c2)

    idx = idx2.reshape(m_p)[:m]
    counts = jnp.sum(hist, axis=(0, 1))                     # (Kc_p,)
    return idx, counts


# ----------------------------------------------------------------------------
# Raw (PyTorch-layout) parameter construction + one-time packing outside jit
# ----------------------------------------------------------------------------
def _init_conv(key, cout, cin, k):
    kw, kb = jax.random.split(key)
    bound = 1.0 / math.sqrt(cin * k)
    w = jax.random.uniform(kw, (cout, cin, k), jnp.float32, -bound, bound)
    b = jax.random.uniform(kb, (cout,), jnp.float32, -bound, bound)
    return {"w": w, "b": b}


def build_params(key, cfg):
    input_dim = cfg["motion_dim"]
    width = cfg["dim"]
    code_dim = cfg["codebook_dim"]
    nb_code = cfg["codebook_size"]
    depth = cfg["depth"]
    down_t = cfg["down_sampling_ratio"] // 2
    stride_t = cfg["down_sampling_ratio"] // 2
    filter_t = stride_t * 2

    keys = iter(jax.random.split(key, 256))

    def res_params():
        return [{"c1": _init_conv(next(keys), width, width, 3),
                 "c2": _init_conv(next(keys), width, width, 1)}
                for _ in range(depth)]

    encoder = {
        "in": _init_conv(next(keys), width, input_dim, 3),
        "down": [{"conv": _init_conv(next(keys), width, width, filter_t),
                  "res": res_params()} for _ in range(down_t)],
        "out": _init_conv(next(keys), code_dim, width, 3),
    }
    decoder = {
        "in": _init_conv(next(keys), width, code_dim, 3),
        "up": [{"res": res_params(),
                "conv": _init_conv(next(keys), width, width, 3)}
               for _ in range(down_t)],
        "out1": _init_conv(next(keys), width, width, 3),
        "out2": _init_conv(next(keys), input_dim, width, 3),
    }
    codebook = jax.random.normal(next(keys), (nb_code, code_dim), jnp.float32)
    return {"encoder": encoder, "decoder": decoder, "codebook": codebook}


def _pad_wb(p, cin_p, cout_p):
    w, b = p["w"], p["b"]
    cout, cin, k = w.shape
    wp = jnp.pad(w, ((0, cout_p - cout), (0, cin_p - cin), (0, 0)))
    bp = jnp.pad(b.astype(jnp.float32), (0, cout_p - cout))
    return wp, bp, k


def _pack_conv(p, cin_p, cout_p):
    wp, bp, k = _pad_wb(p, cin_p, cout_p)
    wf = wp.transpose(2, 1, 0).reshape(k * cin_p, cout_p).astype(jnp.bfloat16)
    return {"w": wf, "b": bp.reshape(1, cout_p)}


def _pack_conv_strided(p, cin_p, cout_p, stride):
    """Space-to-depth fold: stride-s conv == stride-1 conv over s*Cin channels."""
    wp, bp, k = _pad_wb(p, cin_p, cout_p)
    assert k % stride == 0
    wr = wp.reshape(cout_p, cin_p, k // stride, stride).transpose(2, 3, 1, 0)
    wf = wr.reshape((k // stride) * stride * cin_p, cout_p).astype(jnp.bfloat16)
    return {"w": wf, "b": bp.reshape(1, cout_p)}


def _pack_conv_upsample(p, cin_p, cout_p):
    """Fold nearest-2x upsample + conv(k=3,pad=1) into ONE stride-1 conv whose
    output carries the even/odd phases in 2*Cout_p lanes (interleaved by a free
    reshape in the wrapper)."""
    wp, bp, k = _pad_wb(p, cin_p, cout_p)
    assert k == 3
    w0, w1, w2 = wp[:, :, 0].T, wp[:, :, 1].T, wp[:, :, 2].T   # (Cin_p, Cout_p)
    z = jnp.zeros_like(w0)
    tap0 = jnp.concatenate([w0, z], axis=1)                 # x[s-1]
    tap1 = jnp.concatenate([w1 + w2, w0 + w1], axis=1)      # x[s]
    tap2 = jnp.concatenate([z, w2], axis=1)                 # x[s+1]
    wf = jnp.concatenate([tap0, tap1, tap2], axis=0).astype(jnp.bfloat16)
    bf = jnp.concatenate([bp, bp]).reshape(1, 2 * cout_p)
    return {"w": wf, "b": bf}


def _pack_resblock(p, cp):
    c1 = _pack_conv(p["c1"], cp, cp)     # k=3 -> (3*cp, cp)
    c2 = _pack_conv(p["c2"], cp, cp)     # k=1 -> (cp, cp)
    return {"w1": c1["w"], "b1": c1["b"], "w2": c2["w"], "b2": c2["b"]}


def pack_params(params, cfg):
    """One-time (outside jit) packing: pad/transpose/fold/bf16 every weight."""
    motion_dim = cfg["motion_dim"]
    width = cfg["dim"]
    code_dim = cfg["codebook_dim"]
    nb_code = cfg["codebook_size"]
    stride_t = cfg["down_sampling_ratio"] // 2

    cin_p = _round_up(motion_dim, LANE)
    w_p = _round_up(width, LANE)
    cd_p = _round_up(code_dim, LANE)
    kc_p = _round_up(nb_code, LANE)

    enc, dec = params["encoder"], params["decoder"]
    packed_enc = {
        "in": _pack_conv(enc["in"], cin_p, w_p),
        "down": [{"conv": _pack_conv_strided(blk["conv"], w_p, w_p, stride_t),
                  "res": [_pack_resblock(rb, w_p) for rb in blk["res"]]}
                 for blk in enc["down"]],
        "out": _pack_conv(enc["out"], w_p, cd_p),
    }
    packed_dec = {
        "in": _pack_conv(dec["in"], cd_p, w_p),
        "up": [{"res": [_pack_resblock(rb, w_p) for rb in blk["res"]],
                "conv": _pack_conv_upsample(blk["conv"], w_p, w_p)}
               for blk in dec["up"]],
        "out1": _pack_conv(dec["out1"], w_p, w_p),
        "out2": _pack_conv(dec["out2"], w_p, cin_p),
    }

    cb = params["codebook"].astype(jnp.float32)              # (nb_code, code_dim)
    cb_pad = jnp.pad(cb, ((0, 0), (0, cd_p - code_dim)))     # f32, for gather
    cbt = jnp.pad(cb, ((0, kc_p - nb_code), (0, cd_p - code_dim))).T
    c2 = jnp.sum(cb * cb, axis=1)
    c2 = jnp.pad(c2, (0, kc_p - nb_code))
    c2 = jnp.where(jnp.arange(kc_p) < nb_code, c2, 1e30).reshape(1, kc_p)
    packed_vq = {"cbt": cbt.astype(jnp.bfloat16), "c2": c2.astype(jnp.float32),
                 "cb_pad": cb_pad}
    return {"encoder": packed_enc, "decoder": packed_dec, "vq": packed_vq}


# ----------------------------------------------------------------------------
# Model forward (mirrors VQVAE / HumanVQVAE.forward)
# ----------------------------------------------------------------------------
def make_forward(cfg):
    depth = cfg["depth"]
    dgr = cfg["dilation_growth_rate"]
    stride_t = cfg["down_sampling_ratio"] // 2
    pad_t = stride_t // 2
    filter_t = stride_t * 2
    nb_code = cfg["codebook_size"]
    code_dim = cfg["codebook_dim"]
    motion_dim = cfg["motion_dim"]
    cin_p = _round_up(motion_dim, LANE)
    # Resnet1D uses reverse_dilation=True -> dilations [dgr^(depth-1), ..., 1]
    dilations = [dgr ** i for i in range(depth)][::-1]

    def res_chain(x, blocks):
        for rb, dil in zip(blocks, dilations):
            x = resblock_call(x, rb, dilation=dil)
        return x

    def down_conv(x, layer):
        n, t, cp = x.shape
        tp = t + 2 * pad_t
        t_out = (tp - filter_t) // stride_t + 1
        tp_pad = _round_up(tp, stride_t)
        xp = jnp.pad(x, ((0, 0), (pad_t, tp_pad - t - pad_t), (0, 0)))
        xf = xp.reshape(n, tp_pad // stride_t, stride_t * cp)
        return _conv_call(xf, layer["w"], layer["b"], taps=filter_t // stride_t,
                          dilation=1, t_out=t_out)

    def upsample_conv(x, layer):
        n, t, _ = x.shape
        y = conv1d_packed(x, layer, taps=3, padding=1)       # (n, t, 2*Cout_p)
        out_p = y.shape[-1] // 2
        return y.reshape(n, 2 * t, out_p)                    # free interleave

    def encoder_fwd(x, p):
        x = conv1d_packed(x, p["in"], taps=3, padding=1, post_relu=True)
        for blk in p["down"]:
            x = down_conv(x, blk["conv"])
            x = res_chain(x, blk["res"])
        return conv1d_packed(x, p["out"], taps=3, padding=1,
                             out_dtype=jnp.float32)          # f32 feed for VQ

    def decoder_fwd(x, p):
        x = conv1d_packed(x, p["in"], taps=3, padding=1, post_relu=True)
        for blk in p["up"]:
            x = res_chain(x, blk["res"])
            x = upsample_conv(x, blk["conv"])                # fused 2x upsample
        x = conv1d_packed(x, p["out1"], taps=3, padding=1, post_relu=True)
        return conv1d_packed(x, p["out2"], taps=3, padding=1,
                             out_dtype=jnp.float32)

    def forward(params, motion, mask=None):
        n, t, c_in = motion.shape
        assert c_in == motion_dim
        # preprocess: stay channel-last, lane-pad, bf16 (no NCT transpose)
        x = jnp.pad(motion.astype(jnp.float32),
                    ((0, 0), (0, 0), (0, cin_p - c_in))).astype(jnp.bfloat16)

        x_enc = encoder_fwd(x, params["encoder"])            # (N, T_enc, Cp) f32
        if mask is not None:
            # reference hard-codes max_pool1d(mask, 1, stride=4) == mask[:, ::4]
            ds_mask = mask.astype(jnp.float32)[:, ::4]
            x_enc = x_enc * ds_mask[:, :, None]

        t_enc, cp = x_enc.shape[1], x_enc.shape[2]
        m_total = n * t_enc
        x_flat = x_enc.reshape(m_total, cp)

        idx, counts = vq_quantize(x_flat, params["vq"])

        # dequantize / commit loss / perplexity epilogue (tiny, mem-bound)
        xd_flat = jnp.take(params["vq"]["cb_pad"], idx, axis=0)      # (M, Cp) f32
        commit_loss = jnp.sum((x_flat - xd_flat) ** 2) / float(m_total * code_dim)
        prob = counts[:nb_code] / float(m_total)
        perplexity = jnp.exp(-jnp.sum(prob * jnp.log(prob + 1e-7)))

        x_q = xd_flat.reshape(n, t_enc, cp)    # straight-through forward value
        if mask is not None:
            x_q = x_q * ds_mask[:, :, None]

        x_dec = decoder_fwd(x_q.astype(jnp.bfloat16), params["decoder"])
        x_out = x_dec[:, :, :c_in]                           # drop lane padding
        if mask is not None:
            x_out = x_out * mask.astype(jnp.float32)[:, :, None]

        # TODO(synk): EMA codebook update / kmeans init are training-only state
        # updates and are not part of the inference forward pass implemented here.
        return {
            "decoded_motion": x_out,
            "indices": idx,
            "commit_loss": commit_loss,
            "perplexity": perplexity,
            "quantized_motion": x_q[:, :, :code_dim],
        }

    return forward


# ----------------------------------------------------------------------------
if __name__ == "__main__":
    # Small config consistent with HumanVQVAE(args):
    #   down_sampling_ratio=4 -> down_t=stride_t=2 (total temporal downsample 4x)
    cfg = dict(
        motion_dim=8,
        codebook_size=32,
        codebook_dim=16,
        down_sampling_ratio=4,
        dim=16,
        depth=2,
        dilation_growth_rate=3,
    )
    N, T = 2, 16

    key = jax.random.PRNGKey(0)
    k_params, k_data = jax.random.split(key)
    raw_params = build_params(k_params, cfg)
    packed_params = pack_params(raw_params, cfg)    # one-time packing outside jit
    motion = jax.random.normal(k_data, (N, T, cfg["motion_dim"]), jnp.float32)

    forward = jax.jit(make_forward(cfg))
    out = forward(packed_params, motion)
    jax.block_until_ready(out)

    T_enc = T // 4
    assert out["decoded_motion"].shape == (N, T, cfg["motion_dim"])
    assert out["indices"].shape == (N * T_enc,)
    assert out["quantized_motion"].shape == (N, T_enc, cfg["codebook_dim"])
    assert out["commit_loss"].shape == ()
    assert out["perplexity"].shape == ()
    assert bool(jnp.all(jnp.isfinite(out["decoded_motion"])))
    print("KERNEL_OK")
</pallas_src>

<mosaic_0001>
module attributes {stable_mosaic.version = 11 : i64} {
  func.func @_conv_kernel(%arg0: i32, %arg1: i32, %arg2: memref<1x18x128xbf16, #tpu.memory_space<vmem>>, %arg3: memref<384x128xbf16, #tpu.memory_space<vmem>>, %arg4: memref<1x128xf32, #tpu.memory_space<vmem>>, %arg5: memref<1x16x128xbf16, #tpu.memory_space<vmem>>) attributes {dimension_semantics = [#tpu.dimension_semantics<parallel>, #tpu.dimension_semantics<parallel>], iteration_bounds = array<i64: 2, 1>, scalar_prefetch = 0 : i64, scratch_operands = 0 : i64, tpu.core_type = #tpu.core_type<tc>, window_params = [{transform_indices = @transform_0, window_bounds = array<i64: 1, 18, 128>}, {pipeline_mode = #tpu.pipeline_mode<synchronous>, transform_indices = @transform_1, window_bounds = array<i64: 384, 128>}, {pipeline_mode = #tpu.pipeline_mode<synchronous>, transform_indices = @transform_2, window_bounds = array<i64: 1, 128>}, {transform_indices = @transform_3, window_bounds = array<i64: 1, 16, 128>}]} {
    %c0 = arith.constant 0 : index
    %c0_0 = arith.constant 0 : index
    %c0_1 = arith.constant 0 : index
    %0 = vector.load %arg2[%c0, %c0_0, %c0_1] : memref<1x18x128xbf16, #tpu.memory_space<vmem>>, vector<1x18x128xbf16>
    %1 = vector.shape_cast %0 : vector<1x18x128xbf16> to vector<18x128xbf16>
    %2 = vector.extract_strided_slice %1 {offsets = [0, 0], sizes = [16, 128], strides = [1, 1]} : vector<18x128xbf16> to vector<16x128xbf16>
    %3 = vector.extract_strided_slice %1 {offsets = [1, 0], sizes = [16, 128], strides = [1, 1]} : vector<18x128xbf16> to vector<16x128xbf16>
    %4 = vector.extract_strided_slice %1 {offsets = [2, 0], sizes = [16, 128], strides = [1, 1]} : vector<18x128xbf16> to vector<16x128xbf16>
    %5 = tpu.concatenate %2, %3, %4 in 1 : vector<16x128xbf16>, vector<16x128xbf16>, vector<16x128xbf16> -> vector<16x384xbf16>
    %c0_2 = arith.constant 0 : index
    %c0_3 = arith.constant 0 : index
    %6 = vector.load %arg3[%c0_2, %c0_3] : memref<384x128xbf16, #tpu.memory_space<vmem>>, vector<384x128xbf16>
    %cst = arith.constant dense<0.000000e+00> : vector<16x128xf32>
    %7 = tpu.matmul %5, %6, %cst {dimension_numbers = #tpu.dot_dimension_numbers<[1], [0], [0], [1], [0, 0, 1, 1], [], []>} : vector<16x384xbf16>, vector<384x128xbf16>, vector<16x128xf32> -> vector<16x128xf32>
    %c0_4 = arith.constant 0 : index
    %c0_5 = arith.constant 0 : index
    %8 = vector.load %arg4[%c0_4, %c0_5] : memref<1x128xf32, #tpu.memory_space<vmem>>, vector<1x128xf32>
    %9 = vector.broadcast %8 : vector<1x128xf32> to vector<16x128xf32>
    %10 = arith.addf %7, %9 : vector<16x128xf32>
    %cst_6 = arith.constant 0.000000e+00 : f32
    %11 = vector.broadcast %cst_6 : f32 to vector<16x128xf32>
    %12 = arith.maximumf %10, %11 : vector<16x128xf32>
    %13 = arith.truncf %12 : vector<16x128xf32> to vector<16x128xbf16>
    %c0_7 = arith.constant 0 : index
    %c0_8 = arith.constant 0 : index
    %c0_9 = arith.constant 0 : index
    %14 = vector.load %arg5[%c0_7, %c0_8, %c0_9] : memref<1x16x128xbf16, #tpu.memory_space<vmem>>, vector<1x16x128xbf16>
    %15 = vector.shape_cast %14 : vector<1x16x128xbf16> to vector<16x128xbf16>
    %16 = vector.shape_cast %13 : vector<16x128xbf16> to vector<1x16x128xbf16>
    tpu.vector_store %arg5[%c0_7, %c0_8, %c0_9], %16 {strides = array<i32>} : memref<1x16x128xbf16, #tpu.memory_space<vmem>>, vector<1x16x128xbf16>,
    return
  }
  func.func @transform_0(%arg0: i32, %arg1: i32) -> (i32, i32, i32) {
    %c0_i32 = arith.constant 0 : i32
    %c0_i32_0 = arith.constant 0 : i32
    %c0_i32_1 = arith.constant 0 : i32
    return %arg0, %c0_i32, %c0_i32_0 : i32, i32, i32
  }
  func.func @transform_1(%arg0: i32, %arg1: i32) -> (i32, i32) {
    %c0_i32 = arith.constant 0 : i32
    %c0_i32_0 = arith.constant 0 : i32
    %c0_i32_1 = arith.constant 0 : i32
    return %c0_i32, %c0_i32_0 : i32, i32
  }
  func.func @transform_2(%arg0: i32, %arg1: i32) -> (i32, i32) {
    %c0_i32 = arith.constant 0 : i32
    %c0_i32_0 = arith.constant 0 : i32
    %c0_i32_1 = arith.constant 0 : i32
    return %c0_i32, %c0_i32_0 : i32, i32
  }
  func.func @transform_3(%arg0: i32, %arg1: i32) -> (i32, i32, i32) {
    %c0_i32 = arith.constant 0 : i32
    %c0_i32_0 = arith.constant 0 : i32
    return %arg0, %arg1, %c0_i32 : i32, i32, i32
  }
}

module attributes {stable_mosaic.version = 11 : i64} {
  func.func @_conv_kernel(%arg0: i32, %arg1: i32, %arg2: memref<1x9x256xbf16, #tpu.memory_space<vmem>>, %arg3: memref<512x128xbf16, #tpu.memory_space<vmem>>, %arg4: memref<1x128xf32, #tpu.memory_space<vmem>>, %arg5: memref<1x8x128xbf16, #tpu.memory_space<vmem>>) attributes {dimension_semantics = [#tpu.dimension_semantics<parallel>, #tpu.dimension_semantics<parallel>], iteration_bounds = array<i64: 2, 1>, scalar_prefetch = 0 : i64, scratch_operands = 0 : i64, tpu.core_type = #tpu.core_type<tc>, window_params = [{transform_indices = @transform_0, window_bounds = array<i64: 1, 9, 256>}, {pipeline_mode = #tpu.pipeline_mode<synchronous>, transform_indices = @transform_1, window_bounds = array<i64: 512, 128>}, {pipeline_mode = #tpu.pipeline_mode<synchronous>, transform_indices = @transform_2, window_bounds = array<i64: 1, 128>}, {transform_indices = @transform_3, window_bounds = array<i64: 1, 8, 128>}]} {
    %c0 = arith.constant 0 : index
    %c0_0 = arith.constant 0 : index
    %c0_1 = arith.constant 0 : index
    %0 = vector.load %arg2[%c0, %c0_0, %c0_1] : memref<1x9x256xbf16, #tpu.memory_space<vmem>>, vector<1x9x256xbf16>
    %1 = vector.shape_cast %0 : vector<1x9x256xbf16> to vector<9x256xbf16>
    %2 = vector.extract_strided_slice %1 {offsets = [0, 0], sizes = [8, 256], strides = [1, 1]} : vector<9x256xbf16> to vector<8x256xbf16>
    %3 = vector.extract_strided_slice %1 {offsets = [1, 0], sizes = [8, 256], strides = [1, 1]} : vector<9x256xbf16> to vector<8x256xbf16>
    %4 = tpu.concatenate %2, %3 in 1 : vector<8x256xbf16>, vector<8x256xbf16> -> vector<8x512xbf16>
    %c0_2 = arith.constant 0 : index
    %c0_3 = arith.constant 0 : index
    %5 = vector.load %arg3[%c0_2, %c0_3] : memref<512x128xbf16, #tpu.memory_space<vmem>>, vector<512x128xbf16>
    %cst = arith.constant dense<0.000000e+00> : vector<8x128xf32>
    %6 = tpu.matmul %4, %5, %cst {dimension_numbers = #tpu.dot_dimension_numbers<[1], [0], [0], [1], [0, 0, 1, 1], [], []>} : vector<8x512xbf16>, vector<512x128xbf16>, vector<8x128xf32> -> vector<8x128xf32>
    %c0_4 = arith.constant 0 : index
    %c0_5 = arith.constant 0 : index
    %7 = vector.load %arg4[%c0_4, %c0_5] : memref<1x128xf32, #tpu.memory_space<vmem>>, vector<1x128xf32>
    %8 = vector.broadcast %7 : vector<1x128xf32> to vector<8x128xf32>
    %9 = arith.addf %6, %8 : vector<8x128xf32>
    %10 = arith.truncf %9 : vector<8x128xf32> to vector<8x128xbf16>
    %c0_6 = arith.constant 0 : index
    %c0_7 = arith.constant 0 : index
    %c0_8 = arith.constant 0 : index
    %11 = vector.load %arg5[%c0_6, %c0_7, %c0_8] : memref<1x8x128xbf16, #tpu.memory_space<vmem>>, vector<1x8x128xbf16>
    %12 = vector.shape_cast %11 : vector<1x8x128xbf16> to vector<8x128xbf16>
    %13 = vector.shape_cast %10 : vector<8x128xbf16> to vector<1x8x128xbf16>
    tpu.vector_store %arg5[%c0_6, %c0_7, %c0_8], %13 {strides = array<i32>} : memref<1x8x128xbf16, #tpu.memory_space<vmem>>, vector<1x8x128xbf16>,
    return
  }
  func.func @transform_0(%arg0: i32, %arg1: i32) -> (i32, i32, i32) {
    %c0_i32 = arith.constant 0 : i32
    %c0_i32_0 = arith.constant 0 : i32
    %c0_i32_1 = arith.constant 0 : i32
    return %arg0, %c0_i32, %c0_i32_0 : i32, i32, i32
  }
  func.func @transform_1(%arg0: i32, %arg1: i32) -> (i32, i32) {
    %c0_i32 = arith.constant 0 : i32
    %c0_i32_0 = arith.constant 0 : i32
    %c0_i32_1 = arith.constant 0 : i32
    return %c0_i32, %c0_i32_0 : i32, i32
  }
  func.func @transform_2(%arg0: i32, %arg1: i32) -> (i32, i32) {
    %c0_i32 = arith.constant 0 : i32
    %c0_i32_0 = arith.constant 0 : i32
    %c0_i32_1 = arith.constant 0 : i32
    return %c0_i32, %c0_i32_0 : i32, i32
  }
  func.func @transform_3(%arg0: i32, %arg1: i32) -> (i32, i32, i32) {
    %c0_i32 = arith.constant 0 : i32
    %c0_i32_0 = arith.constant 0 : i32
    return %arg0, %arg1, %c0_i32 : i32, i32, i32
  }
}

module attributes {stable_mosaic.version = 11 : i64} {
  func.func @_resblock_kernel(%arg0: i32, %arg1: i32, %arg2: memref<1x14x128xbf16, #tpu.memory_space<vmem>>, %arg3: memref<384x128xbf16, #tpu.memory_space<vmem>>, %arg4: memref<1x128xf32, #tpu.memory_space<vmem>>, %arg5: memref<128x128xbf16, #tpu.memory_space<vmem>>, %arg6: memref<1x128xf32, #tpu.memory_space<vmem>>, %arg7: memref<1x8x128xbf16, #tpu.memory_space<vmem>>) attributes {dimension_semantics = [#tpu.dimension_semantics<parallel>, #tpu.dimension_semantics<parallel>], iteration_bounds = array<i64: 2, 1>, scalar_prefetch = 0 : i64, scratch_operands = 0 : i64, tpu.core_type = #tpu.core_type<tc>, window_params = [{transform_indices = @transform_0, window_bounds = array<i64: 1, 14, 128>}, {pipeline_mode = #tpu.pipeline_mode<synchronous>, transform_indices = @transform_1, window_bounds = array<i64: 384, 128>}, {pipeline_mode = #tpu.pipeline_mode<synchronous>, transform_indices = @transform_2, window_bounds = array<i64: 1, 128>}, {pipeline_mode = #tpu.pipeline_mode<synchronous>, transform_indices = @transform_3, window_bounds = array<i64: 128, 128>}, {pipeline_mode = #tpu.pipeline_mode<synchronous>, transform_indices = @transform_4, window_bounds = array<i64: 1, 128>}, {transform_indices = @transform_5, window_bounds = array<i64: 1, 8, 128>}]} {
    %c0 = arith.constant 0 : index
    %c0_0 = arith.constant 0 : index
    %c0_1 = arith.constant 0 : index
    %0 = vector.load %arg2[%c0, %c0_0, %c0_1] : memref<1x14x128xbf16, #tpu.memory_space<vmem>>, vector<1x14x128xbf16>
    %1 = vector.shape_cast %0 : vector<1x14x128xbf16> to vector<14x128xbf16>
    %2 = vector.extract_strided_slice %1 {offsets = [3, 0], sizes = [8, 128], strides = [1, 1]} : vector<14x128xbf16> to vector<8x128xbf16>
    %cst = arith.constant 0.000000e+00 : bf16
    %3 = vector.broadcast %cst : bf16 to vector<14x128xbf16>
    %4 = arith.maximumf %1, %3 : vector<14x128xbf16>
    %5 = vector.extract_strided_slice %4 {offsets = [0, 0], sizes = [8, 128], strides = [1, 1]} : vector<14x128xbf16> to vector<8x128xbf16>
    %6 = vector.extract_strided_slice %4 {offsets = [3, 0], sizes = [8, 128], strides = [1, 1]} : vector<14x128xbf16> to vector<8x128xbf16>
    %7 = vector.extract_strided_slice %4 {offsets = [6, 0], sizes = [8, 128], strides = [1, 1]} : vector<14x128xbf16> to vector<8x128xbf16>
    %8 = tpu.concatenate %5, %6, %7 in 1 : vector<8x128xbf16>, vector<8x128xbf16>, vector<8x128xbf16> -> vector<8x384xbf16>
    %c0_2 = arith.constant 0 : index
    %c0_3 = arith.constant 0 : index
    %9 = vector.load %arg3[%c0_2, %c0_3] : memref<384x128xbf16, #tpu.memory_space<vmem>>, vector<384x128xbf16>
    %cst_4 = arith.constant dense<0.000000e+00> : vector<8x128xf32>
    %10 = tpu.matmul %8, %9, %cst_4 {dimension_numbers = #tpu.dot_dimension_numbers<[1], [0], [0], [1], [0, 0, 1, 1], [], []>} : vector<8x384xbf16>, vector<384x128xbf16>, vector<8x128xf32> -> vector<8x128xf32>
    %c0_5 = arith.constant 0 : index
    %c0_6 = arith.constant 0 : index
    %11 = vector.load %arg4[%c0_5, %c0_6] : memref<1x128xf32, #tpu.memory_space<vmem>>, vector<1x128xf32>
    %12 = vector.broadcast %11 : vector<1x128xf32> to vector<8x128xf32>
    %13 = arith.addf %10, %12 : vector<8x128xf32>
    %cst_7 = arith.constant 0.000000e+00 : f32
    %14 = vector.broadcast %cst_7 : f32 to vector<8x128xf32>
    %15 = arith.maximumf %13, %14 : vector<8x128xf32>
    %16 = arith.truncf %15 : vector<8x128xf32> to vector<8x128xbf16>
    %c0_8 = arith.constant 0 : index
    %c0_9 = arith.constant 0 : index
    %17 = vector.load %arg5[%c0_8, %c0_9] : memref<128x128xbf16, #tpu.memory_space<vmem>>, vector<128x128xbf16>
    %cst_10 = arith.constant dense<0.000000e+00> : vector<8x128xf32>
    %18 = tpu.matmul %16, %17, %cst_10 {dimension_numbers = #tpu.dot_dimension_numbers<[1], [0], [0], [1], [0, 0, 1, 1], [], []>} : vector<8x128xbf16>, vector<128x128xbf16>, vector<8x128xf32> -> vector<8x128xf32>
    %c0_11 = arith.constant 0 : index
    %c0_12 = arith.constant 0 : index
    %19 = vector.load %arg6[%c0_11, %c0_12] : memref<1x128xf32, #tpu.memory_space<vmem>>, vector<1x128xf32>
    %20 = vector.broadcast %19 : vector<1x128xf32> to vector<8x128xf32>
    %21 = arith.addf %18, %20 : vector<8x128xf32>
    %22 = arith.extf %2 : vector<8x128xbf16> to vector<8x128xf32>
    %23 = arith.addf %21, %22 : vector<8x128xf32>
    %24 = arith.truncf %23 : vector<8x128xf32> to vector<8x128xbf16>
    %c0_13 = arith.constant 0 : index
    %c0_14 = arith.constant 0 : index
    %c0_15 = arith.constant 0 : index
    %25 = vector.load %arg7[%c0_13, %c0_14, %c0_15] : memref<1x8x128xbf16, #tpu.memory_space<vmem>>, vector<1x8x128xbf16>
    %26 = vector.shape_cast %25 : vector<1x8x128xbf16> to vector<8x128xbf16>
    %27 = vector.shape_cast %24 : vector<8x128xbf16> to vector<1x8x128xbf16>
    tpu.vector_store %arg7[%c0_13, %c0_14, %c0_15], %27 {strides = array<i32>} : memref<1x8x128xbf16, #tpu.memory_space<vmem>>, vector<1x8x128xbf16>,
    return
  }
  func.func @transform_0(%arg0: i32, %arg1: i32) -> (i32, i32, i32) {
    %c0_i32 = arith.constant 0 : i32
    %c0_i32_0 = arith.constant 0 : i32
    %c0_i32_1 = arith.constant 0 : i32
    return %arg0, %c0_i32, %c0_i32_0 : i32, i32, i32
  }
  func.func @transform_1(%arg0: i32, %arg1: i32) -> (i32, i32) {
    %c0_i32 = arith.constant 0 : i32
    %c0_i32_0 = arith.constant 0 : i32
    %c0_i32_1 = arith.constant 0 : i32
    return %c0_i32, %c0_i32_0 : i32, i32
  }
  func.func @transform_2(%arg0: i32, %arg1: i32) -> (i32, i32) {
    %c0_i32 = arith.constant 0 : i32
    %c0_i32_0 = arith.constant 0 : i32
    %c0_i32_1 = arith.constant 0 : i32
    return %c0_i32, %c0_i32_0 : i32, i32
  }
  func.func @transform_3(%arg0: i32, %arg1: i32) -> (i32, i32) {
    %c0_i32 = arith.constant 0 : i32
    %c0_i32_0 = arith.constant 0 : i32
    %c0_i32_1 = arith.constant 0 : i32
    return %c0_i32, %c0_i32_0 : i32, i32
  }
  func.func @transform_4(%arg0: i32, %arg1: i32) -> (i32, i32) {
    %c0_i32 = arith.constant 0 : i32
    %c0_i32_0 = arith.constant 0 : i32
    %c0_i32_1 = arith.constant 0 : i32
    return %c0_i32, %c0_i32_0 : i32, i32
  }
  func.func @transform_5(%arg0: i32, %arg1: i32) -> (i32, i32, i32) {
    %c0_i32 = arith.constant 0 : i32
    %c0_i32_0 = arith.constant 0 : i32
    return %arg0, %arg1, %c0_i32 : i32, i32, i32
  }
}

module attributes {stable_mosaic.version = 11 : i64} {
  func.func @_resblock_kernel(%arg0: i32, %arg1: i32, %arg2: memref<1x10x128xbf16, #tpu.memory_space<vmem>>, %arg3: memref<384x128xbf16, #tpu.memory_space<vmem>>, %arg4: memref<1x128xf32, #tpu.memory_space<vmem>>, %arg5: memref<128x128xbf16, #tpu.memory_space<vmem>>, %arg6: memref<1x128xf32, #tpu.memory_space<vmem>>, %arg7: memref<1x8x128xbf16, #tpu.memory_space<vmem>>) attributes {dimension_semantics = [#tpu.dimension_semantics<parallel>, #tpu.dimension_semantics<parallel>], iteration_bounds = array<i64: 2, 1>, scalar_prefetch = 0 : i64, scratch_operands = 0 : i64, tpu.core_type = #tpu.core_type<tc>, window_params = [{transform_indices = @transform_0, window_bounds = array<i64: 1, 10, 128>}, {pipeline_mode = #tpu.pipeline_mode<synchronous>, transform_indices = @transform_1, window_bounds = array<i64: 384, 128>}, {pipeline_mode = #tpu.pipeline_mode<synchronous>, transform_indices = @transform_2, window_bounds = array<i64: 1, 128>}, {pipeline_mode = #tpu.pipeline_mode<synchronous>, transform_indices = @transform_3, window_bounds = array<i64: 128, 128>}, {pipeline_mode = #tpu.pipeline_mode<synchronous>, transform_indices = @transform_4, window_bounds = array<i64: 1, 128>}, {transform_indices = @transform_5, window_bounds = array<i64: 1, 8, 128>}]} {
    %c0 = arith.constant 0 : index
    %c0_0 = arith.constant 0 : index
    %c0_1 = arith.constant 0 : index
    %0 = vector.load %arg2[%c0, %c0_0, %c0_1] : memref<1x10x128xbf16, #tpu.memory_space<vmem>>, vector<1x10x128xbf16>
    %1 = vector.shape_cast %0 : vector<1x10x128xbf16> to vector<10x128xbf16>
    %2 = vector.extract_strided_slice %1 {offsets = [1, 0], sizes = [8, 128], strides = [1, 1]} : vector<10x128xbf16> to vector<8x128xbf16>
    %cst = arith.constant 0.000000e+00 : bf16
    %3 = vector.broadcast %cst : bf16 to vector<10x128xbf16>
    %4 = arith.maximumf %1, %3 : vector<10x128xbf16>
    %5 = vector.extract_strided_slice %4 {offsets = [0, 0], sizes = [8, 128], strides = [1, 1]} : vector<10x128xbf16> to vector<8x128xbf16>
    %6 = vector.extract_strided_slice %4 {offsets = [1, 0], sizes = [8, 128], strides = [1, 1]} : vector<10x128xbf16> to vector<8x128xbf16>
    %7 = vector.extract_strided_slice %4 {offsets = [2, 0], sizes = [8, 128], strides = [1, 1]} : vector<10x128xbf16> to vector<8x128xbf16>
    %8 = tpu.concatenate %5, %6, %7 in 1 : vector<8x128xbf16>, vector<8x128xbf16>, vector<8x128xbf16> -> vector<8x384xbf16>
    %c0_2 = arith.constant 0 : index
    %c0_3 = arith.constant 0 : index
    %9 = vector.load %arg3[%c0_2, %c0_3] : memref<384x128xbf16, #tpu.memory_space<vmem>>, vector<384x128xbf16>
    %cst_4 = arith.constant dense<0.000000e+00> : vector<8x128xf32>
    %10 = tpu.matmul %8, %9, %cst_4 {dimension_numbers = #tpu.dot_dimension_numbers<[1], [0], [0], [1], [0, 0, 1, 1], [], []>} : vector<8x384xbf16>, vector<384x128xbf16>, vector<8x128xf32> -> vector<8x128xf32>
    %c0_5 = arith.constant 0 : index
    %c0_6 = arith.constant 0 : index
    %11 = vector.load %arg4[%c0_5, %c0_6] : memref<1x128xf32, #tpu.memory_space<vmem>>, vector<1x128xf32>
    %12 = vector.broadcast %11 : vector<1x128xf32> to vector<8x128xf32>
    %13 = arith.addf %10, %12 : vector<8x128xf32>
    %cst_7 = arith.constant 0.000000e+00 : f32
    %14 = vector.broadcast %cst_7 : f32 to vector<8x128xf32>
    %15 = arith.maximumf %13, %14 : vector<8x128xf32>
    %16 = arith.truncf %15 : vector<8x128xf32> to vector<8x128xbf16>
    %c0_8 = arith.constant 0 : index
    %c0_9 = arith.constant 0 : index
    %17 = vector.load %arg5[%c0_8, %c0_9] : memref<128x128xbf16, #tpu.memory_space<vmem>>, vector<128x128xbf16>
    %cst_10 = arith.constant dense<0.000000e+00> : vector<8x128xf32>
    %18 = tpu.matmul %16, %17, %cst_10 {dimension_numbers = #tpu.dot_dimension_numbers<[1], [0], [0], [1], [0, 0, 1, 1], [], []>} : vector<8x128xbf16>, vector<128x128xbf16>, vector<8x128xf32> -> vector<8x128xf32>
    %c0_11 = arith.constant 0 : index
    %c0_12 = arith.constant 0 : index
    %19 = vector.load %arg6[%c0_11, %c0_12] : memref<1x128xf32, #tpu.memory_space<vmem>>, vector<1x128xf32>
    %20 = vector.broadcast %19 : vector<1x128xf32> to vector<8x128xf32>
    %21 = arith.addf %18, %20 : vector<8x128xf32>
    %22 = arith.extf %2 : vector<8x128xbf16> to vector<8x128xf32>
    %23 = arith.addf %21, %22 : vector<8x128xf32>
    %24 = arith.truncf %23 : vector<8x128xf32> to vector<8x128xbf16>
    %c0_13 = arith.constant 0 : index
    %c0_14 = arith.constant 0 : index
    %c0_15 = arith.constant 0 : index
    %25 = vector.load %arg7[%c0_13, %c0_14, %c0_15] : memref<1x8x128xbf16, #tpu.memory_space<vmem>>, vector<1x8x128xbf16>
    %26 = vector.shape_cast %25 : vector<1x8x128xbf16> to vector<8x128xbf16>
    %27 = vector.shape_cast %24 : vector<8x128xbf16> to vector<1x8x128xbf16>
    tpu.vector_store %arg7[%c0_13, %c0_14, %c0_15], %27 {strides = array<i32>} : memref<1x8x128xbf16, #tpu.memory_space<vmem>>, vector<1x8x128xbf16>,
    return
  }
  func.func @transform_0(%arg0: i32, %arg1: i32) -> (i32, i32, i32) {
    %c0_i32 = arith.constant 0 : i32
    %c0_i32_0 = arith.constant 0 : i32
    %c0_i32_1 = arith.constant 0 : i32
    return %arg0, %c0_i32, %c0_i32_0 : i32, i32, i32
  }
  func.func @transform_1(%arg0: i32, %arg1: i32) -> (i32, i32) {
    %c0_i32 = arith.constant 0 : i32
    %c0_i32_0 = arith.constant 0 : i32
    %c0_i32_1 = arith.constant 0 : i32
    return %c0_i32, %c0_i32_0 : i32, i32
  }
  func.func @transform_2(%arg0: i32, %arg1: i32) -> (i32, i32) {
    %c0_i32 = arith.constant 0 : i32
    %c0_i32_0 = arith.constant 0 : i32
    %c0_i32_1 = arith.constant 0 : i32
    return %c0_i32, %c0_i32_0 : i32, i32
  }
  func.func @transform_3(%arg0: i32, %arg1: i32) -> (i32, i32) {
    %c0_i32 = arith.constant 0 : i32
    %c0_i32_0 = arith.constant 0 : i32
    %c0_i32_1 = arith.constant 0 : i32
    return %c0_i32, %c0_i32_0 : i32, i32
  }
  func.func @transform_4(%arg0: i32, %arg1: i32) -> (i32, i32) {
    %c0_i32 = arith.constant 0 : i32
    %c0_i32_0 = arith.constant 0 : i32
    %c0_i32_1 = arith.constant 0 : i32
    return %c0_i32, %c0_i32_0 : i32, i32
  }
  func.func @transform_5(%arg0: i32, %arg1: i32) -> (i32, i32, i32) {
    %c0_i32 = arith.constant 0 : i32
    %c0_i32_0 = arith.constant 0 : i32
    return %arg0, %arg1, %c0_i32 : i32, i32, i32
  }
}

module attributes {stable_mosaic.version = 11 : i64} {
  func.func @_resblock_kernel(%arg0: i32, %arg1: i32, %arg2: memref<1x10x128xbf16, #tpu.memory_space<vmem>>, %arg3: memref<384x128xbf16, #tpu.memory_space<vmem>>, %arg4: memref<1x128xf32, #tpu.memory_space<vmem>>, %arg5: memref<128x128xbf16, #tpu.memory_space<vmem>>, %arg6: memref<1x128xf32, #tpu.memory_space<vmem>>, %arg7: memref<1x4x128xbf16, #tpu.memory_space<vmem>>) attributes {dimension_semantics = [#tpu.dimension_semantics<parallel>, #tpu.dimension_semantics<parallel>], iteration_bounds = array<i64: 2, 1>, scalar_prefetch = 0 : i64, scratch_operands = 0 : i64, tpu.core_type = #tpu.core_type<tc>, window_params = [{transform_indices = @transform_0, window_bounds = array<i64: 1, 10, 128>}, {pipeline_mode = #tpu.pipeline_mode<synchronous>, transform_indices = @transform_1, window_bounds = array<i64: 384, 128>}, {pipeline_mode = #tpu.pipeline_mode<synchronous>, transform_indices = @transform_2, window_bounds = array<i64: 1, 128>}, {pipeline_mode = #tpu.pipeline_mode<synchronous>, transform_indices = @transform_3, window_bounds = array<i64: 128, 128>}, {pipeline_mode = #tpu.pipeline_mode<synchronous>, transform_indices = @transform_4, window_bounds = array<i64: 1, 128>}, {transform_indices = @transform_5, window_bounds = array<i64: 1, 4, 128>}]} {
    %c0 = arith.constant 0 : index
    %c0_0 = arith.constant 0 : index
    %c0_1 = arith.constant 0 : index
    %0 = vector.load %arg2[%c0, %c0_0, %c0_1] : memref<1x10x128xbf16, #tpu.memory_space<vmem>>, vector<1x10x128xbf16>
    %1 = vector.shape_cast %0 : vector<1x10x128xbf16> to vector<10x128xbf16>
    %2 = vector.extract_strided_slice %1 {offsets = [3, 0], sizes = [4, 128], strides = [1, 1]} : vector<10x128xbf16> to vector<4x128xbf16>
    %cst = arith.constant 0.000000e+00 : bf16
    %3 = vector.broadcast %cst : bf16 to vector<10x128xbf16>
    %4 = arith.maximumf %1, %3 : vector<10x128xbf16>
    %5 = vector.extract_strided_slice %4 {offsets = [0, 0], sizes = [4, 128], strides = [1, 1]} : vector<10x128xbf16> to vector<4x128xbf16>
    %6 = vector.extract_strided_slice %4 {offsets = [3, 0], sizes = [4, 128], strides = [1, 1]} : vector<10x128xbf16> to vector<4x128xbf16>
    %7 = vector.extract_strided_slice %4 {offsets = [6, 0], sizes = [4, 128], strides = [1, 1]} : vector<10x128xbf16> to vector<4x128xbf16>
    %8 = tpu.concatenate %5, %6, %7 in 1 : vector<4x128xbf16>, vector<4x128xbf16>, vector<4x128xbf16> -> vector<4x384xbf16>
    %c0_2 = arith.constant 0 : index
    %c0_3 = arith.constant 0 : index
    %9 = vector.load %arg3[%c0_2, %c0_3] : memref<384x128xbf16, #tpu.memory_space<vmem>>, vector<384x128xbf16>
    %cst_4 = arith.constant dense<0.000000e+00> : vector<4x128xf32>
    %10 = tpu.matmul %8, %9, %cst_4 {dimension_numbers = #tpu.dot_dimension_numbers<[1], [0], [0], [1], [0, 0, 1, 1], [], []>} : vector<4x384xbf16>, vector<384x128xbf16>, vector<4x128xf32> -> vector<4x128xf32>
    %c0_5 = arith.constant 0 : index
    %c0_6 = arith.constant 0 : index
    %11 = vector.load %arg4[%c0_5, %c0_6] : memref<1x128xf32, #tpu.memory_space<vmem>>, vector<1x128xf32>
    %12 = vector.broadcast %11 : vector<1x128xf32> to vector<4x128xf32>
    %13 = arith.addf %10, %12 : vector<4x128xf32>
    %cst_7 = arith.constant 0.000000e+00 : f32
    %14 = vector.broadcast %cst_7 : f32 to vector<4x128xf32>
    %15 = arith.maximumf %13, %14 : vector<4x128xf32>
    %16 = arith.truncf %15 : vector<4x128xf32> to vector<4x128xbf16>
    %c0_8 = arith.constant 0 : index
    %c0_9 = arith.constant 0 : index
    %17 = vector.load %arg5[%c0_8, %c0_9] : memref<128x128xbf16, #tpu.memory_space<vmem>>, vector<128x128xbf16>
    %cst_10 = arith.constant dense<0.000000e+00> : vector<4x128xf32>
    %18 = tpu.matmul %16, %17, %cst_10 {dimension_numbers = #tpu.dot_dimension_numbers<[1], [0], [0], [1], [0, 0, 1, 1], [], []>} : vector<4x128xbf16>, vector<128x128xbf16>, vector<4x128xf32> -> vector<4x128xf32>
    %c0_11 = arith.constant 0 : index
    %c0_12 = arith.constant 0 : index
    %19 = vector.load %arg6[%c0_11, %c0_12] : memref<1x128xf32, #tpu.memory_space<vmem>>, vector<1x128xf32>
    %20 = vector.broadcast %19 : vector<1x128xf32> to vector<4x128xf32>
    %21 = arith.addf %18, %20 : vector<4x128xf32>
    %22 = arith.extf %2 : vector<4x128xbf16> to vector<4x128xf32>
    %23 = arith.addf %21, %22 : vector<4x128xf32>
    %24 = arith.truncf %23 : vector<4x128xf32> to vector<4x128xbf16>
    %c0_13 = arith.constant 0 : index
    %c0_14 = arith.constant 0 : index
    %c0_15 = arith.constant 0 : index
    %25 = vector.load %arg7[%c0_13, %c0_14, %c0_15] : memref<1x4x128xbf16, #tpu.memory_space<vmem>>, vector<1x4x128xbf16>
    %26 = vector.shape_cast %25 : vector<1x4x128xbf16> to vector<4x128xbf16>
    %27 = vector.shape_cast %24 : vector<4x128xbf16> to vector<1x4x128xbf16>
    tpu.vector_store %arg7[%c0_13, %c0_14, %c0_15], %27 {strides = array<i32>} : memref<1x4x128xbf16, #tpu.memory_space<vmem>>, vector<1x4x128xbf16>,
    return
  }
  func.func @transform_0(%arg0: i32, %arg1: i32) -> (i32, i32, i32) {
    %c0_i32 = arith.constant 0 : i32
    %c0_i32_0 = arith.constant 0 : i32
    %c0_i32_1 = arith.constant 0 : i32
    return %arg0, %c0_i32, %c0_i32_0 : i32, i32, i32
  }
  func.func @transform_1(%arg0: i32, %arg1: i32) -> (i32, i32) {
    %c0_i32 = arith.constant 0 : i32
    %c0_i32_0 = arith.constant 0 : i32
    %c0_i32_1 = arith.constant 0 : i32
    return %c0_i32, %c0_i32_0 : i32, i32
  }
  func.func @transform_2(%arg0: i32, %arg1: i32) -> (i32, i32) {
    %c0_i32 = arith.constant 0 : i32
    %c0_i32_0 = arith.constant 0 : i32
    %c0_i32_1 = arith.constant 0 : i32
    return %c0_i32, %c0_i32_0 : i32, i32
  }
  func.func @transform_3(%arg0: i32, %arg1: i32) -> (i32, i32) {
    %c0_i32 = arith.constant 0 : i32
    %c0_i32_0 = arith.constant 0 : i32
    %c0_i32_1 = arith.constant 0 : i32
    return %c0_i32, %c0_i32_0 : i32, i32
  }
  func.func @transform_4(%arg0: i32, %arg1: i32) -> (i32, i32) {
    %c0_i32 = arith.constant 0 : i32
    %c0_i32_0 = arith.constant 0 : i32
    %c0_i32_1 = arith.constant 0 : i32
    return %c0_i32, %c0_i32_0 : i32, i32
  }
  func.func @transform_5(%arg0: i32, %arg1: i32) -> (i32, i32, i32) {
    %c0_i32 = arith.constant 0 : i32
    %c0_i32_0 = arith.constant 0 : i32
    return %arg0, %arg1, %c0_i32 : i32, i32, i32
  }
}

module attributes {stable_mosaic.version = 11 : i64} {
  func.func @_conv_kernel(%arg0: i32, %arg1: i32, %arg2: memref<1x5x256xbf16, #tpu.memory_space<vmem>>, %arg3: memref<512x128xbf16, #tpu.memory_space<vmem>>, %arg4: memref<1x128xf32, #tpu.memory_space<vmem>>, %arg5: memref<1x4x128xbf16, #tpu.memory_space<vmem>>) attributes {dimension_semantics = [#tpu.dimension_semantics<parallel>, #tpu.dimension_semantics<parallel>], iteration_bounds = array<i64: 2, 1>, scalar_prefetch = 0 : i64, scratch_operands = 0 : i64, tpu.core_type = #tpu.core_type<tc>, window_params = [{transform_indices = @transform_0, window_bounds = array<i64: 1, 5, 256>}, {pipeline_mode = #tpu.pipeline_mode<synchronous>, transform_indices = @transform_1, window_bounds = array<i64: 512, 128>}, {pipeline_mode = #tpu.pipeline_mode<synchronous>, transform_indices = @transform_2, window_bounds = array<i64: 1, 128>}, {transform_indices = @transform_3, window_bounds = array<i64: 1, 4, 128>}]} {
    %c0 = arith.constant 0 : index
    %c0_0 = arith.constant 0 : index
    %c0_1 = arith.constant 0 : index
    %0 = vector.load %arg2[%c0, %c0_0, %c0_1] : memref<1x5x256xbf16, #tpu.memory_space<vmem>>, vector<1x5x256xbf16>
    %1 = vector.shape_cast %0 : vector<1x5x256xbf16> to vector<5x256xbf16>
    %2 = vector.extract_strided_slice %1 {offsets = [0, 0], sizes = [4, 256], strides = [1, 1]} : vector<5x256xbf16> to vector<4x256xbf16>
    %3 = vector.extract_strided_slice %1 {offsets = [1, 0], sizes = [4, 256], strides = [1, 1]} : vector<5x256xbf16> to vector<4x256xbf16>
    %4 = tpu.concatenate %2, %3 in 1 : vector<4x256xbf16>, vector<4x256xbf16> -> vector<4x512xbf16>
    %c0_2 = arith.constant 0 : index
    %c0_3 = arith.constant 0 : index
    %5 = vector.load %arg3[%c0_2, %c0_3] : memref<512x128xbf16, #tpu.memory_space<vmem>>, vector<512x128xbf16>
    %cst = arith.constant dense<0.000000e+00> : vector<4x128xf32>
    %6 = tpu.matmul %4, %5, %cst {dimension_numbers = #tpu.dot_dimension_numbers<[1], [0], [0], [1], [0, 0, 1, 1], [], []>} : vector<4x512xbf16>, vector<512x128xbf16>, vector<4x128xf32> -> vector<4x128xf32>
    %c0_4 = arith.constant 0 : index
    %c0_5 = arith.constant 0 : index
    %7 = vector.load %arg4[%c0_4, %c0_5] : memref<1x128xf32, #tpu.memory_space<vmem>>, vector<1x128xf32>
    %8 = vector.broadcast %7 : vector<1x128xf32> to vector<4x128xf32>
    %9 = arith.addf %6, %8 : vector<4x128xf32>
    %10 = arith.truncf %9 : vector<4x128xf32> to vector<4x128xbf16>
    %c0_6 = arith.constant 0 : index
    %c0_7 = arith.constant 0 : index
    %c0_8 = arith.constant 0 : index
    %11 = vector.load %arg5[%c0_6, %c0_7, %c0_8] : memref<1x4x128xbf16, #tpu.memory_space<vmem>>, vector<1x4x128xbf16>
    %12 = vector.shape_cast %11 : vector<1x4x128xbf16> to vector<4x128xbf16>
    %13 = vector.shape_cast %10 : vector<4x128xbf16> to vector<1x4x128xbf16>
    tpu.vector_store %arg5[%c0_6, %c0_7, %c0_8], %13 {strides = array<i32>} : memref<1x4x128xbf16, #tpu.memory_space<vmem>>, vector<1x4x128xbf16>,
    return
  }
  func.func @transform_0(%arg0: i32, %arg1: i32) -> (i32, i32, i32) {
    %c0_i32 = arith.constant 0 : i32
    %c0_i32_0 = arith.constant 0 : i32
    %c0_i32_1 = arith.constant 0 : i32
    return %arg0, %c0_i32, %c0_i32_0 : i32, i32, i32
  }
  func.func @transform_1(%arg0: i32, %arg1: i32) -> (i32, i32) {
    %c0_i32 = arith.constant 0 : i32
    %c0_i32_0 = arith.constant 0 : i32
    %c0_i32_1 = arith.constant 0 : i32
    return %c0_i32, %c0_i32_0 : i32, i32
  }
  func.func @transform_2(%arg0: i32, %arg1: i32) -> (i32, i32) {
    %c0_i32 = arith.constant 0 : i32
    %c0_i32_0 = arith.constant 0 : i32
    %c0_i32_1 = arith.constant 0 : i32
    return %c0_i32, %c0_i32_0 : i32, i32
  }
  func.func @transform_3(%arg0: i32, %arg1: i32) -> (i32, i32, i32) {
    %c0_i32 = arith.constant 0 : i32
    %c0_i32_0 = arith.constant 0 : i32
    return %arg0, %arg1, %c0_i32 : i32, i32, i32
  }
}

module attributes {stable_mosaic.version = 11 : i64} {
  func.func @_conv_kernel(%arg0: i32, %arg1: i32, %arg2: memref<1x6x128xbf16, #tpu.memory_space<vmem>>, %arg3: memref<384x128xbf16, #tpu.memory_space<vmem>>, %arg4: memref<1x128xf32, #tpu.memory_space<vmem>>, %arg5: memref<1x4x128xf32, #tpu.memory_space<vmem>>) attributes {dimension_semantics = [#tpu.dimension_semantics<parallel>, #tpu.dimension_semantics<parallel>], iteration_bounds = array<i64: 2, 1>, scalar_prefetch = 0 : i64, scratch_operands = 0 : i64, tpu.core_type = #tpu.core_type<tc>, window_params = [{transform_indices = @transform_0, window_bounds = array<i64: 1, 6, 128>}, {pipeline_mode = #tpu.pipeline_mode<synchronous>, transform_indices = @transform_1, window_bounds = array<i64: 384, 128>}, {pipeline_mode = #tpu.pipeline_mode<synchronous>, transform_indices = @transform_2, window_bounds = array<i64: 1, 128>}, {transform_indices = @transform_3, window_bounds = array<i64: 1, 4, 128>}]} {
    %c0 = arith.constant 0 : index
    %c0_0 = arith.constant 0 : index
    %c0_1 = arith.constant 0 : index
    %0 = vector.load %arg2[%c0, %c0_0, %c0_1] : memref<1x6x128xbf16, #tpu.memory_space<vmem>>, vector<1x6x128xbf16>
    %1 = vector.shape_cast %0 : vector<1x6x128xbf16> to vector<6x128xbf16>
    %2 = vector.extract_strided_slice %1 {offsets = [0, 0], sizes = [4, 128], strides = [1, 1]} : vector<6x128xbf16> to vector<4x128xbf16>
    %3 = vector.extract_strided_slice %1 {offsets = [1, 0], sizes = [4, 128], strides = [1, 1]} : vector<6x128xbf16> to vector<4x128xbf16>
    %4 = vector.extract_strided_slice %1 {offsets = [2, 0], sizes = [4, 128], strides = [1, 1]} : vector<6x128xbf16> to vector<4x128xbf16>
    %5 = tpu.concatenate %2, %3, %4 in 1 : vector<4x128xbf16>, vector<4x128xbf16>, vector<4x128xbf16> -> vector<4x384xbf16>
    %c0_2 = arith.constant 0 : index
    %c0_3 = arith.constant 0 : index
    %6 = vector.load %arg3[%c0_2, %c0_3] : memref<384x128xbf16, #tpu.memory_space<vmem>>, vector<384x128xbf16>
    %cst = arith.constant dense<0.000000e+00> : vector<4x128xf32>
    %7 = tpu.matmul %5, %6, %cst {dimension_numbers = #tpu.dot_dimension_numbers<[1], [0], [0], [1], [0, 0, 1, 1], [], []>} : vector<4x384xbf16>, vector<384x128xbf16>, vector<4x128xf32> -> vector<4x128xf32>
    %c0_4 = arith.constant 0 : index
    %c0_5 = arith.constant 0 : index
    %8 = vector.load %arg4[%c0_4, %c0_5] : memref<1x128xf32, #tpu.memory_space<vmem>>, vector<1x128xf32>
    %9 = vector.broadcast %8 : vector<1x128xf32> to vector<4x128xf32>
    %10 = arith.addf %7, %9 : vector<4x128xf32>
    %c0_6 = arith.constant 0 : index
    %c0_7 = arith.constant 0 : index
    %c0_8 = arith.constant 0 : index
    %11 = vector.load %arg5[%c0_6, %c0_7, %c0_8] : memref<1x4x128xf32, #tpu.memory_space<vmem>>, vector<1x4x128xf32>
    %12 = vector.shape_cast %11 : vector<1x4x128xf32> to vector<4x128xf32>
    %13 = vector.shape_cast %10 : vector<4x128xf32> to vector<1x4x128xf32>
    tpu.vector_store %arg5[%c0_6, %c0_7, %c0_8], %13 {strides = array<i32>} : memref<1x4x128xf32, #tpu.memory_space<vmem>>, vector<1x4x128xf32>,
    return
  }
  func.func @transform_0(%arg0: i32, %arg1: i32) -> (i32, i32, i32) {
    %c0_i32 = arith.constant 0 : i32
    %c0_i32_0 = arith.constant 0 : i32
    %c0_i32_1 = arith.constant 0 : i32
    return %arg0, %c0_i32, %c0_i32_0 : i32, i32, i32
  }
  func.func @transform_1(%arg0: i32, %arg1: i32) -> (i32, i32) {
    %c0_i32 = arith.constant 0 : i32
    %c0_i32_0 = arith.constant 0 : i32
    %c0_i32_1 = arith.constant 0 : i32
    return %c0_i32, %c0_i32_0 : i32, i32
  }
  func.func @transform_2(%arg0: i32, %arg1: i32) -> (i32, i32) {
    %c0_i32 = arith.constant 0 : i32
    %c0_i32_0 = arith.constant 0 : i32
    %c0_i32_1 = arith.constant 0 : i32
    return %c0_i32, %c0_i32_0 : i32, i32
  }
  func.func @transform_3(%arg0: i32, %arg1: i32) -> (i32, i32, i32) {
    %c0_i32 = arith.constant 0 : i32
    %c0_i32_0 = arith.constant 0 : i32
    return %arg0, %arg1, %c0_i32 : i32, i32, i32
  }
}

module attributes {stable_mosaic.version = 11 : i64} {
  func.func @_resblock_kernel(%arg0: i32, %arg1: i32, %arg2: memref<1x6x128xbf16, #tpu.memory_space<vmem>>, %arg3: memref<384x128xbf16, #tpu.memory_space<vmem>>, %arg4: memref<1x128xf32, #tpu.memory_space<vmem>>, %arg5: memref<128x128xbf16, #tpu.memory_space<vmem>>, %arg6: memref<1x128xf32, #tpu.memory_space<vmem>>, %arg7: memref<1x4x128xbf16, #tpu.memory_space<vmem>>) attributes {dimension_semantics = [#tpu.dimension_semantics<parallel>, #tpu.dimension_semantics<parallel>], iteration_bounds = array<i64: 2, 1>, scalar_prefetch = 0 : i64, scratch_operands = 0 : i64, tpu.core_type = #tpu.core_type<tc>, window_params = [{transform_indices = @transform_0, window_bounds = array<i64: 1, 6, 128>}, {pipeline_mode = #tpu.pipeline_mode<synchronous>, transform_indices = @transform_1, window_bounds = array<i64: 384, 128>}, {pipeline_mode = #tpu.pipeline_mode<synchronous>, transform_indices = @transform_2, window_bounds = array<i64: 1, 128>}, {pipeline_mode = #tpu.pipeline_mode<synchronous>, transform_indices = @transform_3, window_bounds = array<i64: 128, 128>}, {pipeline_mode = #tpu.pipeline_mode<synchronous>, transform_indices = @transform_4, window_bounds = array<i64: 1, 128>}, {transform_indices = @transform_5, window_bounds = array<i64: 1, 4, 128>}]} {
    %c0 = arith.constant 0 : index
    %c0_0 = arith.constant 0 : index
    %c0_1 = arith.constant 0 : index
    %0 = vector.load %arg2[%c0, %c0_0, %c0_1] : memref<1x6x128xbf16, #tpu.memory_space<vmem>>, vector<1x6x128xbf16>
    %1 = vector.shape_cast %0 : vector<1x6x128xbf16> to vector<6x128xbf16>
    %2 = vector.extract_strided_slice %1 {offsets = [1, 0], sizes = [4, 128], strides = [1, 1]} : vector<6x128xbf16> to vector<4x128xbf16>
    %cst = arith.constant 0.000000e+00 : bf16
    %3 = vector.broadcast %cst : bf16 to vector<6x128xbf16>
    %4 = arith.maximumf %1, %3 : vector<6x128xbf16>
    %5 = vector.extract_strided_slice %4 {offsets = [0, 0], sizes = [4, 128], strides = [1, 1]} : vector<6x128xbf16> to vector<4x128xbf16>
    %6 = vector.extract_strided_slice %4 {offsets = [1, 0], sizes = [4, 128], strides = [1, 1]} : vector<6x128xbf16> to vector<4x128xbf16>
    %7 = vector.extract_strided_slice %4 {offsets = [2, 0], sizes = [4, 128], strides = [1, 1]} : vector<6x128xbf16> to vector<4x128xbf16>
    %8 = tpu.concatenate %5, %6, %7 in 1 : vector<4x128xbf16>, vector<4x128xbf16>, vector<4x128xbf16> -> vector<4x384xbf16>
    %c0_2 = arith.constant 0 : index
    %c0_3 = arith.constant 0 : index
    %9 = vector.load %arg3[%c0_2, %c0_3] : memref<384x128xbf16, #tpu.memory_space<vmem>>, vector<384x128xbf16>
    %cst_4 = arith.constant dense<0.000000e+00> : vector<4x128xf32>
    %10 = tpu.matmul %8, %9, %cst_4 {dimension_numbers = #tpu.dot_dimension_numbers<[1], [0], [0], [1], [0, 0, 1, 1], [], []>} : vector<4x384xbf16>, vector<384x128xbf16>, vector<4x128xf32> -> vector<4x128xf32>
    %c0_5 = arith.constant 0 : index
    %c0_6 = arith.constant 0 : index
    %11 = vector.load %arg4[%c0_5, %c0_6] : memref<1x128xf32, #tpu.memory_space<vmem>>, vector<1x128xf32>
    %12 = vector.broadcast %11 : vector<1x128xf32> to vector<4x128xf32>
    %13 = arith.addf %10, %12 : vector<4x128xf32>
    %cst_7 = arith.constant 0.000000e+00 : f32
    %14 = vector.broadcast %cst_7 : f32 to vector<4x128xf32>
    %15 = arith.maximumf %13, %14 : vector<4x128xf32>
    %16 = arith.truncf %15 : vector<4x128xf32> to vector<4x128xbf16>
    %c0_8 = arith.constant 0 : index
    %c0_9 = arith.constant 0 : index
    %17 = vector.load %arg5[%c0_8, %c0_9] : memref<128x128xbf16, #tpu.memory_space<vmem>>, vector<128x128xbf16>
    %cst_10 = arith.constant dense<0.000000e+00> : vector<4x128xf32>
    %18 = tpu.matmul %16, %17, %cst_10 {dimension_numbers = #tpu.dot_dimension_numbers<[1], [0], [0], [1], [0, 0, 1, 1], [], []>} : vector<4x128xbf16>, vector<128x128xbf16>, vector<4x128xf32> -> vector<4x128xf32>
    %c0_11 = arith.constant 0 : index
    %c0_12 = arith.constant 0 : index
    %19 = vector.load %arg6[%c0_11, %c0_12] : memref<1x128xf32, #tpu.memory_space<vmem>>, vector<1x128xf32>
    %20 = vector.broadcast %19 : vector<1x128xf32> to vector<4x128xf32>
    %21 = arith.addf %18, %20 : vector<4x128xf32>
    %22 = arith.extf %2 : vector<4x128xbf16> to vector<4x128xf32>
    %23 = arith.addf %21, %22 : vector<4x128xf32>
    %24 = arith.truncf %23 : vector<4x128xf32> to vector<4x128xbf16>
    %c0_13 = arith.constant 0 : index
    %c0_14 = arith.constant 0 : index
    %c0_15 = arith.constant 0 : index
    %25 = vector.load %arg7[%c0_13, %c0_14, %c0_15] : memref<1x4x128xbf16, #tpu.memory_space<vmem>>, vector<1x4x128xbf16>
    %26 = vector.shape_cast %25 : vector<1x4x128xbf16> to vector<4x128xbf16>
    %27 = vector.shape_cast %24 : vector<4x128xbf16> to vector<1x4x128xbf16>
    tpu.vector_store %arg7[%c0_13, %c0_14, %c0_15], %27 {strides = array<i32>} : memref<1x4x128xbf16, #tpu.memory_space<vmem>>, vector<1x4x128xbf16>,
    return
  }
  func.func @transform_0(%arg0: i32, %arg1: i32) -> (i32, i32, i32) {
    %c0_i32 = arith.constant 0 : i32
    %c0_i32_0 = arith.constant 0 : i32
    %c0_i32_1 = arith.constant 0 : i32
    return %arg0, %c0_i32, %c0_i32_0 : i32, i32, i32
  }
  func.func @transform_1(%arg0: i32, %arg1: i32) -> (i32, i32) {
    %c0_i32 = arith.constant 0 : i32
    %c0_i32_0 = arith.constant 0 : i32
    %c0_i32_1 = arith.constant 0 : i32
    return %c0_i32, %c0_i32_0 : i32, i32
  }
  func.func @transform_2(%arg0: i32, %arg1: i32) -> (i32, i32) {
    %c0_i32 = arith.constant 0 : i32
    %c0_i32_0 = arith.constant 0 : i32
    %c0_i32_1 = arith.constant 0 : i32
    return %c0_i32, %c0_i32_0 : i32, i32
  }
  func.func @transform_3(%arg0: i32, %arg1: i32) -> (i32, i32) {
    %c0_i32 = arith.constant 0 : i32
    %c0_i32_0 = arith.constant 0 : i32
    %c0_i32_1 = arith.constant 0 : i32
    return %c0_i32, %c0_i32_0 : i32, i32
  }
  func.func @transform_4(%arg0: i32, %arg1: i32) -> (i32, i32) {
    %c0_i32 = arith.constant 0 : i32
    %c0_i32_0 = arith.constant 0 : i32
    %c0_i32_1 = arith.constant 0 : i32
    return %c0_i32, %c0_i32_0 : i32, i32
  }
  func.func @transform_5(%arg0: i32, %arg1: i32) -> (i32, i32, i32) {
    %c0_i32 = arith.constant 0 : i32
    %c0_i32_0 = arith.constant 0 : i32
    return %arg0, %arg1, %c0_i32 : i32, i32, i32
  }
}

module attributes {stable_mosaic.version = 11 : i64} {
  func.func @_vq_kernel(%arg0: i32, %arg1: memref<128x128xf32, #tpu.memory_space<vmem>>, %arg2: memref<128x128xbf16, #tpu.memory_space<vmem>>, %arg3: memref<1x128xf32, #tpu.memory_space<vmem>>, %arg4: memref<1x128xi32, #tpu.memory_space<vmem>>, %arg5: memref<1x1x128xf32, #tpu.memory_space<vmem>>) attributes {dimension_semantics = [#tpu.dimension_semantics<parallel>], iteration_bounds = array<i64: 1>, scalar_prefetch = 0 : i64, scratch_operands = 0 : i64, tpu.core_type = #tpu.core_type<tc>, window_params = [{transform_indices = @transform_0, window_bounds = array<i64: 128, 128>}, {pipeline_mode = #tpu.pipeline_mode<synchronous>, transform_indices = @transform_1, window_bounds = array<i64: 128, 128>}, {pipeline_mode = #tpu.pipeline_mode<synchronous>, transform_indices = @transform_2, window_bounds = array<i64: 1, 128>}, {transform_indices = @transform_3, window_bounds = array<i64: 1, 128>}, {transform_indices = @transform_4, window_bounds = array<i64: 1, 1, 128>}]} {
    %c0 = arith.constant 0 : index
    %c0_0 = arith.constant 0 : index
    %0 = vector.load %arg2[%c0, %c0_0] : memref<128x128xbf16, #tpu.memory_space<vmem>>, vector<128x128xbf16>
    %c0_1 = arith.constant 0 : index
    %c0_2 = arith.constant 0 : index
    %1 = vector.load %arg3[%c0_1, %c0_2] : memref<1x128xf32, #tpu.memory_space<vmem>>, vector<1x128xf32>
    %c0_3 = arith.constant 0 : index
    %c0_4 = arith.constant 0 : index
    %2 = vector.load %arg1[%c0_3, %c0_4] : memref<128x128xf32, #tpu.memory_space<vmem>>, vector<128x128xf32>
    %3 = arith.truncf %2 : vector<128x128xf32> to vector<128x128xbf16>
    %cst = arith.constant dense<0.000000e+00> : vector<128x128xf32>
    %4 = tpu.matmul %3, %0, %cst {dimension_numbers = #tpu.dot_dimension_numbers<[1], [0], [0], [1], [0, 0, 1, 1], [], []>} : vector<128x128xbf16>, vector<128x128xbf16>, vector<128x128xf32> -> vector<128x128xf32>
    %5 = arith.mulf %2, %2 : vector<128x128xf32>
    %cst_5 = arith.constant dense<0.000000e+00> : vector<128xf32>
    %6 = vector.multi_reduction <add>, %5, %cst_5 [1] : vector<128x128xf32> to vector<128xf32>
    %7 = vector.shape_cast %6 : vector<128xf32> to vector<128x1xf32>
    %cst_6 = arith.constant 2.000000e+00 : f32
    %8 = vector.broadcast %cst_6 : f32 to vector<128x128xf32>
    %9 = arith.mulf %8, %4 : vector<128x128xf32>
    %10 = vector.broadcast %7 : vector<128x1xf32> to vector<128x128xf32>
    %11 = arith.subf %10, %9 : vector<128x128xf32>
    %12 = vector.broadcast %1 : vector<1x128xf32> to vector<128x128xf32>
    %13 = arith.addf %11, %12 : vector<128x128xf32>
    %cst_7 = arith.constant dense<0x7F800000> : vector<128xf32>
    %14 = vector.multi_reduction <minimumf>, %13, %cst_7 [1] : vector<128x128xf32> to vector<128xf32>
    %15 = vector.shape_cast %14 : vector<128xf32> to vector<128x1xf32>
    %16 = tpu.iota {dimensions = array<i32: 1>} : vector<128x128xi32>
    %17 = vector.broadcast %15 : vector<128x1xf32> to vector<128x128xf32>
    %18 = arith.cmpf ole, %13, %17 : vector<128x128xf32>
    %c1073741824_i32 = arith.constant 1073741824 : i32
    %19 = vector.broadcast %c1073741824_i32 : i32 to vector<128x128xi32>
    %20 = arith.select %18, %16, %19 : vector<128x128xi1>, vector<128x128xi32>
    %cst_8 = arith.constant dense<2147483647> : vector<128xi32>
    %21 = vector.multi_reduction <minsi>, %20, %cst_8 [1] : vector<128x128xi32> to vector<128xi32>
    %22 = vector.shape_cast %21 : vector<128xi32> to vector<1x128xi32>
    %c0_9 = arith.constant 0 : index
    %c0_10 = arith.constant 0 : index
    %23 = vector.load %arg4[%c0_9, %c0_10] : memref<1x128xi32, #tpu.memory_space<vmem>>, vector<1x128xi32>
    tpu.vector_store %arg4[%c0_9, %c0_10], %22 {strides = array<i32>} : memref<1x128xi32, #tpu.memory_space<vmem>>, vector<1x128xi32>,
    %c128_i32 = arith.constant 128 : i32
    %24 = arith.muli %arg0, %c128_i32 : i32
    %c0_i32 = arith.constant 0 : i32
    %25 = arith.addi %24, %c0_i32 : i32
    %26 = tpu.iota {dimensions = array<i32: 0>} : vector<128x1xi32>
    %27 = vector.broadcast %25 : i32 to vector<128x1xi32>
    %28 = arith.addi %27, %26 : vector<128x1xi32>
    %c8_i32 = arith.constant 8 : i32
    %29 = vector.broadcast %c8_i32 : i32 to vector<128x1xi32>
    %30 = arith.cmpi slt, %28, %29 : vector<128x1xi32>
    %31 = arith.extui %30 : vector<128x1xi1> to vector<128x1xi32>
    %32 = arith.sitofp %31 : vector<128x1xi32> to vector<128x1xf32>
    %33 = vector.shape_cast %21 : vector<128xi32> to vector<128x1xi32>
    %34 = vector.broadcast %33 : vector<128x1xi32> to vector<128x128xi32>
    %35 = arith.cmpi eq, %16, %34 : vector<128x128xi32>
    %36 = arith.extui %35 : vector<128x128xi1> to vector<128x128xi32>
    %37 = arith.sitofp %36 : vector<128x128xi32> to vector<128x128xf32>
    %38 = vector.broadcast %32 : vector<128x1xf32> to vector<128x128xf32>
    %39 = arith.mulf %37, %38 : vector<128x128xf32>
    %cst_11 = arith.constant dense<0.000000e+00> : vector<128xf32>
    %40 = vector.multi_reduction <add>, %39, %cst_11 [0] : vector<128x128xf32> to vector<128xf32>
    %41 = vector.shape_cast %40 : vector<128xf32> to vector<1x128xf32>
    %c0_12 = arith.constant 0 : index
    %c0_13 = arith.constant 0 : index
    %c0_14 = arith.constant 0 : index
    %42 = vector.load %arg5[%c0_12, %c0_13, %c0_14] : memref<1x1x128xf32, #tpu.memory_space<vmem>>, vector<1x1x128xf32>
    %43 = vector.shape_cast %42 : vector<1x1x128xf32> to vector<1x128xf32>
    %44 = vector.shape_cast %41 : vector<1x128xf32> to vector<1x1x128xf32>
    tpu.vector_store %arg5[%c0_12, %c0_13, %c0_14], %44 {strides = array<i32>} : memref<1x1x128xf32, #tpu.memory_space<vmem>>, vector<1x1x128xf32>,
    return
  }
  func.func @transform_0(%arg0: i32) -> (i32, i32) {
    %c0_i32 = arith.constant 0 : i32
    %c0_i32_0 = arith.constant 0 : i32
    return %arg0, %c0_i32 : i32, i32
  }
  func.func @transform_1(%arg0: i32) -> (i32, i32) {
    %c0_i32 = arith.constant 0 : i32
    %c0_i32_0 = arith.constant 0 : i32
    %c0_i32_1 = arith.constant 0 : i32
    return %c0_i32, %c0_i32_0 : i32, i32
  }
  func.func @transform_2(%arg0: i32) -> (i32, i32) {
    %c0_i32 = arith.constant 0 : i32
    %c0_i32_0 = arith.constant 0 : i32
    %c0_i32_1 = arith.constant 0 : i32
    return %c0_i32, %c0_i32_0 : i32, i32
  }
  func.func @transform_3(%arg0: i32) -> (i32, i32) {
    %c0_i32 = arith.constant 0 : i32
    %c0_i32_0 = arith.constant 0 : i32
    return %arg0, %c0_i32 : i32, i32
  }
  func.func @transform_4(%arg0: i32) -> (i32, i32, i32) {
    %c0_i32 = arith.constant 0 : i32
    %c0_i32_0 = arith.constant 0 : i32
    %c0_i32_1 = arith.constant 0 : i32
    return %arg0, %c0_i32, %c0_i32_0 : i32, i32, i32
  }
}

module attributes {stable_mosaic.version = 11 : i64} {
  func.func @_conv_kernel(%arg0: i32, %arg1: i32, %arg2: memref<1x6x128xbf16, #tpu.memory_space<vmem>>, %arg3: memref<384x128xbf16, #tpu.memory_space<vmem>>, %arg4: memref<1x128xf32, #tpu.memory_space<vmem>>, %arg5: memref<1x4x128xbf16, #tpu.memory_space<vmem>>) attributes {dimension_semantics = [#tpu.dimension_semantics<parallel>, #tpu.dimension_semantics<parallel>], iteration_bounds = array<i64: 2, 1>, scalar_prefetch = 0 : i64, scratch_operands = 0 : i64, tpu.core_type = #tpu.core_type<tc>, window_params = [{transform_indices = @transform_0, window_bounds = array<i64: 1, 6, 128>}, {pipeline_mode = #tpu.pipeline_mode<synchronous>, transform_indices = @transform_1, window_bounds = array<i64: 384, 128>}, {pipeline_mode = #tpu.pipeline_mode<synchronous>, transform_indices = @transform_2, window_bounds = array<i64: 1, 128>}, {transform_indices = @transform_3, window_bounds = array<i64: 1, 4, 128>}]} {
    %c0 = arith.constant 0 : index
    %c0_0 = arith.constant 0 : index
    %c0_1 = arith.constant 0 : index
    %0 = vector.load %arg2[%c0, %c0_0, %c0_1] : memref<1x6x128xbf16, #tpu.memory_space<vmem>>, vector<1x6x128xbf16>
    %1 = vector.shape_cast %0 : vector<1x6x128xbf16> to vector<6x128xbf16>
    %2 = vector.extract_strided_slice %1 {offsets = [0, 0], sizes = [4, 128], strides = [1, 1]} : vector<6x128xbf16> to vector<4x128xbf16>
    %3 = vector.extract_strided_slice %1 {offsets = [1, 0], sizes = [4, 128], strides = [1, 1]} : vector<6x128xbf16> to vector<4x128xbf16>
    %4 = vector.extract_strided_slice %1 {offsets = [2, 0], sizes = [4, 128], strides = [1, 1]} : vector<6x128xbf16> to vector<4x128xbf16>
    %5 = tpu.concatenate %2, %3, %4 in 1 : vector<4x128xbf16>, vector<4x128xbf16>, vector<4x128xbf16> -> vector<4x384xbf16>
    %c0_2 = arith.constant 0 : index
    %c0_3 = arith.constant 0 : index
    %6 = vector.load %arg3[%c0_2, %c0_3] : memref<384x128xbf16, #tpu.memory_space<vmem>>, vector<384x128xbf16>
    %cst = arith.constant dense<0.000000e+00> : vector<4x128xf32>
    %7 = tpu.matmul %5, %6, %cst {dimension_numbers = #tpu.dot_dimension_numbers<[1], [0], [0], [1], [0, 0, 1, 1], [], []>} : vector<4x384xbf16>, vector<384x128xbf16>, vector<4x128xf32> -> vector<4x128xf32>
    %c0_4 = arith.constant 0 : index
    %c0_5 = arith.constant 0 : index
    %8 = vector.load %arg4[%c0_4, %c0_5] : memref<1x128xf32, #tpu.memory_space<vmem>>, vector<1x128xf32>
    %9 = vector.broadcast %8 : vector<1x128xf32> to vector<4x128xf32>
    %10 = arith.addf %7, %9 : vector<4x128xf32>
    %cst_6 = arith.constant 0.000000e+00 : f32
    %11 = vector.broadcast %cst_6 : f32 to vector<4x128xf32>
    %12 = arith.maximumf %10, %11 : vector<4x128xf32>
    %13 = arith.truncf %12 : vector<4x128xf32> to vector<4x128xbf16>
    %c0_7 = arith.constant 0 : index
    %c0_8 = arith.constant 0 : index
    %c0_9 = arith.constant 0 : index
    %14 = vector.load %arg5[%c0_7, %c0_8, %c0_9] : memref<1x4x128xbf16, #tpu.memory_space<vmem>>, vector<1x4x128xbf16>
    %15 = vector.shape_cast %14 : vector<1x4x128xbf16> to vector<4x128xbf16>
    %16 = vector.shape_cast %13 : vector<4x128xbf16> to vector<1x4x128xbf16>
    tpu.vector_store %arg5[%c0_7, %c0_8, %c0_9], %16 {strides = array<i32>} : memref<1x4x128xbf16, #tpu.memory_space<vmem>>, vector<1x4x128xbf16>,
    return
  }
  func.func @transform_0(%arg0: i32, %arg1: i32) -> (i32, i32, i32) {
    %c0_i32 = arith.constant 0 : i32
    %c0_i32_0 = arith.constant 0 : i32
    %c0_i32_1 = arith.constant 0 : i32
    return %arg0, %c0_i32, %c0_i32_0 : i32, i32, i32
  }
  func.func @transform_1(%arg0: i32, %arg1: i32) -> (i32, i32) {
    %c0_i32 = arith.constant 0 : i32
    %c0_i32_0 = arith.constant 0 : i32
    %c0_i32_1 = arith.constant 0 : i32
    return %c0_i32, %c0_i32_0 : i32, i32
  }
  func.func @transform_2(%arg0: i32, %arg1: i32) -> (i32, i32) {
    %c0_i32 = arith.constant 0 : i32
    %c0_i32_0 = arith.constant 0 : i32
    %c0_i32_1 = arith.constant 0 : i32
    return %c0_i32, %c0_i32_0 : i32, i32
  }
  func.func @transform_3(%arg0: i32, %arg1: i32) -> (i32, i32, i32) {
    %c0_i32 = arith.constant 0 : i32
    %c0_i32_0 = arith.constant 0 : i32
    return %arg0, %arg1, %c0_i32 : i32, i32, i32
  }
}

module attributes {stable_mosaic.version = 11 : i64} {
  func.func @_conv_kernel(%arg0: i32, %arg1: i32, %arg2: memref<1x6x128xbf16, #tpu.memory_space<vmem>>, %arg3: memref<384x256xbf16, #tpu.memory_space<vmem>>, %arg4: memref<1x256xf32, #tpu.memory_space<vmem>>, %arg5: memref<1x4x256xbf16, #tpu.memory_space<vmem>>) attributes {dimension_semantics = [#tpu.dimension_semantics<parallel>, #tpu.dimension_semantics<parallel>], iteration_bounds = array<i64: 2, 1>, scalar_prefetch = 0 : i64, scratch_operands = 0 : i64, tpu.core_type = #tpu.core_type<tc>, window_params = [{transform_indices = @transform_0, window_bounds = array<i64: 1, 6, 128>}, {pipeline_mode = #tpu.pipeline_mode<synchronous>, transform_indices = @transform_1, window_bounds = array<i64: 384, 256>}, {pipeline_mode = #tpu.pipeline_mode<synchronous>, transform_indices = @transform_2, window_bounds = array<i64: 1, 256>}, {transform_indices = @transform_3, window_bounds = array<i64: 1, 4, 256>}]} {
    %c0 = arith.constant 0 : index
    %c0_0 = arith.constant 0 : index
    %c0_1 = arith.constant 0 : index
    %0 = vector.load %arg2[%c0, %c0_0, %c0_1] : memref<1x6x128xbf16, #tpu.memory_space<vmem>>, vector<1x6x128xbf16>
    %1 = vector.shape_cast %0 : vector<1x6x128xbf16> to vector<6x128xbf16>
    %2 = vector.extract_strided_slice %1 {offsets = [0, 0], sizes = [4, 128], strides = [1, 1]} : vector<6x128xbf16> to vector<4x128xbf16>
    %3 = vector.extract_strided_slice %1 {offsets = [1, 0], sizes = [4, 128], strides = [1, 1]} : vector<6x128xbf16> to vector<4x128xbf16>
    %4 = vector.extract_strided_slice %1 {offsets = [2, 0], sizes = [4, 128], strides = [1, 1]} : vector<6x128xbf16> to vector<4x128xbf16>
    %5 = tpu.concatenate %2, %3, %4 in 1 : vector<4x128xbf16>, vector<4x128xbf16>, vector<4x128xbf16> -> vector<4x384xbf16>
    %c0_2 = arith.constant 0 : index
    %c0_3 = arith.constant 0 : index
    %6 = vector.load %arg3[%c0_2, %c0_3] : memref<384x256xbf16, #tpu.memory_space<vmem>>, vector<384x256xbf16>
    %cst = arith.constant dense<0.000000e+00> : vector<4x256xf32>
    %7 = tpu.matmul %5, %6, %cst {dimension_numbers = #tpu.dot_dimension_numbers<[1], [0], [0], [1], [0, 0, 1, 1], [], []>} : vector<4x384xbf16>, vector<384x256xbf16>, vector<4x256xf32> -> vector<4x256xf32>
    %c0_4 = arith.constant 0 : index
    %c0_5 = arith.constant 0 : index
    %8 = vector.load %arg4[%c0_4, %c0_5] : memref<1x256xf32, #tpu.memory_space<vmem>>, vector<1x256xf32>
    %9 = vector.broadcast %8 : vector<1x256xf32> to vector<4x256xf32>
    %10 = arith.addf %7, %9 : vector<4x256xf32>
    %11 = arith.truncf %10 : vector<4x256xf32> to vector<4x256xbf16>
    %c0_6 = arith.constant 0 : index
    %c0_7 = arith.constant 0 : index
    %c0_8 = arith.constant 0 : index
    %12 = vector.load %arg5[%c0_6, %c0_7, %c0_8] : memref<1x4x256xbf16, #tpu.memory_space<vmem>>, vector<1x4x256xbf16>
    %13 = vector.shape_cast %12 : vector<1x4x256xbf16> to vector<4x256xbf16>
    %14 = vector.shape_cast %11 : vector<4x256xbf16> to vector<1x4x256xbf16>
    tpu.vector_store %arg5[%c0_6, %c0_7, %c0_8], %14 {strides = array<i32>} : memref<1x4x256xbf16, #tpu.memory_space<vmem>>, vector<1x4x256xbf16>,
    return
  }
  func.func @transform_0(%arg0: i32, %arg1: i32) -> (i32, i32, i32) {
    %c0_i32 = arith.constant 0 : i32
    %c0_i32_0 = arith.constant 0 : i32
    %c0_i32_1 = arith.constant 0 : i32
    return %arg0, %c0_i32, %c0_i32_0 : i32, i32, i32
  }
  func.func @transform_1(%arg0: i32, %arg1: i32) -> (i32, i32) {
    %c0_i32 = arith.constant 0 : i32
    %c0_i32_0 = arith.constant 0 : i32
    %c0_i32_1 = arith.constant 0 : i32
    return %c0_i32, %c0_i32_0 : i32, i32
  }
  func.func @transform_2(%arg0: i32, %arg1: i32) -> (i32, i32) {
    %c0_i32 = arith.constant 0 : i32
    %c0_i32_0 = arith.constant 0 : i32
    %c0_i32_1 = arith.constant 0 : i32
    return %c0_i32, %c0_i32_0 : i32, i32
  }
  func.func @transform_3(%arg0: i32, %arg1: i32) -> (i32, i32, i32) {
    %c0_i32 = arith.constant 0 : i32
    %c0_i32_0 = arith.constant 0 : i32
    return %arg0, %arg1, %c0_i32 : i32, i32, i32
  }
}

module attributes {stable_mosaic.version = 11 : i64} {
  func.func @_conv_kernel(%arg0: i32, %arg1: i32, %arg2: memref<1x10x128xbf16, #tpu.memory_space<vmem>>, %arg3: memref<384x256xbf16, #tpu.memory_space<vmem>>, %arg4: memref<1x256xf32, #tpu.memory_space<vmem>>, %arg5: memref<1x8x256xbf16, #tpu.memory_space<vmem>>) attributes {dimension_semantics = [#tpu.dimension_semantics<parallel>, #tpu.dimension_semantics<parallel>], iteration_bounds = array<i64: 2, 1>, scalar_prefetch = 0 : i64, scratch_operands = 0 : i64, tpu.core_type = #tpu.core_type<tc>, window_params = [{transform_indices = @transform_0, window_bounds = array<i64: 1, 10, 128>}, {pipeline_mode = #tpu.pipeline_mode<synchronous>, transform_indices = @transform_1, window_bounds = array<i64: 384, 256>}, {pipeline_mode = #tpu.pipeline_mode<synchronous>, transform_indices = @transform_2, window_bounds = array<i64: 1, 256>}, {transform_indices = @transform_3, window_bounds = array<i64: 1, 8, 256>}]} {
    %c0 = arith.constant 0 : index
    %c0_0 = arith.constant 0 : index
    %c0_1 = arith.constant 0 : index
    %0 = vector.load %arg2[%c0, %c0_0, %c0_1] : memref<1x10x128xbf16, #tpu.memory_space<vmem>>, vector<1x10x128xbf16>
    %1 = vector.shape_cast %0 : vector<1x10x128xbf16> to vector<10x128xbf16>
    %2 = vector.extract_strided_slice %1 {offsets = [0, 0], sizes = [8, 128], strides = [1, 1]} : vector<10x128xbf16> to vector<8x128xbf16>
    %3 = vector.extract_strided_slice %1 {offsets = [1, 0], sizes = [8, 128], strides = [1, 1]} : vector<10x128xbf16> to vector<8x128xbf16>
    %4 = vector.extract_strided_slice %1 {offsets = [2, 0], sizes = [8, 128], strides = [1, 1]} : vector<10x128xbf16> to vector<8x128xbf16>
    %5 = tpu.concatenate %2, %3, %4 in 1 : vector<8x128xbf16>, vector<8x128xbf16>, vector<8x128xbf16> -> vector<8x384xbf16>
    %c0_2 = arith.constant 0 : index
    %c0_3 = arith.constant 0 : index
    %6 = vector.load %arg3[%c0_2, %c0_3] : memref<384x256xbf16, #tpu.memory_space<vmem>>, vector<384x256xbf16>
    %cst = arith.constant dense<0.000000e+00> : vector<8x256xf32>
    %7 = tpu.matmul %5, %6, %cst {dimension_numbers = #tpu.dot_dimension_numbers<[1], [0], [0], [1], [0, 0, 1, 1], [], []>} : vector<8x384xbf16>, vector<384x256xbf16>, vector<8x256xf32> -> vector<8x256xf32>
    %c0_4 = arith.constant 0 : index
    %c0_5 = arith.constant 0 : index
    %8 = vector.load %arg4[%c0_4, %c0_5] : memref<1x256xf32, #tpu.memory_space<vmem>>, vector<1x256xf32>
    %9 = vector.broadcast %8 : vector<1x256xf32> to vector<8x256xf32>
    %10 = arith.addf %7, %9 : vector<8x256xf32>
    %11 = arith.truncf %10 : vector<8x256xf32> to vector<8x256xbf16>
    %c0_6 = arith.constant 0 : index
    %c0_7 = arith.constant 0 : index
    %c0_8 = arith.constant 0 : index
    %12 = vector.load %arg5[%c0_6, %c0_7, %c0_8] : memref<1x8x256xbf16, #tpu.memory_space<vmem>>, vector<1x8x256xbf16>
    %13 = vector.shape_cast %12 : vector<1x8x256xbf16> to vector<8x256xbf16>
    %14 = vector.shape_cast %11 : vector<8x256xbf16> to vector<1x8x256xbf16>
    tpu.vector_store %arg5[%c0_6, %c0_7, %c0_8], %14 {strides = array<i32>} : memref<1x8x256xbf16, #tpu.memory_space<vmem>>, vector<1x8x256xbf16>,
    return
  }
  func.func @transform_0(%arg0: i32, %arg1: i32) -> (i32, i32, i32) {
    %c0_i32 = arith.constant 0 : i32
    %c0_i32_0 = arith.constant 0 : i32
    %c0_i32_1 = arith.constant 0 : i32
    return %arg0, %c0_i32, %c0_i32_0 : i32, i32, i32
  }
  func.func @transform_1(%arg0: i32, %arg1: i32) -> (i32, i32) {
    %c0_i32 = arith.constant 0 : i32
    %c0_i32_0 = arith.constant 0 : i32
    %c0_i32_1 = arith.constant 0 : i32
    return %c0_i32, %c0_i32_0 : i32, i32
  }
  func.func @transform_2(%arg0: i32, %arg1: i32) -> (i32, i32) {
    %c0_i32 = arith.constant 0 : i32
    %c0_i32_0 = arith.constant 0 : i32
    %c0_i32_1 = arith.constant 0 : i32
    return %c0_i32, %c0_i32_0 : i32, i32
  }
  func.func @transform_3(%arg0: i32, %arg1: i32) -> (i32, i32, i32) {
    %c0_i32 = arith.constant 0 : i32
    %c0_i32_0 = arith.constant 0 : i32
    return %arg0, %arg1, %c0_i32 : i32, i32, i32
  }
}

module attributes {stable_mosaic.version = 11 : i64} {
  func.func @_conv_kernel(%arg0: i32, %arg1: i32, %arg2: memref<1x18x128xbf16, #tpu.memory_space<vmem>>, %arg3: memref<384x128xbf16, #tpu.memory_space<vmem>>, %arg4: memref<1x128xf32, #tpu.memory_space<vmem>>, %arg5: memref<1x16x128xf32, #tpu.memory_space<vmem>>) attributes {dimension_semantics = [#tpu.dimension_semantics<parallel>, #tpu.dimension_semantics<parallel>], iteration_bounds = array<i64: 2, 1>, scalar_prefetch = 0 : i64, scratch_operands = 0 : i64, tpu.core_type = #tpu.core_type<tc>, window_params = [{transform_indices = @transform_0, window_bounds = array<i64: 1, 18, 128>}, {pipeline_mode = #tpu.pipeline_mode<synchronous>, transform_indices = @transform_1, window_bounds = array<i64: 384, 128>}, {pipeline_mode = #tpu.pipeline_mode<synchronous>, transform_indices = @transform_2, window_bounds = array<i64: 1, 128>}, {transform_indices = @transform_3, window_bounds = array<i64: 1, 16, 128>}]} {
    %c0 = arith.constant 0 : index
    %c0_0 = arith.constant 0 : index
    %c0_1 = arith.constant 0 : index
    %0 = vector.load %arg2[%c0, %c0_0, %c0_1] : memref<1x18x128xbf16, #tpu.memory_space<vmem>>, vector<1x18x128xbf16>
    %1 = vector.shape_cast %0 : vector<1x18x128xbf16> to vector<18x128xbf16>
    %2 = vector.extract_strided_slice %1 {offsets = [0, 0], sizes = [16, 128], strides = [1, 1]} : vector<18x128xbf16> to vector<16x128xbf16>
    %3 = vector.extract_strided_slice %1 {offsets = [1, 0], sizes = [16, 128], strides = [1, 1]} : vector<18x128xbf16> to vector<16x128xbf16>
    %4 = vector.extract_strided_slice %1 {offsets = [2, 0], sizes = [16, 128], strides = [1, 1]} : vector<18x128xbf16> to vector<16x128xbf16>
    %5 = tpu.concatenate %2, %3, %4 in 1 : vector<16x128xbf16>, vector<16x128xbf16>, vector<16x128xbf16> -> vector<16x384xbf16>
    %c0_2 = arith.constant 0 : index
    %c0_3 = arith.constant 0 : index
    %6 = vector.load %arg3[%c0_2, %c0_3] : memref<384x128xbf16, #tpu.memory_space<vmem>>, vector<384x128xbf16>
    %cst = arith.constant dense<0.000000e+00> : vector<16x128xf32>
    %7 = tpu.matmul %5, %6, %cst {dimension_numbers = #tpu.dot_dimension_numbers<[1], [0], [0], [1], [0, 0, 1, 1], [], []>} : vector<16x384xbf16>, vector<384x128xbf16>, vector<16x128xf32> -> vector<16x128xf32>
    %c0_4 = arith.constant 0 : index
    %c0_5 = arith.constant 0 : index
    %8 = vector.load %arg4[%c0_4, %c0_5] : memref<1x128xf32, #tpu.memory_space<vmem>>, vector<1x128xf32>
    %9 = vector.broadcast %8 : vector<1x128xf32> to vector<16x128xf32>
    %10 = arith.addf %7, %9 : vector<16x128xf32>
    %c0_6 = arith.constant 0 : index
    %c0_7 = arith.constant 0 : index
    %c0_8 = arith.constant 0 : index
    %11 = vector.load %arg5[%c0_6, %c0_7, %c0_8] : memref<1x16x128xf32, #tpu.memory_space<vmem>>, vector<1x16x128xf32>
    %12 = vector.shape_cast %11 : vector<1x16x128xf32> to vector<16x128xf32>
    %13 = vector.shape_cast %10 : vector<16x128xf32> to vector<1x16x128xf32>
    tpu.vector_store %arg5[%c0_6, %c0_7, %c0_8], %13 {strides = array<i32>} : memref<1x16x128xf32, #tpu.memory_space<vmem>>, vector<1x16x128xf32>,
    return
  }
  func.func @transform_0(%arg0: i32, %arg1: i32) -> (i32, i32, i32) {
    %c0_i32 = arith.constant 0 : i32
    %c0_i32_0 = arith.constant 0 : i32
    %c0_i32_1 = arith.constant 0 : i32
    return %arg0, %c0_i32, %c0_i32_0 : i32, i32, i32
  }
  func.func @transform_1(%arg0: i32, %arg1: i32) -> (i32, i32) {
    %c0_i32 = arith.constant 0 : i32
    %c0_i32_0 = arith.constant 0 : i32
    %c0_i32_1 = arith.constant 0 : i32
    return %c0_i32, %c0_i32_0 : i32, i32
  }
  func.func @transform_2(%arg0: i32, %arg1: i32) -> (i32, i32) {
    %c0_i32 = arith.constant 0 : i32
    %c0_i32_0 = arith.constant 0 : i32
    %c0_i32_1 = arith.constant 0 : i32
    return %c0_i32, %c0_i32_0 : i32, i32
  }
  func.func @transform_3(%arg0: i32, %arg1: i32) -> (i32, i32, i32) {
    %c0_i32 = arith.constant 0 : i32
    %c0_i32_0 = arith.constant 0 : i32
    return %arg0, %arg1, %c0_i32 : i32, i32, i32
  }
}

</mosaic_0001>

<bundles_post_ra>
// kernel: forward.18
= control target key start
LH: loop header
LB: loop body
LE: loop exit
PB: predicated region body
PF: predicated region fallthrough
CT: control target
= control target key end

     0   :  { %s797_s12 = smov 0   ;;  %s799_s13 = smov 0   ;;  %s922_s0 = inlined_call_operand.vmem [shape: bf16[2,18,128], index: 0, kind: input, shape index: {}]   ;;  %s923_s1 = inlined_call_operand.vmem [shape: bf16[384,128], index: 1, kind: input, shape index: {}]   ;;  %s924_s2 = inlined_call_operand.vmem [shape: f32[1,128], index: 2, kind: input, shape index: {}]   ;;  %s925_s3 = inlined_call_operand.vmem [shape: bf16[2,16,128], index: 3, kind: output, shape index: {}]  }
   0x1   :  { %s801_s14 = smov 0  }
   0x2 LB: > { %s25_s15 = sadd.s32 1, %s769_s13  ;;  %p604_p0 = scmp.ge.s32.totalorder %s773_s14, 1  ;;  %s773_s14 = sphi %s801_s14, %s13_s14   ;;  %s769_s13 = sphi %s799_s13, %s927_s13   ;;  %s765_s12 = sphi %s797_s12, %s926_s12  }
   0x3   : > { %p27_p1 = scmp.ge.s32.totalorder %s25_s15, 2  ;;  %p151_p2 = scmp.lt.s32.totalorder %s773_s14, 3 }
   0x5   : > { %s929_s15 = smov (%p27_p1, %s25_s15), 0  ;;  %p152_p3 = pnand %p604_p0, %p151_p2 }
   0x6   : > { %v725_v0 = vld [vmem:[%s923_s1 + $0x40] sm:$0xff] (!%p152_p3)   ;;  %v775_v2 = vmov (!%p152_p3), 0.0   ;;  %v728_v4 = vld [vmem:[%s923_s1 + $0x48] sm:$0xff] (!%p152_p3)   ;;  %vm776_vm0 = vmmov (!%p152_p3), 0   ;;  %v731_v7 = vld [vmem:[%s923_s1 + $0x50] sm:$0xff] (!%p152_p3)   ;;  %p179_p4 = scmp.lt.s32.totalorder (!%p152_p3), %s765_s12, 1 }
   0x7   : > { %155 = sbr.rel (%p152_p3) target bundleno = 265 (0x109), region = 32  ;;  %v726_v1 = vld [vmem:[%s923_s1] sm:$0xff] (!%p152_p3)   ;;  %678 = vmatprep.subr.bf16.mxu1 (!%p152_p3), %v775_v2  ;;  %647 = vmatprep.subr.bf16.mxu0 (!%p152_p3), %v725_v0  ;;  %v729_v5 = vld [vmem:[%s923_s1 + $0x8] sm:$0xff] (!%p152_p3)   ;;  %v732_v8 = vld [vmem:[%s923_s1 + $0x10] sm:$0xff] (!%p152_p3)   ;;  %vm207_vm1 = vsmask.f32 (!%p152_p3), 7424 }
   0x8   : > { %v727_v3 = vld [vmem:[%s923_s1 + $0x80] sm:$0xff] (!%p152_p3)   ;;  %648 = vmatpush3.bf16.msra.mxu0 (!%p152_p3), %v726_v1  ;;  %694 = vmatprep.mubr.msk.bf16.mxu1 (!%p152_p3), %vm776_vm0, %v775_v2  ;;  %v730_v6 = vld [vmem:[%s923_s1 + $0x88] sm:$0xff] (!%p152_p3)   ;;  %v733_v9 = vld [vmem:[%s923_s1 + $0x90] sm:$0xff] (!%p152_p3)   ;;  %vm221_vm2 = vcmask (!%p152_p3), 1046528  }
   0x9   : > { %679 = vmatpush3.bf16.msra.mxu1 (!%p152_p3), %v727_v3  ;;  %649 = vmatprep.subr.bf16.mxu0 (!%p152_p3), %v728_v4  ;;  %v734_v10 = vld [vmem:[%s923_s1 + $0x58] sm:$0xff] (!%p152_p3)   ;;  %v737_v13 = vld [vmem:[%s923_s1 + $0x60] sm:$0xff] (!%p152_p3)   ;;  %v740_v16 = vld [vmem:[%s923_s1 + $0x68] sm:$0xff] (!%p152_p3)  }
   0xa   : > { %680 = vmatprep.subr.bf16.mxu1 (!%p152_p3), %v775_v2  ;;  %v735_v11 = vld [vmem:[%s923_s1 + $0x18] sm:$0xff] (!%p152_p3)   ;;  %v738_v14 = vld [vmem:[%s923_s1 + $0x20] sm:$0xff] (!%p152_p3)   ;;  %v741_v17 = vld [vmem:[%s923_s1 + $0x28] sm:$0xff] (!%p152_p3)  }
   0xb   : > { %v736_v12 = vld [vmem:[%s923_s1 + $0x98] sm:$0xff] (!%p152_p3)   ;;  %v739_v15 = vld [vmem:[%s923_s1 + $0xa0] sm:$0xff] (!%p152_p3)   ;;  %v742_v18 = vld [vmem:[%s923_s1 + $0xa8] sm:$0xff] (!%p152_p3)  }
   0xc   : > { %650 = vmatpush3.bf16.msra.mxu0 (!%p152_p3), %v729_v5  ;;  %v743_v19 = vld [vmem:[%s923_s1 + $0x70] sm:$0xff] (!%p152_p3)   ;;  %v746_v22 = vld [vmem:[%s923_s1 + $0x78] sm:$0xff] (!%p152_p3)   ;;  %v610_v39 = vld [vmem:[%s924_s2] ss:$0 sm:$0xff] (!%p152_p3) }
   0xd   : > { %681 = vmatpush3.bf16.msra.mxu1 (!%p152_p3), %v730_v6  ;;  %651 = vmatprep.subr.bf16.mxu0 (!%p152_p3), %v731_v7  ;;  %v744_v20 = vld [vmem:[%s923_s1 + $0x30] sm:$0xff] (!%p152_p3)   ;;  %v747_v28 = vld [vmem:[%s923_s1 + $0x38] sm:$0xff] (!%p152_p3)  }
   0xe   : > { %682 = vmatprep.subr.bf16.mxu1 %v775_v2  ;;  %s931_s12 = smov (!%p179_p4, %s765_s12), 1  ;;  %v745_v21 = vld [vmem:[%s923_s1 + $0xb0] sm:$0xff]   ;;  %v750_v31 = vld [vmem:[%s923_s1 + $0xb8] sm:$0xff]  }
   0xf   : > { %s698_s25 = smul.u32 12, %s931_s12  ;;  %s639_s24 = sshll.u32 %s931_s12, 3 }
  0x10   : > { %652 = vmatpush3.bf16.msra.mxu0 %v732_v8  ;;  %s192_s27 = scalar_lea.vmem %s925_s3, %s639_s24 }
  0x11   : > { %683 = vmatpush3.bf16.msra.mxu1 %v733_v9  ;;  %653 = vmatprep.subr.bf16.mxu0 %v734_v10  ;;  %s183_s9 = scalar_lea.vmem %s922_s0, %s698_s25 }
  0x12   : > { %684 = vmatprep.subr.bf16.mxu1 %v775_v2  ;;  %v748_v23 = vld [vmem:[%s183_s9] sm:$0xff]   ;;  %v749_v24 = vld [vmem:[%s183_s9 + $0x8] ss:$0 sps:$4 sm:$0x11]  }
  0x13   : > { %v209_v25 = vshrl.u32 %v748_v23, 16  ;;  %v211_v26 = vshll.u32 %v748_v23, 16  ;;  %v216_v27 = vshll.u32 %v749_v24, 16  ;;  %v222_v32 = vrot.slane %v748_v23, 1 }
  0x14   : > { %654 = vmatpush3.bf16.msra.mxu0 %v735_v11  ;;  %v223_v33 = vrot.slane %v749_v24, 1 }
  0x15   : > { %685 = vmatpush3.bf16.msra.mxu1 %v736_v12  ;;  %655 = vmatprep.subr.bf16.mxu0 %v737_v13  ;;  %v213_v29 = vrot.slane %v211_v26, 1  ;;  %v218_v30 = vrot.slane %v216_v27, 1 }
  0x16   : > { %686 = vmatprep.subr.bf16.mxu1 %v775_v2  ;;  %v224_v36 = vsel %vm221_vm2, %v222_v32, %v223_v33 }
  0x17   : > { %v214_v34 = vor.u32 %v213_v29, %v209_v25 }
  0x18   : > { %656 = vmatpush3.bf16.msra.mxu0 %v738_v14 }
  0x19   : > { %687 = vmatpush3.bf16.msra.mxu1 %v739_v15  ;;  %657 = vmatprep.subr.bf16.mxu0 %v740_v16  ;;  %v219_v35 = vsel %vm207_vm1, %v214_v34, %v218_v30 }
  0x1a   : > { %688 = vmatprep.subr.bf16.mxu1 %v775_v2  ;;  %457 = vmatprep.mubr.bf16.mxu0 %v219_v35 }
  0x1c   : > { %658 = vmatpush3.bf16.msra.mxu0 %v741_v17 }
  0x1d   : > { %689 = vmatpush3.bf16.msra.mxu1 %v742_v18  ;;  %659 = vmatprep.subr.bf16.mxu0 %v743_v19 }
  0x1e   : > { %690 = vmatprep.subr.bf16.mxu1 %v775_v2 }
  0x20   : > { %660 = vmatpush3.bf16.msra.mxu0 %v744_v20 }
  0x21   : > { %691 = vmatpush3.bf16.msra.mxu1 %v745_v21  ;;  %661 = vmatprep.subr.bf16.mxu0 %v746_v22 }
  0x22   : > { %692 = vmatprep.subr.bf16.mxu1 %v775_v2 }
  0x24   : > { %662 = vmatpush3.bf16.msra.mxu0 %v747_v28 }
  0x25   : > { %693 = vmatpush3.bf16.msra.mxu1 %v750_v31 }
  0x27   : > { %458 = vmatmul.mubr.bf16.vlgmr.msra.gmra.mrb[0].mxu0 %v748_v23 }
  0x28   : > { %695 = vmatmul.mubr.bf16.vlgmr.msra.gmra.mrb[0].mxu1 %v224_v36 }
  0xfa   : > { %v663_v37 = vpop.f32.mrb[0].mxu0 }
  0xfb   : > { %v664_v38 = vpop.f32.mrb[1].mxu0  ;;  %v500_v40 = vpop.f32.mrb[0].mxu1 }
  0xfc   : > { %v665_v41 = vadd.f32 %v664_v38, %v663_v37  ;;  %v666_v42 = vpop.f32.mrb[2].mxu0  ;;  %v696_v43 = vpop.f32.mrb[1].mxu1 }
  0xfd   : > { %v667_v44 = vpop.f32.mrb[3].mxu0  ;;  %v503_v45 = vpop.f32.mrb[2].mxu1 }
  0xfe   : > { %v460_v46 = vadd.f32 %v665_v41, %v610_v39  ;;  %v668_v47 = vadd.f32 %v667_v44, %v666_v42  ;;  %v697_v48 = vpop.f32.mrb[3].mxu1 }
 0x100   : > { %v501_v49 = vadd.f32 %v500_v40, %v460_v46  ;;  %v463_v50 = vadd.f32 %v668_v47, %v610_v39 }
 0x102   : > { %v504_v51 = vadd.f32 %v503_v45, %v463_v50  ;;  %v507_v52 = vmax.f32 %v501_v49, 0.0 }
 0x104   : > { %v508_v53 = vmax.f32 %v504_v51, 0.0 }
 0x106   : > { %v645_v54 = vpack.c.bf16 %v508_v53, %v507_v52 }
 0x108   : > { %646 = vst [vmem:[%s192_s27] sm:$0xff] %v645_v54  }
 0x109 PF: > { %s13_s14 = sadd.s32 1, %s773_s14   ;;  %s926_s12 = smov %s769_s13 }
 0x10a   : > { %p10_p5 = scmp.ge.s32.totalorder %s13_s14, 4   ;;  %s927_s13 = smov %s929_s15 }
 0x10c   :  { %12 = sbr.rel (!%p10_p5) target bundleno = 2 (0x2), region = 62 }

// kernel: forward.19
= control target key start
LH: loop header
LB: loop body
LE: loop exit
PB: predicated region body
PF: predicated region fallthrough
CT: control target
= control target key end

     0   :  { %s832_s12 = smov 0   ;;  %s834_s13 = smov 0   ;;  %s972_s0 = inlined_call_operand.vmem [shape: bf16[2,9,256], index: 0, kind: input, shape index: {}]   ;;  %s973_s1 = inlined_call_operand.vmem [shape: bf16[512,128], index: 1, kind: input, shape index: {}]   ;;  %s974_s2 = inlined_call_operand.vmem [shape: f32[1,128], index: 2, kind: input, shape index: {}]   ;;  %s975_s3 = inlined_call_operand.vmem [shape: bf16[2,8,128], index: 3, kind: output, shape index: {}]  }
   0x1   :  { %s836_s14 = smov 0  }
   0x2 LB: > { %s25_s15 = sadd.s32 1, %s806_s13  ;;  %p640_p0 = scmp.ge.s32.totalorder %s810_s14, 1  ;;  %s810_s14 = sphi %s836_s14, %s13_s14   ;;  %s806_s13 = sphi %s834_s13, %s977_s13   ;;  %s802_s12 = sphi %s832_s12, %s976_s12  }
   0x3   : > { %p27_p1 = scmp.ge.s32.totalorder %s25_s15, 2  ;;  %p151_p2 = scmp.lt.s32.totalorder %s810_s14, 3 }
   0x5   : > { %s979_s15 = smov (%p27_p1, %s25_s15), 0  ;;  %p152_p3 = pnand %p640_p0, %p151_p2 }
   0x6   : > { %v752_v0 = vld [vmem:[%s973_s1 + $0x40] sm:$0xff] (!%p152_p3)   ;;  %v756_v4 = vld [vmem:[%s973_s1 + $0x48] sm:$0xff] (!%p152_p3)   ;;  %v760_v8 = vld [vmem:[%s973_s1 + $0x50] sm:$0xff] (!%p152_p3)   ;;  %p177_p4 = scmp.lt.s32.totalorder (!%p152_p3), %s802_s12, 1 }
   0x7   : > { %155 = sbr.rel (%p152_p3) target bundleno = 262 (0x106), region = 32  ;;  %v753_v1 = vld [vmem:[%s973_s1 + $0xc0] sm:$0xff] (!%p152_p3)   ;;  %684 = vmatprep.subr.bf16.mxu0 (!%p152_p3), %v752_v0  ;;  %v757_v5 = vld [vmem:[%s973_s1 + $0xc8] sm:$0xff] (!%p152_p3)   ;;  %v761_v9 = vld [vmem:[%s973_s1 + $0xd0] sm:$0xff] (!%p152_p3)  }
   0x8   : > { %v754_v2 = vld [vmem:[%s973_s1] sm:$0xff] (!%p152_p3)   ;;  %706 = vmatprep.subr.bf16.mxu1 (!%p152_p3), %v753_v1  ;;  %v758_v6 = vld [vmem:[%s973_s1 + $0x8] sm:$0xff] (!%p152_p3)   ;;  %v762_v10 = vld [vmem:[%s973_s1 + $0x10] sm:$0xff] (!%p152_p3)  }
   0x9   : > { %v755_v3 = vld [vmem:[%s973_s1 + $0x80] sm:$0xff] (!%p152_p3)   ;;  %685 = vmatpush3.bf16.msra.mxu0 (!%p152_p3), %v754_v2  ;;  %v759_v7 = vld [vmem:[%s973_s1 + $0x88] sm:$0xff] (!%p152_p3)   ;;  %v763_v11 = vld [vmem:[%s973_s1 + $0x90] sm:$0xff] (!%p152_p3)  }
   0xa   : > { %707 = vmatpush3.bf16.msra.mxu1 (!%p152_p3), %v755_v3  ;;  %686 = vmatprep.subr.bf16.mxu0 (!%p152_p3), %v756_v4  ;;  %v764_v12 = vld [vmem:[%s973_s1 + $0x58] sm:$0xff] (!%p152_p3)   ;;  %v768_v16 = vld [vmem:[%s973_s1 + $0x60] sm:$0xff] (!%p152_p3)   ;;  %v772_v20 = vld [vmem:[%s973_s1 + $0x68] sm:$0xff] (!%p152_p3)  }
   0xb   : > { %708 = vmatprep.subr.bf16.mxu1 (!%p152_p3), %v757_v5  ;;  %v765_v13 = vld [vmem:[%s973_s1 + $0xd8] sm:$0xff] (!%p152_p3)   ;;  %v769_v17 = vld [vmem:[%s973_s1 + $0xe0] sm:$0xff] (!%p152_p3)   ;;  %v773_v21 = vld [vmem:[%s973_s1 + $0xe8] sm:$0xff] (!%p152_p3)  }
   0xc   : > { %v766_v14 = vld [vmem:[%s973_s1 + $0x18] sm:$0xff] (!%p152_p3)   ;;  %v770_v18 = vld [vmem:[%s973_s1 + $0x20] sm:$0xff] (!%p152_p3)   ;;  %v774_v22 = vld [vmem:[%s973_s1 + $0x28] sm:$0xff] (!%p152_p3)  }
   0xd   : > { %687 = vmatpush3.bf16.msra.mxu0 (!%p152_p3), %v758_v6  ;;  %v767_v15 = vld [vmem:[%s973_s1 + $0x98] sm:$0xff] (!%p152_p3)   ;;  %v771_v19 = vld [vmem:[%s973_s1 + $0xa0] sm:$0xff] (!%p152_p3)   ;;  %v775_v23 = vld [vmem:[%s973_s1 + $0xa8] sm:$0xff] (!%p152_p3)  }
   0xe   : > { %709 = vmatpush3.bf16.msra.mxu1 %v759_v7  ;;  %688 = vmatprep.subr.bf16.mxu0 %v760_v8  ;;  %s981_s12 = smov (!%p177_p4, %s802_s12), 1  ;;  %v776_v24 = vld [vmem:[%s973_s1 + $0x70] sm:$0xff]   ;;  %v780_v28 = vld [vmem:[%s973_s1 + $0x78] sm:$0xff]   ;;  %v648_v50 = vld [vmem:[%s974_s2] ss:$0 sm:$0xff] }
   0xf   : > { %710 = vmatprep.subr.bf16.mxu1 %v761_v9  ;;  %v777_v25 = vld [vmem:[%s973_s1 + $0xf0] sm:$0xff]   ;;  %s683_s24 = sshll.u32 %s981_s12, 4  ;;  %v781_v29 = vld [vmem:[%s973_s1 + $0xf8] sm:$0xff]   ;;  %s643_s17 = sshll.u32 %s981_s12, 2 }
  0x10   : > { %v778_v26 = vld [vmem:[%s973_s1 + $0x30] sm:$0xff]   ;;  %s181_s6 = scalar_lea.vmem %s972_s0, %s683_s24  ;;  %v782_v30 = vld [vmem:[%s973_s1 + $0x38] sm:$0xff]   ;;  %s188_s20 = scalar_lea.vmem %s975_s3, %s643_s17 }
  0x11   : > { %689 = vmatpush3.bf16.msra.mxu0 %v762_v10  ;;  %v779_v27 = vld [vmem:[%s973_s1 + $0xb0] sm:$0xff]   ;;  %v783_v31 = vld [vmem:[%s973_s1 + $0xb8] sm:$0xff]   ;;  %v190_v32 = vld [vmem:[%s181_s6] sm:$0xff] }
  0x12   : > { %711 = vmatpush3.bf16.msra.mxu1 %v763_v11  ;;  %690 = vmatprep.subr.bf16.mxu0 %v764_v12  ;;  %v191_v33 = vld [vmem:[%s181_s6 + $0x8] sm:$0x11]  ;;  %v645_v34 = vcombine.high %v190_v32, %v190_v32  ;;  %v644_v37 = vcombine.low %v190_v32, %v190_v32 }
  0x13   : > { %712 = vmatprep.subr.bf16.mxu1 %v765_v13  ;;  %v646_v35 = vcombine.low %v190_v32, %v191_v33  ;;  %v647_v36 = vcombine.high %v190_v32, %v191_v33 }
  0x14   : > { %515 = vmatprep.mubr.bf16.mxu0 %v645_v34 }
  0x15   : > { %691 = vmatpush3.bf16.msra.mxu0 %v766_v14  ;;  %v212_v38 = vshrl.u32 %v647_v36, 16  ;;  %v214_v39 = vshll.u32 %v647_v36, 16  ;;  %v205_v40 = vshrl.u32 %v646_v35, 16  ;;  %v207_v41 = vshll.u32 %v646_v35, 16 }
  0x16   : > { %713 = vmatpush3.bf16.msra.mxu1 %v767_v15  ;;  %692 = vmatprep.subr.bf16.mxu0 %v768_v16 }
  0x17   : > { %714 = vmatprep.subr.bf16.mxu1 %v769_v17  ;;  %v216_v42 = vrot.slane %v214_v39, 1  ;;  %v209_v43 = vrot.slane %v207_v41, 1 }
  0x19   : > { %693 = vmatpush3.bf16.msra.mxu0 %v770_v18  ;;  %v217_v44 = vor.u32 %v216_v42, %v212_v38  ;;  %v210_v45 = vor.u32 %v209_v43, %v205_v40 }
  0x1a   : > { %715 = vmatpush3.bf16.msra.mxu1 %v771_v19  ;;  %694 = vmatprep.subr.bf16.mxu0 %v772_v20 }
  0x1b   : > { %716 = vmatprep.subr.bf16.mxu1 %v773_v21  ;;  %555 = vmatprep.mubr.bf16.mxu1 %v217_v44 }
  0x1d   : > { %695 = vmatpush3.bf16.msra.mxu0 %v774_v22 }
  0x1e   : > { %717 = vmatpush3.bf16.msra.mxu1 %v775_v23  ;;  %696 = vmatprep.subr.bf16.mxu0 %v776_v24 }
  0x1f   : > { %718 = vmatprep.subr.bf16.mxu1 %v777_v25 }
  0x21   : > { %697 = vmatpush3.bf16.msra.mxu0 %v778_v26 }
  0x22   : > { %719 = vmatpush3.bf16.msra.mxu1 %v779_v27  ;;  %698 = vmatprep.subr.bf16.mxu0 %v780_v28 }
  0x23   : > { %720 = vmatprep.subr.bf16.mxu1 %v781_v29 }
  0x25   : > { %699 = vmatpush3.bf16.msra.mxu0 %v782_v30 }
  0x26   : > { %721 = vmatpush3.bf16.msra.mxu1 %v783_v31 }
  0x28   : > { %516 = vmatmul.mubr.bf16.vlgmr.msra.gmra.mrb[0].mxu0 %v644_v37 }
  0x29   : > { %556 = vmatmul.mubr.bf16.vlgmr.msra.gmra.mrb[0].mxu1 %v210_v45 }
  0xfb   : > { %v700_v46 = vpop.f32.mrb[0].mxu0 }
  0xfc   : > { %v701_v47 = vpop.f32.mrb[1].mxu0  ;;  %v722_v52 = vpop.f32.mrb[0].mxu1 }
  0xfd   : > { %v702_v48 = vadd.f32 %v701_v47, %v700_v46  ;;  %v703_v49 = vpop.f32.mrb[2].mxu0  ;;  %v723_v54 = vpop.f32.mrb[1].mxu1 }
  0xfe   : > { %v704_v51 = vpop.f32.mrb[3].mxu0  ;;  %v724_v55 = vadd.f32 %v723_v54, %v722_v52  ;;  %v725_v56 = vpop.f32.mrb[2].mxu1 }
  0xff   : > { %v518_v53 = vadd.f32 %v702_v48, %v648_v50  ;;  %v726_v57 = vpop.f32.mrb[3].mxu1 }
 0x101   : > { %v558_v58 = vadd.f32 %v724_v55, %v518_v53 }
 0x103   : > { %v563_v59 = vpack.c.bf16 %v558_v58, %v558_v58 }
 0x105   : > { %564 = vst [vmem:[%s188_s20] sm:$0xf] %v563_v59 }
 0x106 PF: > { %s13_s14 = sadd.s32 1, %s810_s14   ;;  %s976_s12 = smov %s806_s13 }
 0x107   : > { %p10_p5 = scmp.ge.s32.totalorder %s13_s14, 4   ;;  %s977_s13 = smov %s979_s15 }
 0x109   :  { %12 = sbr.rel (!%p10_p5) target bundleno = 2 (0x2), region = 62 }

// kernel: forward.20
= control target key start
LH: loop header
LB: loop body
LE: loop exit
PB: predicated region body
PF: predicated region fallthrough
CT: control target
= control target key end

     0   :  { %s981_s18 = smov 0   ;;  %s983_s19 = smov 0   ;;  %s1152_s0 = inlined_call_operand.vmem [shape: bf16[2,14,128], index: 0, kind: input, shape index: {}]   ;;  %s1153_s1 = inlined_call_operand.vmem [shape: bf16[384,128], index: 1, kind: input, shape index: {}]   ;;  %s1154_s2 = inlined_call_operand.vmem [shape: f32[1,128], index: 2, kind: input, shape index: {}]   ;;  %s1155_s3 = inlined_call_operand.vmem [shape: bf16[128,128], index: 3, kind: input, shape index: {}]   ;;  %s1156_s4 = inlined_call_operand.vmem [shape: f32[1,128], index: 4, kind: input, shape index: {}]   ;;  %s1157_s5 = inlined_call_operand.vmem [shape: bf16[2,8,128], index: 5, kind: output, shape index: {}]  }
   0x1   :  { %s985_s20 = smov 0  }
   0x2 LB: > { %s27_s21 = sadd.s32 1, %s942_s19  ;;  %p743_p0 = scmp.ge.s32.totalorder %s946_s20, 1  ;;  %s946_s20 = sphi %s985_s20, %s15_s20   ;;  %s942_s19 = sphi %s983_s19, %s1159_s19   ;;  %s938_s18 = sphi %s981_s18, %s1158_s18  }
   0x3   : > { %p29_p1 = scmp.ge.s32.totalorder %s27_s21, 2  ;;  %p201_p2 = scmp.lt.s32.totalorder %s946_s20, 3 }
   0x5   : > { %s1161_s21 = smov (%p29_p1, %s27_s21), 0  ;;  %p202_p3 = pnand %p743_p0, %p201_p2 }
   0x6   : > { %v892_v0 = vld [vmem:[%s1153_s1 + $0x40] sm:$0xff] (!%p202_p3)   ;;  %v948_v2 = vmov (!%p202_p3), 0.0   ;;  %v895_v4 = vld [vmem:[%s1153_s1 + $0x48] sm:$0xff] (!%p202_p3)   ;;  %v898_v7 = vld [vmem:[%s1153_s1 + $0x50] sm:$0xff] (!%p202_p3)   ;;  %vm949_vm0 = vmmov (!%p202_p3), 0   ;;  %p231_p4 = scmp.lt.s32.totalorder (!%p202_p3), %s938_s18, 1 }
   0x7   : > { %205 = sbr.rel (%p202_p3) target bundleno = 481 (0x1e1), region = 40  ;;  %v893_v1 = vld [vmem:[%s1153_s1] sm:$0xff] (!%p202_p3)   ;;  %825 = vmatprep.subr.bf16.mxu1 (!%p202_p3), %v948_v2  ;;  %785 = vmatprep.subr.bf16.mxu0 (!%p202_p3), %v892_v0  ;;  %v896_v5 = vld [vmem:[%s1153_s1 + $0x8] sm:$0xff] (!%p202_p3)   ;;  %v899_v8 = vld [vmem:[%s1153_s1 + $0x10] sm:$0xff] (!%p202_p3)   ;;  %v950_v25 = vmov (!%p202_p3), 0   ;;  %vm660_vm1 = vcmask (!%p202_p3), 1044480  }
   0x8   : > { %v894_v3 = vld [vmem:[%s1153_s1 + $0x80] sm:$0xff] (!%p202_p3)   ;;  %786 = vmatpush3.bf16.msra.mxu0 (!%p202_p3), %v893_v1  ;;  %v897_v6 = vld [vmem:[%s1153_s1 + $0x88] sm:$0xff] (!%p202_p3)   ;;  %841 = vmatprep.mubr.msk.bf16.mxu1 (!%p202_p3), %vm949_vm0, %v948_v2  ;;  %v900_v9 = vld [vmem:[%s1153_s1 + $0x90] sm:$0xff] (!%p202_p3)  }
   0x9   : > { %826 = vmatpush3.bf16.msra.mxu1 (!%p202_p3), %v894_v3  ;;  %787 = vmatprep.subr.bf16.mxu0 (!%p202_p3), %v895_v4  ;;  %v901_v10 = vld [vmem:[%s1153_s1 + $0x58] sm:$0xff] (!%p202_p3)   ;;  %v904_v13 = vld [vmem:[%s1153_s1 + $0x60] sm:$0xff] (!%p202_p3)   ;;  %v907_v16 = vld [vmem:[%s1153_s1 + $0x68] sm:$0xff] (!%p202_p3)  }
   0xa   : > { %827 = vmatprep.subr.bf16.mxu1 (!%p202_p3), %v948_v2  ;;  %v902_v11 = vld [vmem:[%s1153_s1 + $0x18] sm:$0xff] (!%p202_p3)   ;;  %v905_v14 = vld [vmem:[%s1153_s1 + $0x20] sm:$0xff] (!%p202_p3)   ;;  %v908_v17 = vld [vmem:[%s1153_s1 + $0x28] sm:$0xff] (!%p202_p3)  }
   0xb   : > { %v903_v12 = vld [vmem:[%s1153_s1 + $0x98] sm:$0xff] (!%p202_p3)   ;;  %v906_v15 = vld [vmem:[%s1153_s1 + $0xa0] sm:$0xff] (!%p202_p3)   ;;  %v909_v18 = vld [vmem:[%s1153_s1 + $0xa8] sm:$0xff] (!%p202_p3)  }
   0xc   : > { %788 = vmatpush3.bf16.msra.mxu0 (!%p202_p3), %v896_v5  ;;  %v910_v19 = vld [vmem:[%s1153_s1 + $0x70] sm:$0xff] (!%p202_p3)   ;;  %v913_v24 = vld [vmem:[%s1153_s1 + $0x78] sm:$0xff] (!%p202_p3)   ;;  %v916_v37 = vld [vmem:[%s1155_s3] sm:$0xff] (!%p202_p3)  }
   0xd   : > { %828 = vmatpush3.bf16.msra.mxu1 (!%p202_p3), %v897_v6  ;;  %789 = vmatprep.subr.bf16.mxu0 (!%p202_p3), %v898_v7  ;;  %v911_v20 = vld [vmem:[%s1153_s1 + $0x30] sm:$0xff] (!%p202_p3)   ;;  %v914_v29 = vld [vmem:[%s1153_s1 + $0x38] sm:$0xff] (!%p202_p3)   ;;  %v917_v38 = vld [vmem:[%s1155_s3 + $0x8] sm:$0xff] (!%p202_p3)  }
   0xe   : > { %829 = vmatprep.subr.bf16.mxu1 %v948_v2  ;;  %s1163_s18 = smov (!%p231_p4, %s938_s18), 1  ;;  %v912_v21 = vld [vmem:[%s1153_s1 + $0xb0] sm:$0xff]   ;;  %v915_v32 = vld [vmem:[%s1153_s1 + $0xb8] sm:$0xff]   ;;  %v920_v41 = vld [vmem:[%s1155_s3 + $0x20] sm:$0xff]  }
   0xf   : > { %s784_s8 = sshll.u32 %s1163_s18, 3  ;;  %v918_v39 = vld [vmem:[%s1155_s3 + $0x10] sm:$0xff]   ;;  %v919_v40 = vld [vmem:[%s1155_s3 + $0x18] sm:$0xff]   ;;  %v921_v42 = vld [vmem:[%s1155_s3 + $0x28] sm:$0xff]   ;;  %s746_s6 = sshll.u32 %s1163_s18, 2 }
  0x10   : > { %790 = vmatpush3.bf16.msra.mxu0 %v899_v8  ;;  %s235_s17 = scalar_lea.vmem %s1152_s0, %s784_s8  ;;  %v922_v43 = vld [vmem:[%s1155_s3 + $0x30] sm:$0xff]   ;;  %v923_v44 = vld [vmem:[%s1155_s3 + $0x38] sm:$0xff]   ;;  %v748_v48 = vld [vmem:[%s1154_s2] ss:$0 sm:$0xff]  ;;  %s242_s9 = scalar_lea.vmem %s1157_s5, %s746_s6 }
  0x11   : > { %830 = vmatpush3.bf16.msra.mxu1 %v900_v9  ;;  %791 = vmatprep.subr.bf16.mxu0 %v901_v10  ;;  %v1080_v22 = vld [vmem:[%s235_s17] sm:$0xf]  ;;  %v1082_v23 = vld [vmem:[%s235_s17 + $0x4] sm:$0x7] }
  0x12   : > { %831 = vmatprep.subr.bf16.mxu1 %v948_v2  ;;  %v246_v26 = vmax.bf16 %v950_v25, %v1080_v22  ;;  %v247_v27 = vmax.bf16 %v950_v25, %v1082_v23  ;;  %v656_v59 = vunpack.c.l.bf16 %v1080_v22  ;;  %v657_v60 = vunpack.c.l.bf16 %v1082_v23  ;;  %v773_v63 = vld [vmem:[%s1156_s4] ss:$0 sm:$0xff] }
  0x14   : > { %792 = vmatpush3.bf16.msra.mxu0 %v902_v11  ;;  %v747_v28 = vcombine.low %v246_v26, %v247_v27  ;;  %v661_v61 = vrot.slane %v656_v59, 3  ;;  %v662_v62 = vrot.slane %v657_v60, 3 }
  0x15   : > { %832 = vmatpush3.bf16.msra.mxu1 %v903_v12  ;;  %793 = vmatprep.subr.bf16.mxu0 %v904_v13 }
  0x16   : > { %833 = vmatprep.subr.bf16.mxu1 %v948_v2  ;;  %v254_v30 = vshrl.u32 %v747_v28, 16  ;;  %v257_v31 = vshll.u32 %v747_v28, 16  ;;  %v262_v33 = vrot.slane %v747_v28, 3  ;;  %v663_v1 = vsel %vm660_vm1, %v661_v61, %v662_v62 }
  0x18   : > { %794 = vmatpush3.bf16.msra.mxu0 %v905_v14  ;;  %v256_v34 = vrot.slane %v254_v30, 1  ;;  %v259_v35 = vrot.slane %v257_v31, 2 }
  0x19   : > { %834 = vmatpush3.bf16.msra.mxu1 %v906_v15  ;;  %795 = vmatprep.subr.bf16.mxu0 %v907_v16 }
  0x1a   : > { %835 = vmatprep.subr.bf16.mxu1 %v948_v2  ;;  %v260_v36 = vor.u32 %v259_v35, %v256_v34 }
  0x1c   : > { %796 = vmatpush3.bf16.msra.mxu0 %v908_v17  ;;  %495 = vmatprep.mubr.bf16.mxu0 %v260_v36 }
  0x1d   : > { %836 = vmatpush3.bf16.msra.mxu1 %v909_v18  ;;  %797 = vmatprep.subr.bf16.mxu0 %v910_v19 }
  0x1e   : > { %837 = vmatprep.subr.bf16.mxu1 %v948_v2 }
  0x20   : > { %798 = vmatpush3.bf16.msra.mxu0 %v911_v20 }
  0x21   : > { %838 = vmatpush3.bf16.msra.mxu1 %v912_v21  ;;  %799 = vmatprep.subr.bf16.mxu0 %v913_v24 }
  0x22   : > { %839 = vmatprep.subr.bf16.mxu1 %v948_v2 }
  0x24   : > { %800 = vmatpush3.bf16.msra.mxu0 %v914_v29 }
  0x25   : > { %840 = vmatpush3.bf16.msra.mxu1 %v915_v32  ;;  %845 = vmatprep.subr.bf16.mxu0 %v948_v2 }
  0x27   : > { %496 = vmatmul.mubr.bf16.vlgmr.msra.gmra.mrb[0].mxu0 %v246_v26 }
  0x28   : > { %842 = vmatmul.mubr.bf16.vlgmr.msra.gmra.mrb[0].mxu1 %v262_v33  ;;  %846 = vmatpush3.bf16.msra.mxu0 %v916_v37 }
  0x29   : > { %861 = vmatprep.mubr.msk.bf16.mxu0 %vm949_vm0, %v948_v2  ;;  %847 = vmatprep.subr.bf16.mxu0 %v948_v2 }
  0x2c   : > { %848 = vmatpush3.bf16.msra.mxu0 %v917_v38 }
  0x2d   : > { %849 = vmatprep.subr.bf16.mxu0 %v948_v2 }
  0x30   : > { %850 = vmatpush3.bf16.msra.mxu0 %v918_v39 }
  0x31   : > { %851 = vmatprep.subr.bf16.mxu0 %v948_v2 }
  0x34   : > { %852 = vmatpush3.bf16.msra.mxu0 %v919_v40 }
  0x35   : > { %853 = vmatprep.subr.bf16.mxu0 %v948_v2 }
  0x38   : > { %854 = vmatpush3.bf16.msra.mxu0 %v920_v41 }
  0x39   : > { %855 = vmatprep.subr.bf16.mxu0 %v948_v2 }
  0x3c   : > { %856 = vmatpush3.bf16.msra.mxu0 %v921_v42 }
  0x3d   : > { %857 = vmatprep.subr.bf16.mxu0 %v948_v2 }
  0x40   : > { %858 = vmatpush3.bf16.msra.mxu0 %v922_v43 }
  0x41   : > { %859 = vmatprep.subr.bf16.mxu0 %v948_v2 }
  0x44   : > { %860 = vmatpush3.bf16.msra.mxu0 %v923_v44 }
  0xfa   : > { %v801_v45 = vpop.f32.mrb[0].mxu0 }
  0xfb   : > { %v537_v46 = vpop.f32.mrb[0].mxu1  ;;  %v802_v47 = vpop.f32.mrb[1].mxu0 }
  0xfc   : > { %v843_v49 = vpop.f32.mrb[1].mxu1  ;;  %v803_v50 = vadd.f32 %v802_v47, %v801_v45  ;;  %v804_v51 = vpop.f32.mrb[2].mxu0 }
  0xfd   : > { %v540_v52 = vpop.f32.mrb[2].mxu1  ;;  %v805_v53 = vpop.f32.mrb[3].mxu0 }
  0xfe   : > { %v844_v54 = vpop.f32.mrb[3].mxu1  ;;  %v498_v55 = vadd.f32 %v803_v50, %v748_v48 }
 0x100   : > { %v538_v56 = vadd.f32 %v537_v46, %v498_v55 }
 0x102   : > { %v543_v57 = vmax.f32 %v538_v56, 0.0 }
 0x104   : > { %v544_v58 = vpack.c.bf16 %v543_v57, %v543_v57 }
 0x106   : > { %862 = vmatmul.mubr.bf16.vlgmr.msra.gmra.mrb[4].mxu0 %v544_v58 }
 0x1d9   : > { %v650_v0 = vpop.f32.mrb[4].mxu0 }
 0x1da   : > { %v651_v2 = vadd.f32 %v773_v63, %v650_v0  ;;  %v863_v3 = vpop.f32.mrb[5].mxu0 }
 0x1db   : > { %v653_v4 = vpop.f32.mrb[6].mxu0 }
 0x1dc   : > { %v665_v5 = vadd.f32 %v663_v1, %v651_v2  ;;  %v864_v6 = vpop.f32.mrb[7].mxu0 }
 0x1de   : > { %v666_v7 = vpack.c.bf16 %v665_v5, %v665_v5 }
 0x1e0   : > { %667 = vst [vmem:[%s242_s9] sm:$0xf] %v666_v7 }
 0x1e1 PF: > { %s15_s20 = sadd.s32 1, %s946_s20   ;;  %s1158_s18 = smov %s942_s19 }
 0x1e2   : > { %p12_p5 = scmp.ge.s32.totalorder %s15_s20, 4   ;;  %s1159_s19 = smov %s1161_s21 }
 0x1e4   :  { %14 = sbr.rel (!%p12_p5) target bundleno = 2 (0x2), region = 70 }

// kernel: forward.21
= control target key start
LH: loop header
LB: loop body
LE: loop exit
PB: predicated region body
PF: predicated region fallthrough
CT: control target
= control target key end

     0   :  { %s980_s18 = smov 0   ;;  %s982_s19 = smov 0   ;;  %s1151_s0 = inlined_call_operand.vmem [shape: bf16[2,10,128], index: 0, kind: input, shape index: {}]   ;;  %s1152_s1 = inlined_call_operand.vmem [shape: bf16[384,128], index: 1, kind: input, shape index: {}]   ;;  %s1153_s2 = inlined_call_operand.vmem [shape: f32[1,128], index: 2, kind: input, shape index: {}]   ;;  %s1154_s3 = inlined_call_operand.vmem [shape: bf16[128,128], index: 3, kind: input, shape index: {}]   ;;  %s1155_s4 = inlined_call_operand.vmem [shape: f32[1,128], index: 4, kind: input, shape index: {}]   ;;  %s1156_s5 = inlined_call_operand.vmem [shape: bf16[2,8,128], index: 5, kind: output, shape index: {}]  }
   0x1   :  { %s984_s20 = smov 0  }
   0x2 LB: > { %s27_s21 = sadd.s32 1, %s941_s19  ;;  %p742_p0 = scmp.ge.s32.totalorder %s945_s20, 1  ;;  %s945_s20 = sphi %s984_s20, %s15_s20   ;;  %s941_s19 = sphi %s982_s19, %s1158_s19   ;;  %s937_s18 = sphi %s980_s18, %s1157_s18  }
   0x3   : > { %p29_p1 = scmp.ge.s32.totalorder %s27_s21, 2  ;;  %p201_p2 = scmp.lt.s32.totalorder %s945_s20, 3 }
   0x5   : > { %s1160_s21 = smov (%p29_p1, %s27_s21), 0  ;;  %p202_p3 = pnand %p742_p0, %p201_p2 }
   0x6   : > { %v891_v0 = vld [vmem:[%s1152_s1 + $0x40] sm:$0xff] (!%p202_p3)   ;;  %v947_v2 = vmov (!%p202_p3), 0.0   ;;  %v894_v4 = vld [vmem:[%s1152_s1 + $0x48] sm:$0xff] (!%p202_p3)   ;;  %v897_v7 = vld [vmem:[%s1152_s1 + $0x50] sm:$0xff] (!%p202_p3)   ;;  %vm948_vm0 = vmmov (!%p202_p3), 0   ;;  %p231_p4 = scmp.lt.s32.totalorder (!%p202_p3), %s937_s18, 1 }
   0x7   : > { %205 = sbr.rel (%p202_p3) target bundleno = 481 (0x1e1), region = 40  ;;  %v892_v1 = vld [vmem:[%s1152_s1] sm:$0xff] (!%p202_p3)   ;;  %824 = vmatprep.subr.bf16.mxu1 (!%p202_p3), %v947_v2  ;;  %784 = vmatprep.subr.bf16.mxu0 (!%p202_p3), %v891_v0  ;;  %v895_v5 = vld [vmem:[%s1152_s1 + $0x8] sm:$0xff] (!%p202_p3)   ;;  %v898_v8 = vld [vmem:[%s1152_s1 + $0x10] sm:$0xff] (!%p202_p3)   ;;  %v949_v25 = vmov (!%p202_p3), 0   ;;  %vm659_vm1 = vcmask (!%p202_p3), 1046528  }
   0x8   : > { %v893_v3 = vld [vmem:[%s1152_s1 + $0x80] sm:$0xff] (!%p202_p3)   ;;  %785 = vmatpush3.bf16.msra.mxu0 (!%p202_p3), %v892_v1  ;;  %v896_v6 = vld [vmem:[%s1152_s1 + $0x88] sm:$0xff] (!%p202_p3)   ;;  %840 = vmatprep.mubr.msk.bf16.mxu1 (!%p202_p3), %vm948_vm0, %v947_v2  ;;  %v899_v9 = vld [vmem:[%s1152_s1 + $0x90] sm:$0xff] (!%p202_p3)  }
   0x9   : > { %825 = vmatpush3.bf16.msra.mxu1 (!%p202_p3), %v893_v3  ;;  %786 = vmatprep.subr.bf16.mxu0 (!%p202_p3), %v894_v4  ;;  %v900_v10 = vld [vmem:[%s1152_s1 + $0x58] sm:$0xff] (!%p202_p3)   ;;  %v903_v13 = vld [vmem:[%s1152_s1 + $0x60] sm:$0xff] (!%p202_p3)   ;;  %v906_v16 = vld [vmem:[%s1152_s1 + $0x68] sm:$0xff] (!%p202_p3)  }
   0xa   : > { %826 = vmatprep.subr.bf16.mxu1 (!%p202_p3), %v947_v2  ;;  %v901_v11 = vld [vmem:[%s1152_s1 + $0x18] sm:$0xff] (!%p202_p3)   ;;  %v904_v14 = vld [vmem:[%s1152_s1 + $0x20] sm:$0xff] (!%p202_p3)   ;;  %v907_v17 = vld [vmem:[%s1152_s1 + $0x28] sm:$0xff] (!%p202_p3)  }
   0xb   : > { %v902_v12 = vld [vmem:[%s1152_s1 + $0x98] sm:$0xff] (!%p202_p3)   ;;  %v905_v15 = vld [vmem:[%s1152_s1 + $0xa0] sm:$0xff] (!%p202_p3)   ;;  %v908_v18 = vld [vmem:[%s1152_s1 + $0xa8] sm:$0xff] (!%p202_p3)  }
   0xc   : > { %787 = vmatpush3.bf16.msra.mxu0 (!%p202_p3), %v895_v5  ;;  %v909_v19 = vld [vmem:[%s1152_s1 + $0x70] sm:$0xff] (!%p202_p3)   ;;  %v912_v24 = vld [vmem:[%s1152_s1 + $0x78] sm:$0xff] (!%p202_p3)   ;;  %v915_v36 = vld [vmem:[%s1154_s3] sm:$0xff] (!%p202_p3)  }
   0xd   : > { %827 = vmatpush3.bf16.msra.mxu1 (!%p202_p3), %v896_v6  ;;  %788 = vmatprep.subr.bf16.mxu0 (!%p202_p3), %v897_v7  ;;  %v910_v20 = vld [vmem:[%s1152_s1 + $0x30] sm:$0xff] (!%p202_p3)   ;;  %v913_v29 = vld [vmem:[%s1152_s1 + $0x38] sm:$0xff] (!%p202_p3)   ;;  %v916_v37 = vld [vmem:[%s1154_s3 + $0x8] sm:$0xff] (!%p202_p3)  }
   0xe   : > { %828 = vmatprep.subr.bf16.mxu1 %v947_v2  ;;  %s1162_s18 = smov (!%p231_p4, %s937_s18), 1  ;;  %v911_v21 = vld [vmem:[%s1152_s1 + $0xb0] sm:$0xff]   ;;  %v914_v32 = vld [vmem:[%s1152_s1 + $0xb8] sm:$0xff]   ;;  %v919_v40 = vld [vmem:[%s1154_s3 + $0x20] sm:$0xff]  }
   0xf   : > { %s783_s8 = sshll.u32 %s1162_s18, 3  ;;  %v917_v38 = vld [vmem:[%s1154_s3 + $0x10] sm:$0xff]   ;;  %v918_v39 = vld [vmem:[%s1154_s3 + $0x18] sm:$0xff]   ;;  %v920_v41 = vld [vmem:[%s1154_s3 + $0x28] sm:$0xff]   ;;  %s745_s6 = sshll.u32 %s1162_s18, 2 }
  0x10   : > { %789 = vmatpush3.bf16.msra.mxu0 %v898_v8  ;;  %s235_s17 = scalar_lea.vmem %s1151_s0, %s783_s8  ;;  %v921_v42 = vld [vmem:[%s1154_s3 + $0x30] sm:$0xff]   ;;  %v922_v43 = vld [vmem:[%s1154_s3 + $0x38] sm:$0xff]   ;;  %v747_v47 = vld [vmem:[%s1153_s2] ss:$0 sm:$0xff]  ;;  %s242_s9 = scalar_lea.vmem %s1156_s5, %s745_s6 }
  0x11   : > { %829 = vmatpush3.bf16.msra.mxu1 %v899_v9  ;;  %790 = vmatprep.subr.bf16.mxu0 %v900_v10  ;;  %v1079_v22 = vld [vmem:[%s235_s17] sm:$0xf]  ;;  %v1081_v23 = vld [vmem:[%s235_s17 + $0x4] sm:$0x1] }
  0x12   : > { %830 = vmatprep.subr.bf16.mxu1 %v947_v2  ;;  %v246_v26 = vmax.bf16 %v949_v25, %v1079_v22  ;;  %v247_v27 = vmax.bf16 %v949_v25, %v1081_v23  ;;  %v655_v58 = vunpack.c.l.bf16 %v1079_v22  ;;  %v656_v59 = vunpack.c.l.bf16 %v1081_v23  ;;  %v772_v62 = vld [vmem:[%s1155_s4] ss:$0 sm:$0xff] }
  0x14   : > { %791 = vmatpush3.bf16.msra.mxu0 %v901_v11  ;;  %v746_v28 = vcombine.low %v246_v26, %v247_v27  ;;  %v660_v60 = vrot.slane %v655_v58, 1  ;;  %v661_v61 = vrot.slane %v656_v59, 1 }
  0x15   : > { %831 = vmatpush3.bf16.msra.mxu1 %v902_v12  ;;  %792 = vmatprep.subr.bf16.mxu0 %v903_v13 }
  0x16   : > { %832 = vmatprep.subr.bf16.mxu1 %v947_v2  ;;  %v254_v30 = vshrl.u32 %v746_v28, 16  ;;  %v256_v31 = vshll.u32 %v746_v28, 16  ;;  %v261_v34 = vrot.slane %v746_v28, 1  ;;  %v662_v0 = vsel %vm659_vm1, %v660_v60, %v661_v61 }
  0x18   : > { %793 = vmatpush3.bf16.msra.mxu0 %v904_v14  ;;  %v258_v33 = vrot.slane %v256_v31, 1 }
  0x19   : > { %833 = vmatpush3.bf16.msra.mxu1 %v905_v15  ;;  %794 = vmatprep.subr.bf16.mxu0 %v906_v16 }
  0x1a   : > { %834 = vmatprep.subr.bf16.mxu1 %v947_v2  ;;  %v259_v35 = vor.u32 %v258_v33, %v254_v30 }
  0x1c   : > { %795 = vmatpush3.bf16.msra.mxu0 %v907_v17  ;;  %494 = vmatprep.mubr.bf16.mxu0 %v259_v35 }
  0x1d   : > { %835 = vmatpush3.bf16.msra.mxu1 %v908_v18  ;;  %796 = vmatprep.subr.bf16.mxu0 %v909_v19 }
  0x1e   : > { %836 = vmatprep.subr.bf16.mxu1 %v947_v2 }
  0x20   : > { %797 = vmatpush3.bf16.msra.mxu0 %v910_v20 }
  0x21   : > { %837 = vmatpush3.bf16.msra.mxu1 %v911_v21  ;;  %798 = vmatprep.subr.bf16.mxu0 %v912_v24 }
  0x22   : > { %838 = vmatprep.subr.bf16.mxu1 %v947_v2 }
  0x24   : > { %799 = vmatpush3.bf16.msra.mxu0 %v913_v29 }
  0x25   : > { %839 = vmatpush3.bf16.msra.mxu1 %v914_v32  ;;  %844 = vmatprep.subr.bf16.mxu0 %v947_v2 }
  0x27   : > { %495 = vmatmul.mubr.bf16.vlgmr.msra.gmra.mrb[0].mxu0 %v246_v26 }
  0x28   : > { %841 = vmatmul.mubr.bf16.vlgmr.msra.gmra.mrb[0].mxu1 %v261_v34  ;;  %845 = vmatpush3.bf16.msra.mxu0 %v915_v36 }
  0x29   : > { %860 = vmatprep.mubr.msk.bf16.mxu0 %vm948_vm0, %v947_v2  ;;  %846 = vmatprep.subr.bf16.mxu0 %v947_v2 }
  0x2c   : > { %847 = vmatpush3.bf16.msra.mxu0 %v916_v37 }
  0x2d   : > { %848 = vmatprep.subr.bf16.mxu0 %v947_v2 }
  0x30   : > { %849 = vmatpush3.bf16.msra.mxu0 %v917_v38 }
  0x31   : > { %850 = vmatprep.subr.bf16.mxu0 %v947_v2 }
  0x34   : > { %851 = vmatpush3.bf16.msra.mxu0 %v918_v39 }
  0x35   : > { %852 = vmatprep.subr.bf16.mxu0 %v947_v2 }
  0x38   : > { %853 = vmatpush3.bf16.msra.mxu0 %v919_v40 }
  0x39   : > { %854 = vmatprep.subr.bf16.mxu0 %v947_v2 }
  0x3c   : > { %855 = vmatpush3.bf16.msra.mxu0 %v920_v41 }
  0x3d   : > { %856 = vmatprep.subr.bf16.mxu0 %v947_v2 }
  0x40   : > { %857 = vmatpush3.bf16.msra.mxu0 %v921_v42 }
  0x41   : > { %858 = vmatprep.subr.bf16.mxu0 %v947_v2 }
  0x44   : > { %859 = vmatpush3.bf16.msra.mxu0 %v922_v43 }
  0xfa   : > { %v800_v44 = vpop.f32.mrb[0].mxu0 }
  0xfb   : > { %v536_v45 = vpop.f32.mrb[0].mxu1  ;;  %v801_v46 = vpop.f32.mrb[1].mxu0 }
  0xfc   : > { %v842_v48 = vpop.f32.mrb[1].mxu1  ;;  %v802_v49 = vadd.f32 %v801_v46, %v800_v44  ;;  %v803_v50 = vpop.f32.mrb[2].mxu0 }
  0xfd   : > { %v539_v51 = vpop.f32.mrb[2].mxu1  ;;  %v804_v52 = vpop.f32.mrb[3].mxu0 }
  0xfe   : > { %v843_v53 = vpop.f32.mrb[3].mxu1  ;;  %v497_v54 = vadd.f32 %v802_v49, %v747_v47 }
 0x100   : > { %v537_v55 = vadd.f32 %v536_v45, %v497_v54 }
 0x102   : > { %v542_v56 = vmax.f32 %v537_v55, 0.0 }
 0x104   : > { %v543_v57 = vpack.c.bf16 %v542_v56, %v542_v56 }
 0x106   : > { %861 = vmatmul.mubr.bf16.vlgmr.msra.gmra.mrb[4].mxu0 %v543_v57 }
 0x1d9   : > { %v649_v63 = vpop.f32.mrb[4].mxu0 }
 0x1da   : > { %v650_v1 = vadd.f32 %v772_v62, %v649_v63  ;;  %v862_v2 = vpop.f32.mrb[5].mxu0 }
 0x1db   : > { %v652_v3 = vpop.f32.mrb[6].mxu0 }
 0x1dc   : > { %v664_v4 = vadd.f32 %v662_v0, %v650_v1  ;;  %v863_v5 = vpop.f32.mrb[7].mxu0 }
 0x1de   : > { %v665_v6 = vpack.c.bf16 %v664_v4, %v664_v4 }
 0x1e0   : > { %666 = vst [vmem:[%s242_s9] sm:$0xf] %v665_v6 }
 0x1e1 PF: > { %s15_s20 = sadd.s32 1, %s945_s20   ;;  %s1157_s18 = smov %s941_s19 }
 0x1e2   : > { %p12_p5 = scmp.ge.s32.totalorder %s15_s20, 4   ;;  %s1158_s19 = smov %s1160_s21 }
 0x1e4   :  { %14 = sbr.rel (!%p12_p5) target bundleno = 2 (0x2), region = 70 }

// kernel: forward.22
= control target key start
LH: loop header
LB: loop body
LE: loop exit
PB: predicated region body
PF: predicated region fallthrough
CT: control target
= control target key end

     0   :  { %s822_s12 = smov 0   ;;  %s824_s13 = smov 0   ;;  %s962_s0 = inlined_call_operand.vmem [shape: bf16[2,5,256], index: 0, kind: input, shape index: {}]   ;;  %s963_s1 = inlined_call_operand.vmem [shape: bf16[512,128], index: 1, kind: input, shape index: {}]   ;;  %s964_s2 = inlined_call_operand.vmem [shape: f32[1,128], index: 2, kind: input, shape index: {}]   ;;  %s965_s3 = inlined_call_operand.vmem [shape: bf16[2,4,128], index: 3, kind: output, shape index: {}]  }
   0x1   :  { %s826_s14 = smov 0  }
   0x2 LB: > { %s25_s15 = sadd.s32 1, %s796_s13  ;;  %p634_p0 = scmp.ge.s32.totalorder %s800_s14, 1  ;;  %s800_s14 = sphi %s826_s14, %s13_s14   ;;  %s796_s13 = sphi %s824_s13, %s967_s13   ;;  %s792_s12 = sphi %s822_s12, %s966_s12  }
   0x3   : > { %p27_p1 = scmp.ge.s32.totalorder %s25_s15, 2  ;;  %p151_p2 = scmp.lt.s32.totalorder %s800_s14, 3 }
   0x5   : > { %s969_s15 = smov (%p27_p1, %s25_s15), 0  ;;  %p152_p3 = pnand %p634_p0, %p151_p2 }
   0x6   : > { %v744_v0 = vld [vmem:[%s963_s1 + $0x40] sm:$0xff] (!%p152_p3)   ;;  %v748_v4 = vld [vmem:[%s963_s1 + $0x48] sm:$0xff] (!%p152_p3)   ;;  %v752_v8 = vld [vmem:[%s963_s1 + $0x50] sm:$0xff] (!%p152_p3)   ;;  %p177_p4 = scmp.lt.s32.totalorder (!%p152_p3), %s792_s12, 1 }
   0x7   : > { %155 = sbr.rel (%p152_p3) target bundleno = 262 (0x106), region = 32  ;;  %v745_v1 = vld [vmem:[%s963_s1 + $0xc0] sm:$0xff] (!%p152_p3)   ;;  %676 = vmatprep.subr.bf16.mxu0 (!%p152_p3), %v744_v0  ;;  %v749_v5 = vld [vmem:[%s963_s1 + $0xc8] sm:$0xff] (!%p152_p3)   ;;  %v753_v9 = vld [vmem:[%s963_s1 + $0xd0] sm:$0xff] (!%p152_p3)  }
   0x8   : > { %v746_v2 = vld [vmem:[%s963_s1] sm:$0xff] (!%p152_p3)   ;;  %698 = vmatprep.subr.bf16.mxu1 (!%p152_p3), %v745_v1  ;;  %v750_v6 = vld [vmem:[%s963_s1 + $0x8] sm:$0xff] (!%p152_p3)   ;;  %v754_v10 = vld [vmem:[%s963_s1 + $0x10] sm:$0xff] (!%p152_p3)  }
   0x9   : > { %v747_v3 = vld [vmem:[%s963_s1 + $0x80] sm:$0xff] (!%p152_p3)   ;;  %677 = vmatpush3.bf16.msra.mxu0 (!%p152_p3), %v746_v2  ;;  %v751_v7 = vld [vmem:[%s963_s1 + $0x88] sm:$0xff] (!%p152_p3)   ;;  %v755_v11 = vld [vmem:[%s963_s1 + $0x90] sm:$0xff] (!%p152_p3)  }
   0xa   : > { %699 = vmatpush3.bf16.msra.mxu1 (!%p152_p3), %v747_v3  ;;  %678 = vmatprep.subr.bf16.mxu0 (!%p152_p3), %v748_v4  ;;  %v756_v12 = vld [vmem:[%s963_s1 + $0x58] sm:$0xff] (!%p152_p3)   ;;  %v760_v16 = vld [vmem:[%s963_s1 + $0x60] sm:$0xff] (!%p152_p3)   ;;  %v764_v20 = vld [vmem:[%s963_s1 + $0x68] sm:$0xff] (!%p152_p3)  }
   0xb   : > { %700 = vmatprep.subr.bf16.mxu1 (!%p152_p3), %v749_v5  ;;  %v757_v13 = vld [vmem:[%s963_s1 + $0xd8] sm:$0xff] (!%p152_p3)   ;;  %v761_v17 = vld [vmem:[%s963_s1 + $0xe0] sm:$0xff] (!%p152_p3)   ;;  %v765_v21 = vld [vmem:[%s963_s1 + $0xe8] sm:$0xff] (!%p152_p3)  }
   0xc   : > { %v758_v14 = vld [vmem:[%s963_s1 + $0x18] sm:$0xff] (!%p152_p3)   ;;  %v762_v18 = vld [vmem:[%s963_s1 + $0x20] sm:$0xff] (!%p152_p3)   ;;  %v766_v22 = vld [vmem:[%s963_s1 + $0x28] sm:$0xff] (!%p152_p3)  }
   0xd   : > { %679 = vmatpush3.bf16.msra.mxu0 (!%p152_p3), %v750_v6  ;;  %v759_v15 = vld [vmem:[%s963_s1 + $0x98] sm:$0xff] (!%p152_p3)   ;;  %v763_v19 = vld [vmem:[%s963_s1 + $0xa0] sm:$0xff] (!%p152_p3)   ;;  %v767_v23 = vld [vmem:[%s963_s1 + $0xa8] sm:$0xff] (!%p152_p3)  }
   0xe   : > { %701 = vmatpush3.bf16.msra.mxu1 %v751_v7  ;;  %680 = vmatprep.subr.bf16.mxu0 %v752_v8  ;;  %s971_s12 = smov (!%p177_p4, %s792_s12), 1  ;;  %v768_v24 = vld [vmem:[%s963_s1 + $0x70] sm:$0xff]   ;;  %v772_v28 = vld [vmem:[%s963_s1 + $0x78] sm:$0xff]   ;;  %v640_v47 = vld [vmem:[%s964_s2] ss:$0 sm:$0xff] }
   0xf   : > { %702 = vmatprep.subr.bf16.mxu1 %v753_v9  ;;  %v769_v25 = vld [vmem:[%s963_s1 + $0xf0] sm:$0xff]   ;;  %s675_s24 = sshll.u32 %s971_s12, 3  ;;  %v773_v29 = vld [vmem:[%s963_s1 + $0xf8] sm:$0xff]   ;;  %s637_s17 = sshll.u32 %s971_s12, 1 }
  0x10   : > { %v770_v26 = vld [vmem:[%s963_s1 + $0x30] sm:$0xff]   ;;  %s181_s6 = scalar_lea.vmem %s962_s0, %s675_s24  ;;  %v774_v30 = vld [vmem:[%s963_s1 + $0x38] sm:$0xff]   ;;  %s188_s20 = scalar_lea.vmem %s965_s3, %s637_s17 }
  0x11   : > { %681 = vmatpush3.bf16.msra.mxu0 %v754_v10  ;;  %v771_v27 = vld [vmem:[%s963_s1 + $0xb0] sm:$0xff]   ;;  %v775_v31 = vld [vmem:[%s963_s1 + $0xb8] sm:$0xff]   ;;  %v190_v32 = vld [vmem:[%s181_s6] sm:$0x77] }
  0x12   : > { %703 = vmatpush3.bf16.msra.mxu1 %v755_v11  ;;  %682 = vmatprep.subr.bf16.mxu0 %v756_v12  ;;  %v639_v33 = vcombine.high %v190_v32, %v190_v32  ;;  %v638_v34 = vcombine.low %v190_v32, %v190_v32 }
  0x13   : > { %704 = vmatprep.subr.bf16.mxu1 %v757_v13 }
  0x14   : > { %509 = vmatprep.mubr.bf16.mxu0 %v639_v33  ;;  %v206_v35 = vshrl.u32 %v639_v33, 16  ;;  %v208_v36 = vshll.u32 %v639_v33, 16  ;;  %v199_v37 = vshrl.u32 %v638_v34, 16  ;;  %v201_v38 = vshll.u32 %v638_v34, 16 }
  0x15   : > { %683 = vmatpush3.bf16.msra.mxu0 %v758_v14 }
  0x16   : > { %705 = vmatpush3.bf16.msra.mxu1 %v759_v15  ;;  %684 = vmatprep.subr.bf16.mxu0 %v760_v16  ;;  %v210_v39 = vrot.slane %v208_v36, 1  ;;  %v203_v40 = vrot.slane %v201_v38, 1 }
  0x17   : > { %706 = vmatprep.subr.bf16.mxu1 %v761_v17 }
  0x18   : > { %v211_v41 = vor.u32 %v210_v39, %v206_v35  ;;  %v204_v42 = vor.u32 %v203_v40, %v199_v37 }
  0x19   : > { %685 = vmatpush3.bf16.msra.mxu0 %v762_v18 }
  0x1a   : > { %707 = vmatpush3.bf16.msra.mxu1 %v763_v19  ;;  %686 = vmatprep.subr.bf16.mxu0 %v764_v20 }
  0x1b   : > { %708 = vmatprep.subr.bf16.mxu1 %v765_v21  ;;  %549 = vmatprep.mubr.bf16.mxu1 %v211_v41 }
  0x1d   : > { %687 = vmatpush3.bf16.msra.mxu0 %v766_v22 }
  0x1e   : > { %709 = vmatpush3.bf16.msra.mxu1 %v767_v23  ;;  %688 = vmatprep.subr.bf16.mxu0 %v768_v24 }
  0x1f   : > { %710 = vmatprep.subr.bf16.mxu1 %v769_v25 }
  0x21   : > { %689 = vmatpush3.bf16.msra.mxu0 %v770_v26 }
  0x22   : > { %711 = vmatpush3.bf16.msra.mxu1 %v771_v27  ;;  %690 = vmatprep.subr.bf16.mxu0 %v772_v28 }
  0x23   : > { %712 = vmatprep.subr.bf16.mxu1 %v773_v29 }
  0x25   : > { %691 = vmatpush3.bf16.msra.mxu0 %v774_v30 }
  0x26   : > { %713 = vmatpush3.bf16.msra.mxu1 %v775_v31 }
  0x28   : > { %510 = vmatmul.mubr.bf16.vlgmr.msra.gmra.mrb[0].mxu0 %v638_v34 }
  0x29   : > { %550 = vmatmul.mubr.bf16.vlgmr.msra.gmra.mrb[0].mxu1 %v204_v42 }
  0xfb   : > { %v692_v43 = vpop.f32.mrb[0].mxu0 }
  0xfc   : > { %v693_v44 = vpop.f32.mrb[1].mxu0  ;;  %v714_v49 = vpop.f32.mrb[0].mxu1 }
  0xfd   : > { %v694_v45 = vadd.f32 %v693_v44, %v692_v43  ;;  %v695_v46 = vpop.f32.mrb[2].mxu0  ;;  %v715_v51 = vpop.f32.mrb[1].mxu1 }
  0xfe   : > { %v696_v48 = vpop.f32.mrb[3].mxu0  ;;  %v716_v52 = vadd.f32 %v715_v51, %v714_v49  ;;  %v717_v53 = vpop.f32.mrb[2].mxu1 }
  0xff   : > { %v512_v50 = vadd.f32 %v694_v45, %v640_v47  ;;  %v718_v54 = vpop.f32.mrb[3].mxu1 }
 0x101   : > { %v552_v55 = vadd.f32 %v716_v52, %v512_v50 }
 0x103   : > { %v557_v56 = vpack.c.bf16 %v552_v55, %v552_v55 }
 0x105   : > { %558 = vst [vmem:[%s188_s20] sm:$0x3] %v557_v56 }
 0x106 PF: > { %s13_s14 = sadd.s32 1, %s800_s14   ;;  %s966_s12 = smov %s796_s13 }
 0x107   : > { %p10_p5 = scmp.ge.s32.totalorder %s13_s14, 4   ;;  %s967_s13 = smov %s969_s15 }
 0x109   :  { %12 = sbr.rel (!%p10_p5) target bundleno = 2 (0x2), region = 62 }

// kernel: forward.23
= control target key start
LH: loop header
LB: loop body
LE: loop exit
PB: predicated region body
PF: predicated region fallthrough
CT: control target
= control target key end

     0   :  { %s978_s18 = smov 0   ;;  %s980_s19 = smov 0   ;;  %s1145_s0 = inlined_call_operand.vmem [shape: bf16[2,10,128], index: 0, kind: input, shape index: {}]   ;;  %s1146_s1 = inlined_call_operand.vmem [shape: bf16[384,128], index: 1, kind: input, shape index: {}]   ;;  %s1147_s2 = inlined_call_operand.vmem [shape: f32[1,128], index: 2, kind: input, shape index: {}]   ;;  %s1148_s3 = inlined_call_operand.vmem [shape: bf16[128,128], index: 3, kind: input, shape index: {}]   ;;  %s1149_s4 = inlined_call_operand.vmem [shape: f32[1,128], index: 4, kind: input, shape index: {}]   ;;  %s1150_s5 = inlined_call_operand.vmem [shape: bf16[2,4,128], index: 5, kind: output, shape index: {}]  }
   0x1   :  { %s982_s20 = smov 0  }
   0x2 LB: > { %s27_s21 = sadd.s32 1, %s939_s19  ;;  %p739_p0 = scmp.ge.s32.totalorder %s943_s20, 1  ;;  %s943_s20 = sphi %s982_s20, %s15_s20   ;;  %s939_s19 = sphi %s980_s19, %s1152_s19   ;;  %s935_s18 = sphi %s978_s18, %s1151_s18  }
   0x3   : > { %p29_p1 = scmp.ge.s32.totalorder %s27_s21, 2  ;;  %p201_p2 = scmp.lt.s32.totalorder %s943_s20, 3 }
   0x5   : > { %s1154_s21 = smov (%p29_p1, %s27_s21), 0  ;;  %p202_p3 = pnand %p739_p0, %p201_p2 }
   0x6   : > { %v889_v0 = vld [vmem:[%s1146_s1 + $0x40] sm:$0xff] (!%p202_p3)   ;;  %v945_v2 = vmov (!%p202_p3), 0.0   ;;  %v892_v4 = vld [vmem:[%s1146_s1 + $0x48] sm:$0xff] (!%p202_p3)   ;;  %v895_v7 = vld [vmem:[%s1146_s1 + $0x50] sm:$0xff] (!%p202_p3)   ;;  %vm946_vm0 = vmmov (!%p202_p3), 0   ;;  %p231_p4 = scmp.lt.s32.totalorder (!%p202_p3), %s935_s18, 1 }
   0x7   : > { %205 = sbr.rel (%p202_p3) target bundleno = 481 (0x1e1), region = 40  ;;  %v890_v1 = vld [vmem:[%s1146_s1] sm:$0xff] (!%p202_p3)   ;;  %822 = vmatprep.subr.bf16.mxu1 (!%p202_p3), %v945_v2  ;;  %782 = vmatprep.subr.bf16.mxu0 (!%p202_p3), %v889_v0  ;;  %v893_v5 = vld [vmem:[%s1146_s1 + $0x8] sm:$0xff] (!%p202_p3)   ;;  %v896_v8 = vld [vmem:[%s1146_s1 + $0x10] sm:$0xff] (!%p202_p3)   ;;  %v947_v24 = vmov (!%p202_p3), 0  }
   0x8   : > { %v891_v3 = vld [vmem:[%s1146_s1 + $0x80] sm:$0xff] (!%p202_p3)   ;;  %783 = vmatpush3.bf16.msra.mxu0 (!%p202_p3), %v890_v1  ;;  %v894_v6 = vld [vmem:[%s1146_s1 + $0x88] sm:$0xff] (!%p202_p3)   ;;  %838 = vmatprep.mubr.msk.bf16.mxu1 (!%p202_p3), %vm946_vm0, %v945_v2  ;;  %v897_v9 = vld [vmem:[%s1146_s1 + $0x90] sm:$0xff] (!%p202_p3)  }
   0x9   : > { %823 = vmatpush3.bf16.msra.mxu1 (!%p202_p3), %v891_v3  ;;  %784 = vmatprep.subr.bf16.mxu0 (!%p202_p3), %v892_v4  ;;  %v898_v10 = vld [vmem:[%s1146_s1 + $0x58] sm:$0xff] (!%p202_p3)   ;;  %v901_v13 = vld [vmem:[%s1146_s1 + $0x60] sm:$0xff] (!%p202_p3)   ;;  %v904_v16 = vld [vmem:[%s1146_s1 + $0x68] sm:$0xff] (!%p202_p3)  }
   0xa   : > { %824 = vmatprep.subr.bf16.mxu1 (!%p202_p3), %v945_v2  ;;  %v899_v11 = vld [vmem:[%s1146_s1 + $0x18] sm:$0xff] (!%p202_p3)   ;;  %v902_v14 = vld [vmem:[%s1146_s1 + $0x20] sm:$0xff] (!%p202_p3)   ;;  %v905_v17 = vld [vmem:[%s1146_s1 + $0x28] sm:$0xff] (!%p202_p3)  }
   0xb   : > { %v900_v12 = vld [vmem:[%s1146_s1 + $0x98] sm:$0xff] (!%p202_p3)   ;;  %v903_v15 = vld [vmem:[%s1146_s1 + $0xa0] sm:$0xff] (!%p202_p3)   ;;  %v906_v18 = vld [vmem:[%s1146_s1 + $0xa8] sm:$0xff] (!%p202_p3)  }
   0xc   : > { %785 = vmatpush3.bf16.msra.mxu0 (!%p202_p3), %v893_v5  ;;  %v907_v19 = vld [vmem:[%s1146_s1 + $0x70] sm:$0xff] (!%p202_p3)   ;;  %v910_v23 = vld [vmem:[%s1146_s1 + $0x78] sm:$0xff] (!%p202_p3)   ;;  %v913_v38 = vld [vmem:[%s1148_s3] sm:$0xff] (!%p202_p3)  }
   0xd   : > { %825 = vmatpush3.bf16.msra.mxu1 (!%p202_p3), %v894_v6  ;;  %786 = vmatprep.subr.bf16.mxu0 (!%p202_p3), %v895_v7  ;;  %v908_v20 = vld [vmem:[%s1146_s1 + $0x30] sm:$0xff] (!%p202_p3)   ;;  %v911_v29 = vld [vmem:[%s1146_s1 + $0x38] sm:$0xff] (!%p202_p3)   ;;  %v914_v39 = vld [vmem:[%s1148_s3 + $0x8] sm:$0xff] (!%p202_p3)  }
   0xe   : > { %826 = vmatprep.subr.bf16.mxu1 %v945_v2  ;;  %s1156_s18 = smov (!%p231_p4, %s935_s18), 1  ;;  %v909_v21 = vld [vmem:[%s1146_s1 + $0xb0] sm:$0xff]   ;;  %v912_v33 = vld [vmem:[%s1146_s1 + $0xb8] sm:$0xff]   ;;  %v917_v42 = vld [vmem:[%s1148_s3 + $0x20] sm:$0xff]  }
   0xf   : > { %s781_s8 = sshll.u32 %s1156_s18, 3  ;;  %v915_v40 = vld [vmem:[%s1148_s3 + $0x10] sm:$0xff]   ;;  %v916_v41 = vld [vmem:[%s1148_s3 + $0x18] sm:$0xff]   ;;  %v918_v43 = vld [vmem:[%s1148_s3 + $0x28] sm:$0xff]   ;;  %s742_s6 = sshll.u32 %s1156_s18, 1 }
  0x10   : > { %787 = vmatpush3.bf16.msra.mxu0 %v896_v8  ;;  %s235_s17 = scalar_lea.vmem %s1145_s0, %s781_s8  ;;  %v919_v44 = vld [vmem:[%s1148_s3 + $0x30] sm:$0xff]   ;;  %v920_v45 = vld [vmem:[%s1148_s3 + $0x38] sm:$0xff]   ;;  %v745_v49 = vld [vmem:[%s1147_s2] ss:$0 sm:$0xff]  ;;  %s242_s9 = scalar_lea.vmem %s1150_s5, %s742_s6 }
  0x11   : > { %827 = vmatpush3.bf16.msra.mxu1 %v897_v9  ;;  %788 = vmatprep.subr.bf16.mxu0 %v898_v10  ;;  %v1077_v22 = vld [vmem:[%s235_s17] sm:$0xf]  ;;  %v245_v26 = vld [vmem:[%s235_s17 + $0x4] sm:$0x1] }
  0x12   : > { %828 = vmatprep.subr.bf16.mxu1 %v945_v2  ;;  %v246_v25 = vmax.bf16 %v947_v24, %v1077_v22  ;;  %v247_v27 = vmax.bf16 %v947_v24, %v245_v26  ;;  %v657_v60 = vunpack.c.l.bf16 %v1077_v22  ;;  %v770_v61 = vld [vmem:[%s1149_s4] ss:$0 sm:$0xff] }
  0x14   : > { %789 = vmatpush3.bf16.msra.mxu0 %v899_v11  ;;  %v743_v28 = vcombine.low %v246_v25, %v246_v25  ;;  %v744_v30 = vcombine.low %v246_v25, %v247_v27  ;;  %v659_v62 = vrot.slane %v657_v60, 3 }
  0x15   : > { %829 = vmatpush3.bf16.msra.mxu1 %v900_v12  ;;  %790 = vmatprep.subr.bf16.mxu0 %v901_v13 }
  0x16   : > { %830 = vmatprep.subr.bf16.mxu1 %v945_v2  ;;  %v252_v31 = vshrl.u32 %v743_v28, 16  ;;  %v255_v32 = vshll.u32 %v743_v28, 16  ;;  %v263_v34 = vrot.slane %v744_v30, 3 }
  0x18   : > { %791 = vmatpush3.bf16.msra.mxu0 %v902_v14  ;;  %v254_v35 = vrot.slane %v252_v31, 1  ;;  %v257_v36 = vrot.slane %v255_v32, 2 }
  0x19   : > { %831 = vmatpush3.bf16.msra.mxu1 %v903_v15  ;;  %792 = vmatprep.subr.bf16.mxu0 %v904_v16 }
  0x1a   : > { %832 = vmatprep.subr.bf16.mxu1 %v945_v2  ;;  %v258_v37 = vor.u32 %v257_v36, %v254_v35 }
  0x1c   : > { %793 = vmatpush3.bf16.msra.mxu0 %v905_v17  ;;  %496 = vmatprep.mubr.bf16.mxu0 %v258_v37 }
  0x1d   : > { %833 = vmatpush3.bf16.msra.mxu1 %v906_v18  ;;  %794 = vmatprep.subr.bf16.mxu0 %v907_v19 }
  0x1e   : > { %834 = vmatprep.subr.bf16.mxu1 %v945_v2 }
  0x20   : > { %795 = vmatpush3.bf16.msra.mxu0 %v908_v20 }
  0x21   : > { %835 = vmatpush3.bf16.msra.mxu1 %v909_v21  ;;  %796 = vmatprep.subr.bf16.mxu0 %v910_v23 }
  0x22   : > { %836 = vmatprep.subr.bf16.mxu1 %v945_v2 }
  0x24   : > { %797 = vmatpush3.bf16.msra.mxu0 %v911_v29 }
  0x25   : > { %837 = vmatpush3.bf16.msra.mxu1 %v912_v33  ;;  %842 = vmatprep.subr.bf16.mxu0 %v945_v2 }
  0x27   : > { %497 = vmatmul.mubr.bf16.vlgmr.msra.gmra.mrb[0].mxu0 %v246_v25 }
  0x28   : > { %839 = vmatmul.mubr.bf16.vlgmr.msra.gmra.mrb[0].mxu1 %v263_v34  ;;  %843 = vmatpush3.bf16.msra.mxu0 %v913_v38 }
  0x29   : > { %858 = vmatprep.mubr.msk.bf16.mxu0 %vm946_vm0, %v945_v2  ;;  %844 = vmatprep.subr.bf16.mxu0 %v945_v2 }
  0x2c   : > { %845 = vmatpush3.bf16.msra.mxu0 %v914_v39 }
  0x2d   : > { %846 = vmatprep.subr.bf16.mxu0 %v945_v2 }
  0x30   : > { %847 = vmatpush3.bf16.msra.mxu0 %v915_v40 }
  0x31   : > { %848 = vmatprep.subr.bf16.mxu0 %v945_v2 }
  0x34   : > { %849 = vmatpush3.bf16.msra.mxu0 %v916_v41 }
  0x35   : > { %850 = vmatprep.subr.bf16.mxu0 %v945_v2 }
  0x38   : > { %851 = vmatpush3.bf16.msra.mxu0 %v917_v42 }
  0x39   : > { %852 = vmatprep.subr.bf16.mxu0 %v945_v2 }
  0x3c   : > { %853 = vmatpush3.bf16.msra.mxu0 %v918_v43 }
  0x3d   : > { %854 = vmatprep.subr.bf16.mxu0 %v945_v2 }
  0x40   : > { %855 = vmatpush3.bf16.msra.mxu0 %v919_v44 }
  0x41   : > { %856 = vmatprep.subr.bf16.mxu0 %v945_v2 }
  0x44   : > { %857 = vmatpush3.bf16.msra.mxu0 %v920_v45 }
  0xfa   : > { %v798_v46 = vpop.f32.mrb[0].mxu0 }
  0xfb   : > { %v538_v47 = vpop.f32.mrb[0].mxu1  ;;  %v799_v48 = vpop.f32.mrb[1].mxu0 }
  0xfc   : > { %v840_v50 = vpop.f32.mrb[1].mxu1  ;;  %v800_v51 = vadd.f32 %v799_v48, %v798_v46  ;;  %v801_v52 = vpop.f32.mrb[2].mxu0 }
  0xfd   : > { %v541_v53 = vpop.f32.mrb[2].mxu1  ;;  %v802_v54 = vpop.f32.mrb[3].mxu0 }
  0xfe   : > { %v841_v55 = vpop.f32.mrb[3].mxu1  ;;  %v499_v56 = vadd.f32 %v800_v51, %v745_v49 }
 0x100   : > { %v539_v57 = vadd.f32 %v538_v47, %v499_v56 }
 0x102   : > { %v544_v58 = vmax.f32 %v539_v57, 0.0 }
 0x104   : > { %v545_v59 = vpack.c.bf16 %v544_v58, %v544_v58 }
 0x106   : > { %859 = vmatmul.mubr.bf16.vlgmr.msra.gmra.mrb[4].mxu0 %v545_v59 }
 0x1d9   : > { %v651_v63 = vpop.f32.mrb[4].mxu0 }
 0x1da   : > { %v652_v0 = vadd.f32 %v770_v61, %v651_v63  ;;  %v860_v1 = vpop.f32.mrb[5].mxu0 }
 0x1db   : > { %v654_v2 = vpop.f32.mrb[6].mxu0 }
 0x1dc   : > { %v661_v3 = vadd.f32 %v659_v62, %v652_v0  ;;  %v861_v4 = vpop.f32.mrb[7].mxu0 }
 0x1de   : > { %v662_v5 = vpack.c.bf16 %v661_v3, %v661_v3 }
 0x1e0   : > { %663 = vst [vmem:[%s242_s9] sm:$0x3] %v662_v5 }
 0x1e1 PF: > { %s15_s20 = sadd.s32 1, %s943_s20   ;;  %s1151_s18 = smov %s939_s19 }
 0x1e2   : > { %p12_p5 = scmp.ge.s32.totalorder %s15_s20, 4   ;;  %s1152_s19 = smov %s1154_s21 }
 0x1e4   :  { %14 = sbr.rel (!%p12_p5) target bundleno = 2 (0x2), region = 70 }

// kernel: forward.25
= control target key start
LH: loop header
LB: loop body
LE: loop exit
PB: predicated region body
PF: predicated region fallthrough
CT: control target
= control target key end

     0   :  { %s735_s12 = smov 0   ;;  %s737_s13 = smov 0   ;;  %s854_s0 = inlined_call_operand.vmem [shape: bf16[2,6,128], index: 0, kind: input, shape index: {}]   ;;  %s855_s1 = inlined_call_operand.vmem [shape: bf16[384,128], index: 1, kind: input, shape index: {}]   ;;  %s856_s2 = inlined_call_operand.vmem [shape: f32[1,128], index: 2, kind: input, shape index: {}]   ;;  %s857_s3 = inlined_call_operand.vmem [shape: f32[2,4,128], index: 3, kind: output, shape index: {}]  }
   0x1   :  { %s739_s14 = smov 0  }
   0x2 LB: > { %s25_s15 = sadd.s32 1, %s707_s13  ;;  %p556_p0 = scmp.ge.s32.totalorder %s711_s14, 1  ;;  %s711_s14 = sphi %s739_s14, %s13_s14   ;;  %s707_s13 = sphi %s737_s13, %s859_s13   ;;  %s703_s12 = sphi %s735_s12, %s858_s12  }
   0x3   : > { %p27_p1 = scmp.ge.s32.totalorder %s25_s15, 2  ;;  %p150_p2 = scmp.lt.s32.totalorder %s711_s14, 3 }
   0x5   : > { %s861_s15 = smov (%p27_p1, %s25_s15), 0  ;;  %p151_p3 = pnand %p556_p0, %p150_p2 }
   0x6   : > { %v664_v0 = vld [vmem:[%s855_s1 + $0x40] sm:$0xff] (!%p151_p3)   ;;  %v713_v2 = vmov (!%p151_p3), 0.0   ;;  %v667_v4 = vld [vmem:[%s855_s1 + $0x48] sm:$0xff] (!%p151_p3)   ;;  %vm714_vm0 = vmmov (!%p151_p3), 0   ;;  %v670_v7 = vld [vmem:[%s855_s1 + $0x50] sm:$0xff] (!%p151_p3)   ;;  %p175_p4 = scmp.lt.s32.totalorder (!%p151_p3), %s703_s12, 1 }
   0x7   : > { %154 = sbr.rel (%p151_p3) target bundleno = 259 (0x103), region = 32  ;;  %v665_v1 = vld [vmem:[%s855_s1] sm:$0xff] (!%p151_p3)   ;;  %618 = vmatprep.subr.bf16.mxu1 (!%p151_p3), %v713_v2  ;;  %587 = vmatprep.subr.bf16.mxu0 (!%p151_p3), %v664_v0  ;;  %v668_v5 = vld [vmem:[%s855_s1 + $0x8] sm:$0xff] (!%p151_p3)   ;;  %v671_v8 = vld [vmem:[%s855_s1 + $0x10] sm:$0xff] (!%p151_p3)  }
   0x8   : > { %v666_v3 = vld [vmem:[%s855_s1 + $0x80] sm:$0xff] (!%p151_p3)   ;;  %588 = vmatpush3.bf16.msra.mxu0 (!%p151_p3), %v665_v1  ;;  %634 = vmatprep.mubr.msk.bf16.mxu1 (!%p151_p3), %vm714_vm0, %v713_v2  ;;  %v669_v6 = vld [vmem:[%s855_s1 + $0x88] sm:$0xff] (!%p151_p3)   ;;  %v672_v9 = vld [vmem:[%s855_s1 + $0x90] sm:$0xff] (!%p151_p3)  }
   0x9   : > { %619 = vmatpush3.bf16.msra.mxu1 (!%p151_p3), %v666_v3  ;;  %589 = vmatprep.subr.bf16.mxu0 (!%p151_p3), %v667_v4  ;;  %v673_v10 = vld [vmem:[%s855_s1 + $0x58] sm:$0xff] (!%p151_p3)   ;;  %v676_v13 = vld [vmem:[%s855_s1 + $0x60] sm:$0xff] (!%p151_p3)   ;;  %v679_v16 = vld [vmem:[%s855_s1 + $0x68] sm:$0xff] (!%p151_p3)  }
   0xa   : > { %620 = vmatprep.subr.bf16.mxu1 (!%p151_p3), %v713_v2  ;;  %v674_v11 = vld [vmem:[%s855_s1 + $0x18] sm:$0xff] (!%p151_p3)   ;;  %v677_v14 = vld [vmem:[%s855_s1 + $0x20] sm:$0xff] (!%p151_p3)   ;;  %v680_v17 = vld [vmem:[%s855_s1 + $0x28] sm:$0xff] (!%p151_p3)  }
   0xb   : > { %v675_v12 = vld [vmem:[%s855_s1 + $0x98] sm:$0xff] (!%p151_p3)   ;;  %v678_v15 = vld [vmem:[%s855_s1 + $0xa0] sm:$0xff] (!%p151_p3)   ;;  %v681_v18 = vld [vmem:[%s855_s1 + $0xa8] sm:$0xff] (!%p151_p3)  }
   0xc   : > { %590 = vmatpush3.bf16.msra.mxu0 (!%p151_p3), %v668_v5  ;;  %v682_v19 = vld [vmem:[%s855_s1 + $0x70] sm:$0xff] (!%p151_p3)   ;;  %v685_v23 = vld [vmem:[%s855_s1 + $0x78] sm:$0xff] (!%p151_p3)   ;;  %v560_v34 = vld [vmem:[%s856_s2] ss:$0 sm:$0xff] (!%p151_p3) }
   0xd   : > { %621 = vmatpush3.bf16.msra.mxu1 (!%p151_p3), %v669_v6  ;;  %591 = vmatprep.subr.bf16.mxu0 (!%p151_p3), %v670_v7  ;;  %v683_v20 = vld [vmem:[%s855_s1 + $0x30] sm:$0xff] (!%p151_p3)   ;;  %v686_v27 = vld [vmem:[%s855_s1 + $0x38] sm:$0xff] (!%p151_p3)  }
   0xe   : > { %622 = vmatprep.subr.bf16.mxu1 %v713_v2  ;;  %s863_s12 = smov (!%p175_p4, %s703_s12), 1  ;;  %v684_v22 = vld [vmem:[%s855_s1 + $0xb0] sm:$0xff]   ;;  %v688_v29 = vld [vmem:[%s855_s1 + $0xb8] sm:$0xff]  }
   0xf   : > { %s557_s25 = sshll.u32 %s863_s12, 2 }
  0x10   : > { %592 = vmatpush3.bf16.msra.mxu0 %v671_v8  ;;  %s178_s7 = scalar_lea.vmem %s854_s0, %s557_s25  ;;  %s185_s27 = scalar_lea.vmem %s857_s3, %s557_s25 }
  0x11   : > { %623 = vmatpush3.bf16.msra.mxu1 %v672_v9  ;;  %593 = vmatprep.subr.bf16.mxu0 %v673_v10  ;;  %v187_v21 = vld [vmem:[%s178_s7] sm:$0x7] }
  0x12   : > { %624 = vmatprep.subr.bf16.mxu1 %v713_v2  ;;  %v559_v24 = vcombine.low %v187_v21, %v187_v21 }
  0x14   : > { %594 = vmatpush3.bf16.msra.mxu0 %v674_v11  ;;  %v192_v25 = vshrl.u32 %v559_v24, 16  ;;  %v194_v26 = vshll.u32 %v559_v24, 16  ;;  %v199_v31 = vrot.slane %v559_v24, 1 }
  0x15   : > { %625 = vmatpush3.bf16.msra.mxu1 %v675_v12  ;;  %595 = vmatprep.subr.bf16.mxu0 %v676_v13 }
  0x16   : > { %626 = vmatprep.subr.bf16.mxu1 %v713_v2  ;;  %v196_v28 = vrot.slane %v194_v26, 1 }
  0x18   : > { %596 = vmatpush3.bf16.msra.mxu0 %v677_v14  ;;  %v197_v30 = vor.u32 %v196_v28, %v192_v25 }
  0x19   : > { %627 = vmatpush3.bf16.msra.mxu1 %v678_v15  ;;  %597 = vmatprep.subr.bf16.mxu0 %v679_v16 }
  0x1a   : > { %628 = vmatprep.subr.bf16.mxu1 %v713_v2  ;;  %432 = vmatprep.mubr.bf16.mxu0 %v197_v30 }
  0x1c   : > { %598 = vmatpush3.bf16.msra.mxu0 %v680_v17 }
  0x1d   : > { %629 = vmatpush3.bf16.msra.mxu1 %v681_v18  ;;  %599 = vmatprep.subr.bf16.mxu0 %v682_v19 }
  0x1e   : > { %630 = vmatprep.subr.bf16.mxu1 %v713_v2 }
  0x20   : > { %600 = vmatpush3.bf16.msra.mxu0 %v683_v20 }
  0x21   : > { %631 = vmatpush3.bf16.msra.mxu1 %v684_v22  ;;  %601 = vmatprep.subr.bf16.mxu0 %v685_v23 }
  0x22   : > { %632 = vmatprep.subr.bf16.mxu1 %v713_v2 }
  0x24   : > { %602 = vmatpush3.bf16.msra.mxu0 %v686_v27 }
  0x25   : > { %633 = vmatpush3.bf16.msra.mxu1 %v688_v29 }
  0x27   : > { %433 = vmatmul.mubr.bf16.vlgmr.msra.gmra.mrb[0].mxu0 %v187_v21 }
  0x28   : > { %635 = vmatmul.mubr.bf16.vlgmr.msra.gmra.mrb[0].mxu1 %v199_v31 }
  0xfa   : > { %v603_v32 = vpop.f32.mrb[0].mxu0 }
  0xfb   : > { %v604_v33 = vpop.f32.mrb[1].mxu0  ;;  %v474_v35 = vpop.f32.mrb[0].mxu1 }
  0xfc   : > { %v605_v36 = vadd.f32 %v604_v33, %v603_v32  ;;  %v606_v37 = vpop.f32.mrb[2].mxu0  ;;  %v636_v38 = vpop.f32.mrb[1].mxu1 }
  0xfd   : > { %v607_v39 = vpop.f32.mrb[3].mxu0  ;;  %v477_v40 = vpop.f32.mrb[2].mxu1 }
  0xfe   : > { %v435_v41 = vadd.f32 %v605_v36, %v560_v34  ;;  %v637_v42 = vpop.f32.mrb[3].mxu1 }
 0x100   : > { %v475_v43 = vadd.f32 %v474_v35, %v435_v41 }
 0x102   : > { %480 = vst [vmem:[%s185_s27] sm:$0xf] %v475_v43 }
 0x103 PF: > { %s13_s14 = sadd.s32 1, %s711_s14   ;;  %s858_s12 = smov %s707_s13 }
 0x104   : > { %p10_p5 = scmp.ge.s32.totalorder %s13_s14, 4   ;;  %s859_s13 = smov %s861_s15 }
 0x106   :  { %12 = sbr.rel (!%p10_p5) target bundleno = 2 (0x2), region = 62 }

// kernel: forward.24
= control target key start
LH: loop header
LB: loop body
LE: loop exit
PB: predicated region body
PF: predicated region fallthrough
CT: control target
= control target key end

     0   :  { %s966_s18 = smov 0   ;;  %s968_s19 = smov 0   ;;  %s1133_s0 = inlined_call_operand.vmem [shape: bf16[2,6,128], index: 0, kind: input, shape index: {}]   ;;  %s1134_s1 = inlined_call_operand.vmem [shape: bf16[384,128], index: 1, kind: input, shape index: {}]   ;;  %s1135_s2 = inlined_call_operand.vmem [shape: f32[1,128], index: 2, kind: input, shape index: {}]   ;;  %s1136_s3 = inlined_call_operand.vmem [shape: bf16[128,128], index: 3, kind: input, shape index: {}]   ;;  %s1137_s4 = inlined_call_operand.vmem [shape: f32[1,128], index: 4, kind: input, shape index: {}]   ;;  %s1138_s5 = inlined_call_operand.vmem [shape: bf16[2,4,128], index: 5, kind: output, shape index: {}]  }
   0x1   :  { %s970_s20 = smov 0  }
   0x2 LB: > { %s27_s21 = sadd.s32 1, %s927_s19  ;;  %p730_p0 = scmp.ge.s32.totalorder %s931_s20, 1  ;;  %s931_s20 = sphi %s970_s20, %s15_s20   ;;  %s927_s19 = sphi %s968_s19, %s1140_s19   ;;  %s923_s18 = sphi %s966_s18, %s1139_s18  }
   0x3   : > { %p29_p1 = scmp.ge.s32.totalorder %s27_s21, 2  ;;  %p200_p2 = scmp.lt.s32.totalorder %s931_s20, 3 }
   0x5   : > { %s1142_s21 = smov (%p29_p1, %s27_s21), 0  ;;  %p201_p3 = pnand %p730_p0, %p200_p2 }
   0x6   : > { %v877_v0 = vld [vmem:[%s1134_s1 + $0x40] sm:$0xff] (!%p201_p3)   ;;  %v933_v2 = vmov (!%p201_p3), 0.0   ;;  %v880_v4 = vld [vmem:[%s1134_s1 + $0x48] sm:$0xff] (!%p201_p3)   ;;  %v883_v7 = vld [vmem:[%s1134_s1 + $0x50] sm:$0xff] (!%p201_p3)   ;;  %vm934_vm0 = vmmov (!%p201_p3), 0   ;;  %p229_p4 = scmp.lt.s32.totalorder (!%p201_p3), %s923_s18, 1 }
   0x7   : > { %204 = sbr.rel (%p201_p3) target bundleno = 481 (0x1e1), region = 40  ;;  %v878_v1 = vld [vmem:[%s1134_s1] sm:$0xff] (!%p201_p3)   ;;  %810 = vmatprep.subr.bf16.mxu1 (!%p201_p3), %v933_v2  ;;  %770 = vmatprep.subr.bf16.mxu0 (!%p201_p3), %v877_v0  ;;  %v881_v5 = vld [vmem:[%s1134_s1 + $0x8] sm:$0xff] (!%p201_p3)   ;;  %v884_v8 = vld [vmem:[%s1134_s1 + $0x10] sm:$0xff] (!%p201_p3)   ;;  %v935_v24 = vmov (!%p201_p3), 0  }
   0x8   : > { %v879_v3 = vld [vmem:[%s1134_s1 + $0x80] sm:$0xff] (!%p201_p3)   ;;  %771 = vmatpush3.bf16.msra.mxu0 (!%p201_p3), %v878_v1  ;;  %v882_v6 = vld [vmem:[%s1134_s1 + $0x88] sm:$0xff] (!%p201_p3)   ;;  %826 = vmatprep.mubr.msk.bf16.mxu1 (!%p201_p3), %vm934_vm0, %v933_v2  ;;  %v885_v9 = vld [vmem:[%s1134_s1 + $0x90] sm:$0xff] (!%p201_p3)  }
   0x9   : > { %811 = vmatpush3.bf16.msra.mxu1 (!%p201_p3), %v879_v3  ;;  %772 = vmatprep.subr.bf16.mxu0 (!%p201_p3), %v880_v4  ;;  %v886_v10 = vld [vmem:[%s1134_s1 + $0x58] sm:$0xff] (!%p201_p3)   ;;  %v889_v13 = vld [vmem:[%s1134_s1 + $0x60] sm:$0xff] (!%p201_p3)   ;;  %v892_v16 = vld [vmem:[%s1134_s1 + $0x68] sm:$0xff] (!%p201_p3)  }
   0xa   : > { %812 = vmatprep.subr.bf16.mxu1 (!%p201_p3), %v933_v2  ;;  %v887_v11 = vld [vmem:[%s1134_s1 + $0x18] sm:$0xff] (!%p201_p3)   ;;  %v890_v14 = vld [vmem:[%s1134_s1 + $0x20] sm:$0xff] (!%p201_p3)   ;;  %v893_v17 = vld [vmem:[%s1134_s1 + $0x28] sm:$0xff] (!%p201_p3)  }
   0xb   : > { %v888_v12 = vld [vmem:[%s1134_s1 + $0x98] sm:$0xff] (!%p201_p3)   ;;  %v891_v15 = vld [vmem:[%s1134_s1 + $0xa0] sm:$0xff] (!%p201_p3)   ;;  %v894_v18 = vld [vmem:[%s1134_s1 + $0xa8] sm:$0xff] (!%p201_p3)  }
   0xc   : > { %773 = vmatpush3.bf16.msra.mxu0 (!%p201_p3), %v881_v5  ;;  %v895_v19 = vld [vmem:[%s1134_s1 + $0x70] sm:$0xff] (!%p201_p3)   ;;  %v898_v23 = vld [vmem:[%s1134_s1 + $0x78] sm:$0xff] (!%p201_p3)   ;;  %v901_v34 = vld [vmem:[%s1136_s3] sm:$0xff] (!%p201_p3)  }
   0xd   : > { %813 = vmatpush3.bf16.msra.mxu1 (!%p201_p3), %v882_v6  ;;  %774 = vmatprep.subr.bf16.mxu0 (!%p201_p3), %v883_v7  ;;  %v896_v20 = vld [vmem:[%s1134_s1 + $0x30] sm:$0xff] (!%p201_p3)   ;;  %v899_v27 = vld [vmem:[%s1134_s1 + $0x38] sm:$0xff] (!%p201_p3)   ;;  %v902_v35 = vld [vmem:[%s1136_s3 + $0x8] sm:$0xff] (!%p201_p3)  }
   0xe   : > { %814 = vmatprep.subr.bf16.mxu1 %v933_v2  ;;  %s1144_s18 = smov (!%p229_p4, %s923_s18), 1  ;;  %v897_v21 = vld [vmem:[%s1134_s1 + $0xb0] sm:$0xff]   ;;  %v900_v30 = vld [vmem:[%s1134_s1 + $0xb8] sm:$0xff]   ;;  %v905_v38 = vld [vmem:[%s1136_s3 + $0x20] sm:$0xff]  }
   0xf   : > { %s731_s8 = sshll.u32 %s1144_s18, 2  ;;  %v903_v36 = vld [vmem:[%s1136_s3 + $0x10] sm:$0xff]   ;;  %v904_v37 = vld [vmem:[%s1136_s3 + $0x18] sm:$0xff]   ;;  %v906_v39 = vld [vmem:[%s1136_s3 + $0x28] sm:$0xff]   ;;  %s732_s6 = sshll.u32 %s1144_s18, 1 }
  0x10   : > { %775 = vmatpush3.bf16.msra.mxu0 %v884_v8  ;;  %s232_s17 = scalar_lea.vmem %s1133_s0, %s731_s8  ;;  %v907_v40 = vld [vmem:[%s1136_s3 + $0x30] sm:$0xff]   ;;  %v908_v41 = vld [vmem:[%s1136_s3 + $0x38] sm:$0xff]   ;;  %v734_v45 = vld [vmem:[%s1135_s2] ss:$0 sm:$0xff]  ;;  %s239_s9 = scalar_lea.vmem %s1138_s5, %s732_s6 }
  0x11   : > { %815 = vmatpush3.bf16.msra.mxu1 %v885_v9  ;;  %776 = vmatprep.subr.bf16.mxu0 %v886_v10  ;;  %v1065_v22 = vld [vmem:[%s232_s17] sm:$0x7] }
  0x12   : > { %816 = vmatprep.subr.bf16.mxu1 %v933_v2  ;;  %v242_v25 = vmax.bf16 %v935_v24, %v1065_v22  ;;  %v648_v56 = vunpack.c.l.bf16 %v1065_v22  ;;  %v759_v57 = vld [vmem:[%s1137_s4] ss:$0 sm:$0xff] }
  0x14   : > { %777 = vmatpush3.bf16.msra.mxu0 %v887_v11  ;;  %v733_v26 = vcombine.low %v242_v25, %v242_v25  ;;  %v650_v58 = vrot.slane %v648_v56, 1 }
  0x15   : > { %817 = vmatpush3.bf16.msra.mxu1 %v888_v12  ;;  %778 = vmatprep.subr.bf16.mxu0 %v889_v13 }
  0x16   : > { %818 = vmatprep.subr.bf16.mxu1 %v933_v2  ;;  %v247_v28 = vshrl.u32 %v733_v26, 16  ;;  %v249_v29 = vshll.u32 %v733_v26, 16  ;;  %v254_v32 = vrot.slane %v733_v26, 1 }
  0x18   : > { %779 = vmatpush3.bf16.msra.mxu0 %v890_v14  ;;  %v251_v31 = vrot.slane %v249_v29, 1 }
  0x19   : > { %819 = vmatpush3.bf16.msra.mxu1 %v891_v15  ;;  %780 = vmatprep.subr.bf16.mxu0 %v892_v16 }
  0x1a   : > { %820 = vmatprep.subr.bf16.mxu1 %v933_v2  ;;  %v252_v33 = vor.u32 %v251_v31, %v247_v28 }
  0x1c   : > { %781 = vmatpush3.bf16.msra.mxu0 %v893_v17  ;;  %487 = vmatprep.mubr.bf16.mxu0 %v252_v33 }
  0x1d   : > { %821 = vmatpush3.bf16.msra.mxu1 %v894_v18  ;;  %782 = vmatprep.subr.bf16.mxu0 %v895_v19 }
  0x1e   : > { %822 = vmatprep.subr.bf16.mxu1 %v933_v2 }
  0x20   : > { %783 = vmatpush3.bf16.msra.mxu0 %v896_v20 }
  0x21   : > { %823 = vmatpush3.bf16.msra.mxu1 %v897_v21  ;;  %784 = vmatprep.subr.bf16.mxu0 %v898_v23 }
  0x22   : > { %824 = vmatprep.subr.bf16.mxu1 %v933_v2 }
  0x24   : > { %785 = vmatpush3.bf16.msra.mxu0 %v899_v27 }
  0x25   : > { %825 = vmatpush3.bf16.msra.mxu1 %v900_v30  ;;  %830 = vmatprep.subr.bf16.mxu0 %v933_v2 }
  0x27   : > { %488 = vmatmul.mubr.bf16.vlgmr.msra.gmra.mrb[0].mxu0 %v242_v25 }
  0x28   : > { %827 = vmatmul.mubr.bf16.vlgmr.msra.gmra.mrb[0].mxu1 %v254_v32  ;;  %831 = vmatpush3.bf16.msra.mxu0 %v901_v34 }
  0x29   : > { %846 = vmatprep.mubr.msk.bf16.mxu0 %vm934_vm0, %v933_v2  ;;  %832 = vmatprep.subr.bf16.mxu0 %v933_v2 }
  0x2c   : > { %833 = vmatpush3.bf16.msra.mxu0 %v902_v35 }
  0x2d   : > { %834 = vmatprep.subr.bf16.mxu0 %v933_v2 }
  0x30   : > { %835 = vmatpush3.bf16.msra.mxu0 %v903_v36 }
  0x31   : > { %836 = vmatprep.subr.bf16.mxu0 %v933_v2 }
  0x34   : > { %837 = vmatpush3.bf16.msra.mxu0 %v904_v37 }
  0x35   : > { %838 = vmatprep.subr.bf16.mxu0 %v933_v2 }
  0x38   : > { %839 = vmatpush3.bf16.msra.mxu0 %v905_v38 }
  0x39   : > { %840 = vmatprep.subr.bf16.mxu0 %v933_v2 }
  0x3c   : > { %841 = vmatpush3.bf16.msra.mxu0 %v906_v39 }
  0x3d   : > { %842 = vmatprep.subr.bf16.mxu0 %v933_v2 }
  0x40   : > { %843 = vmatpush3.bf16.msra.mxu0 %v907_v40 }
  0x41   : > { %844 = vmatprep.subr.bf16.mxu0 %v933_v2 }
  0x44   : > { %845 = vmatpush3.bf16.msra.mxu0 %v908_v41 }
  0xfa   : > { %v786_v42 = vpop.f32.mrb[0].mxu0 }
  0xfb   : > { %v529_v43 = vpop.f32.mrb[0].mxu1  ;;  %v787_v44 = vpop.f32.mrb[1].mxu0 }
  0xfc   : > { %v828_v46 = vpop.f32.mrb[1].mxu1  ;;  %v788_v47 = vadd.f32 %v787_v44, %v786_v42  ;;  %v789_v48 = vpop.f32.mrb[2].mxu0 }
  0xfd   : > { %v532_v49 = vpop.f32.mrb[2].mxu1  ;;  %v790_v50 = vpop.f32.mrb[3].mxu0 }
  0xfe   : > { %v829_v51 = vpop.f32.mrb[3].mxu1  ;;  %v490_v52 = vadd.f32 %v788_v47, %v734_v45 }
 0x100   : > { %v530_v53 = vadd.f32 %v529_v43, %v490_v52 }
 0x102   : > { %v535_v54 = vmax.f32 %v530_v53, 0.0 }
 0x104   : > { %v536_v55 = vpack.c.bf16 %v535_v54, %v535_v54 }
 0x106   : > { %847 = vmatmul.mubr.bf16.vlgmr.msra.gmra.mrb[4].mxu0 %v536_v55 }
 0x1d9   : > { %v642_v59 = vpop.f32.mrb[4].mxu0 }
 0x1da   : > { %v643_v60 = vadd.f32 %v759_v57, %v642_v59  ;;  %v848_v61 = vpop.f32.mrb[5].mxu0 }
 0x1db   : > { %v645_v62 = vpop.f32.mrb[6].mxu0 }
 0x1dc   : > { %v652_v63 = vadd.f32 %v650_v58, %v643_v60  ;;  %v849_v0 = vpop.f32.mrb[7].mxu0 }
 0x1de   : > { %v653_v1 = vpack.c.bf16 %v652_v63, %v652_v63 }
 0x1e0   : > { %654 = vst [vmem:[%s239_s9] sm:$0x3] %v653_v1 }
 0x1e1 PF: > { %s15_s20 = sadd.s32 1, %s931_s20   ;;  %s1139_s18 = smov %s927_s19 }
 0x1e2   : > { %p12_p5 = scmp.ge.s32.totalorder %s15_s20, 4   ;;  %s1140_s19 = smov %s1142_s21 }
 0x1e4   :  { %14 = sbr.rel (!%p12_p5) target bundleno = 2 (0x2), region = 70 }

// kernel: forward.26
= control target key start
LH: loop header
LB: loop body
LE: loop exit
PB: predicated region body
PF: predicated region fallthrough
CT: control target
= control target key end

     0   :  { %s1560_s1 = inlined_call_operand.vmem [shape: bf16[128,128], index: 1, kind: input, shape index: {}]   ;;  %s1561_s0 = inlined_call_operand.vmem [shape: f32[128,128], index: 0, kind: input, shape index: {}]   ;;  %s1562_s2 = inlined_call_operand.vmem [shape: f32[1,128], index: 2, kind: input, shape index: {}]   ;;  %s1563_s3 = inlined_call_operand.vmem [shape: s32[1,128], index: 3, kind: output, shape index: {0}]   ;;  %s1564_s4 = inlined_call_operand.vmem [shape: f32[1,1,128], index: 4, kind: output, shape index: {1}]  }
   0x1   :  { %v972_v0 = vld [vmem:[%s1560_s1] sm:$0xff]   ;;  %v973_v1 = vld [vmem:[%s1560_s1 + $0x8] sm:$0xff]   ;;  %v974_v2 = vld [vmem:[%s1560_s1 + $0x10] sm:$0xff]  }
   0x2   :  { %923 = vmatprep.subr.bf16.mxu0 %v972_v0  ;;  %955 = vmatprep.subr.bf16.mxu1 %v972_v0  ;;  %v975_v3 = vld [vmem:[%s1560_s1 + $0x18] sm:$0xff]   ;;  %v34_v4 = vld [vmem:[%s1561_s0] sm:$0xff]  ;;  %v35_v5 = vld [vmem:[%s1561_s0 + $0x8] sm:$0xff] }
   0x3   :  { %924 = vmatpush3.bf16.msra.mxu0 %v972_v0  ;;  %963 = vmatpush3.bf16.msra.mxu1 %v972_v0  ;;  %v50_v6 = vpack.c.bf16 %v35_v5, %v34_v4  ;;  %v1027_v7 = vld [vmem:[%s1561_s0 + $0x10] sm:$0xff]  ;;  %v204_v8 = vmul.f32 %v35_v5, %v35_v5  ;;  %v42_v9 = vld [vmem:[%s1561_s0 + $0x40] sm:$0xff]  ;;  %v43_v11 = vld [vmem:[%s1561_s0 + $0x48] sm:$0xff]  ;;  %v203_v15 = vmul.f32 %v34_v4, %v34_v4 }
   0x4   :  { %925 = vmatprep.subr.bf16.mxu0 %v973_v1  ;;  %956 = vmatprep.subr.bf16.mxu1 %v973_v1  ;;  %v205_v10 = vmul.f32 %v1027_v7, %v1027_v7  ;;  %v976_v12 = vld [vmem:[%s1560_s1 + $0x20] sm:$0xff]   ;;  %v54_v13 = vpack.c.bf16 %v43_v11, %v42_v9  ;;  %v37_v14 = vld [vmem:[%s1561_s0 + $0x18] sm:$0xff]  ;;  %v977_v17 = vld [vmem:[%s1560_s1 + $0x28] sm:$0xff]   ;;  %v211_v28 = vmul.f32 %v42_v9, %v42_v9 }
   0x5   :  { %939 = vmatprep.mubr.bf16.mxu0 %v50_v6  ;;  %221 = vadd.xlane.f32.xlu0 %v204_v8  ;;  %v206_v16 = vmul.f32 %v37_v14, %v37_v14  ;;  %v38_v18 = vld [vmem:[%s1561_s0 + $0x20] sm:$0xff]  ;;  %v39_v19 = vld [vmem:[%s1561_s0 + $0x28] sm:$0xff]  ;;  %v978_v22 = vld [vmem:[%s1560_s1 + $0x30] sm:$0xff]   ;;  %v212_v29 = vmul.f32 %v43_v11, %v43_v11  ;;  %v51_v35 = vpack.c.bf16 %v37_v14, %v1027_v7 }
   0x6   :  { %947 = vmatprep.mubr.bf16.mxu1 %v54_v13  ;;  %223 = vadd.xlane.f32.xlu1 %v205_v10  ;;  %v207_v20 = vmul.f32 %v38_v18, %v38_v18  ;;  %v208_v21 = vmul.f32 %v39_v19, %v39_v19  ;;  %v40_v23 = vld [vmem:[%s1561_s0 + $0x30] sm:$0xff]  ;;  %v41_v24 = vld [vmem:[%s1561_s0 + $0x38] sm:$0xff]  ;;  %v46_v32 = vld [vmem:[%s1561_s0 + $0x60] sm:$0xff]  ;;  %v52_v37 = vpack.c.bf16 %v39_v19, %v38_v18 }
   0x7   :  { %926 = vmatpush3.bf16.msra.mxu0 %v973_v1  ;;  %964 = vmatpush3.bf16.msra.mxu1 %v973_v1  ;;  %v209_v25 = vmul.f32 %v40_v23, %v40_v23  ;;  %v210_v26 = vmul.f32 %v41_v24, %v41_v24  ;;  %v979_v27 = vld [vmem:[%s1560_s1 + $0x38] sm:$0xff]   ;;  %v44_v30 = vld [vmem:[%s1561_s0 + $0x50] sm:$0xff]  ;;  %v47_v33 = vld [vmem:[%s1561_s0 + $0x68] sm:$0xff]  ;;  %v215_v40 = vmul.f32 %v46_v32, %v46_v32 }
   0x8   :  { %927 = vmatprep.subr.bf16.mxu0 %v974_v2  ;;  %957 = vmatprep.subr.bf16.mxu1 %v974_v2  ;;  %v45_v31 = vld [vmem:[%s1561_s0 + $0x58] sm:$0xff]  ;;  %v213_v34 = vmul.f32 %v44_v30, %v44_v30  ;;  %v56_v38 = vpack.c.bf16 %v47_v33, %v46_v32  ;;  %v48_v41 = vld [vmem:[%s1561_s0 + $0x70] sm:$0xff]  ;;  %v216_v43 = vmul.f32 %v47_v33, %v47_v33 }
   0x9   :  { %219 = vadd.xlane.f32.xlu0 %v203_v15  ;;  %v55_v36 = vpack.c.bf16 %v45_v31, %v44_v30  ;;  %v214_v39 = vmul.f32 %v45_v31, %v45_v31  ;;  %v49_v42 = vld [vmem:[%s1561_s0 + $0x78] sm:$0xff]  ;;  %v217_v44 = vmul.f32 %v48_v41, %v48_v41  ;;  %v53_v45 = vpack.c.bf16 %v41_v24, %v40_v23 }
   0xa   :  { %225 = vadd.xlane.f32.xlu1 %v206_v16  ;;  %v57_v46 = vpack.c.bf16 %v49_v42, %v48_v41  ;;  %v218_v47 = vmul.f32 %v49_v42, %v49_v42 }
   0xb   :  { %928 = vmatpush3.bf16.msra.mxu0 %v974_v2  ;;  %965 = vmatpush3.bf16.msra.mxu1 %v974_v2  ;;  %v1086_v2 = vld [vmem:[%s1562_s2] ss:$0 sm:$0xff] }
   0xc   :  { %929 = vmatprep.subr.bf16.mxu0 %v975_v3  ;;  %958 = vmatprep.subr.bf16.mxu1 %v975_v3 }
   0xd   :  { %227 = vadd.xlane.f32.xlu0 %v207_v20 }
   0xe   :  { %229 = vadd.xlane.f32.xlu1 %v208_v21 }
   0xf   :  { %930 = vmatpush3.bf16.msra.mxu0 %v975_v3  ;;  %966 = vmatpush3.bf16.msra.mxu1 %v975_v3 }
  0x10   :  { %931 = vmatprep.subr.bf16.mxu0 %v976_v12  ;;  %959 = vmatprep.subr.bf16.mxu1 %v976_v12 }
  0x11   :  { %231 = vadd.xlane.f32.xlu0 %v209_v25 }
  0x12   :  { %233 = vadd.xlane.f32.xlu1 %v210_v26 }
  0x13   :  { %932 = vmatpush3.bf16.msra.mxu0 %v976_v12  ;;  %967 = vmatpush3.bf16.msra.mxu1 %v976_v12 }
  0x14   :  { %933 = vmatprep.subr.bf16.mxu0 %v977_v17  ;;  %960 = vmatprep.subr.bf16.mxu1 %v977_v17 }
  0x15   :  { %235 = vadd.xlane.f32.xlu0 %v211_v28 }
  0x16   :  { %237 = vadd.xlane.f32.xlu1 %v212_v29 }
  0x17   :  { %934 = vmatpush3.bf16.msra.mxu0 %v977_v17  ;;  %968 = vmatpush3.bf16.msra.mxu1 %v977_v17 }
  0x18   :  { %935 = vmatprep.subr.bf16.mxu0 %v978_v22  ;;  %961 = vmatprep.subr.bf16.mxu1 %v978_v22 }
  0x19   :  { %239 = vadd.xlane.f32.xlu0 %v213_v34 }
  0x1a   :  { %241 = vadd.xlane.f32.xlu1 %v214_v39 }
  0x1b   :  { %936 = vmatpush3.bf16.msra.mxu0 %v978_v22  ;;  %969 = vmatpush3.bf16.msra.mxu1 %v978_v22 }
  0x1c   :  { %937 = vmatprep.subr.bf16.mxu0 %v979_v27  ;;  %962 = vmatprep.subr.bf16.mxu1 %v979_v27 }
  0x1d   :  { %243 = vadd.xlane.f32.xlu0 %v215_v40 }
  0x1e   :  { %245 = vadd.xlane.f32.xlu1 %v216_v43 }
  0x1f   :  { %938 = vmatpush3.bf16.msra.mxu0 %v979_v27  ;;  %970 = vmatpush3.bf16.msra.mxu1 %v979_v27 }
  0x21   :  { %247 = vadd.xlane.f32.xlu0 %v217_v44 }
  0x22   :  { %940 = vmatmul.mubr.bf16.vlgmr.msra.gmra.mrb[0].mxu0 %v51_v35  ;;  %948 = vmatmul.mubr.bf16.vlgmr.msra.gmra.mrb[0].mxu1 %v55_v36 }
  0x23   :  { %943 = vmatprep.mubr.bf16.mxu0 %v52_v37  ;;  %951 = vmatprep.mubr.bf16.mxu1 %v56_v38 }
  0x24   :  { %249 = vadd.xlane.f32.xlu1 %v218_v47 }
  0x2a   :  { %944 = vmatmul.mubr.bf16.gmra.mrb[4].mxu0 %v53_v45  ;;  %952 = vmatmul.mubr.bf16.gmra.mrb[4].mxu1 %v57_v46 }
  0x92   :  { %v222_v48 = vpop.xlane.xlu0 %221 }
  0x93   :  { %v224_v49 = vpop.xlane.xlu1 %223 }
  0x96   :  { %v220_v50 = vpop.xlane.xlu0 %219 }
  0x97   :  { %v226_v51 = vpop.xlane.xlu1 %225 }
  0x9a   :  { %v228_v53 = vpop.xlane.xlu0 %227 }
  0x9b   :  { %v230_v52 = vpop.xlane.xlu1 %229 }
  0x9e   :  { %v232_v55 = vpop.xlane.xlu0 %231 }
  0x9f   :  { %v234_v54 = vpop.xlane.xlu1 %233 }
  0xa2   :  { %v236_v11 = vpop.xlane.xlu0 %235 }
  0xa3   :  { %v238_v10 = vpop.xlane.xlu1 %237 }
  0xa6   :  { %v240_v36 = vpop.xlane.xlu0 %239 }
  0xa7   :  { %v242_v35 = vpop.xlane.xlu1 %241 }
  0xab   :  { %v246_v47 = vpop.xlane.xlu1 %245 }
  0xf5   :  { %v941_v56 = vpop.f32.mrb[0].mxu0  ;;  %v949_v57 = vpop.f32.mrb[0].mxu1 }
  0xf6   :  { %v140_v58 = vpop.f32.mrb[1].mxu0  ;;  %v172_v59 = vpop.f32.mrb[1].mxu1  ;;  %v253_v63 = vmul.f32 2.0, %v941_v56  ;;  %v261_v39 = vmul.f32 2.0, %v949_v57 }
  0xf7   :  { %v251_v60 = vmul.f32 2.0, %v140_v58  ;;  %v942_v61 = vpop.f32.mrb[2].mxu0  ;;  %v950_v62 = vpop.f32.mrb[2].mxu1  ;;  %v259_v29 = vmul.f32 2.0, %v172_v59 }
  0xf8   :  { %v254_v0 = vmul.f32 2.0, %v942_v61  ;;  %v143_v1 = vpop.f32.mrb[3].mxu0  ;;  %v175_v3 = vpop.f32.mrb[3].mxu1  ;;  %v269_v9 = vsub.f32 %v224_v49, %v253_v63  ;;  %v262_v40 = vmul.f32 2.0, %v950_v62 }
  0xf9   :  { %v267_v4 = vsub.f32 %v220_v50, %v251_v60  ;;  %v252_v5 = vmul.f32 2.0, %v143_v1  ;;  %v260_v30 = vmul.f32 2.0, %v175_v3  ;;  %v275_v37 = vsub.f32 %v236_v11, %v259_v29  ;;  %v250_v57 = vpop.xlane.xlu1 %249 }
  0xfa   :  { %v270_v7 = vsub.f32 %v226_v51, %v254_v0  ;;  %v1100_v22 = vadd.f32 %v1086_v2, %v269_v9  ;;  %v278_v49 = vsub.f32 %v242_v35, %v262_v40  ;;  %v277_v50 = vsub.f32 %v240_v36, %v261_v39 }
  0xfb   :  { %v268_v6 = vsub.f32 %v222_v48, %v252_v5  ;;  %v1089_v8 = vadd.f32 %v1086_v2, %v267_v4  ;;  %v276_v38 = vsub.f32 %v238_v10, %v260_v30  ;;  %v1121_v45 = vadd.f32 %v1086_v2, %v275_v37  ;;  %v244_v48 = vpop.xlane.xlu0 %243 }
  0xfc   :  { %v1097_v19 = vadd.f32 %v1086_v2, %v270_v7  ;;  %v1132_v56 = vadd.f32 %v1086_v2, %v278_v49  ;;  %v337_v1 = vlaneseq }
  0xfd   :  { %305 = vmin.xlane.f32.xlu1 %v1089_v8  ;;  %v945_v12 = vpop.f32.mrb[4].mxu0  ;;  %v1093_v13 = vadd.f32 %v1086_v2, %v268_v6  ;;  %v953_v14 = vpop.f32.mrb[4].mxu1  ;;  %v1124_v46 = vadd.f32 %v1086_v2, %v276_v38 }
  0xfe   :  { %v156_v15 = vpop.f32.mrb[5].mxu0  ;;  %v188_v16 = vpop.f32.mrb[5].mxu1  ;;  %v257_v24 = vmul.f32 2.0, %v945_v12  ;;  %v1153_v3 = vand.u32 127, %v337_v1 }
  0xff   :  { %v255_v17 = vmul.f32 2.0, %v156_v15  ;;  %307 = vmin.xlane.f32.xlu0 %v1093_v13  ;;  %v946_v18 = vpop.f32.mrb[6].mxu0  ;;  %v954_v20 = vpop.f32.mrb[6].mxu1  ;;  %v263_v43 = vmul.f32 2.0, %v188_v16 }
 0x100   :  { %v159_v21 = vpop.f32.mrb[7].mxu0  ;;  %v191_v23 = vpop.f32.mrb[7].mxu1  ;;  %v258_v26 = vmul.f32 2.0, %v946_v18  ;;  %v273_v33 = vsub.f32 %v232_v55, %v257_v24  ;;  %v1129_v55 = vadd.f32 %v1086_v2, %v277_v50 }
 0x101   :  { %v271_v25 = vsub.f32 %v228_v53, %v255_v17  ;;  %v256_v27 = vmul.f32 2.0, %v159_v21  ;;  %311 = vmin.xlane.f32.xlu1 %v1097_v19  ;;  %v264_v44 = vmul.f32 2.0, %v191_v23  ;;  %v279_v51 = vsub.f32 %v244_v48, %v263_v43  ;;  %v248_v58 = vpop.xlane.xlu0 %247 }
 0x102   :  { %v274_v32 = vsub.f32 %v234_v54, %v258_v26  ;;  %v1113_v41 = vadd.f32 %v1086_v2, %v273_v33  ;;  %v265_v53 = vmul.f32 2.0, %v953_v14  ;;  %v266_v54 = vmul.f32 2.0, %v954_v20 }
 0x103   :  { %v272_v28 = vsub.f32 %v230_v52, %v256_v27  ;;  %309 = vmin.xlane.f32.xlu0 %v1100_v22  ;;  %v1105_v31 = vadd.f32 %v1086_v2, %v271_v25  ;;  %v280_v52 = vsub.f32 %v246_v47, %v264_v44  ;;  %v1137_v59 = vadd.f32 %v1086_v2, %v279_v51 }
 0x104   :  { %v1116_v42 = vadd.f32 %v1086_v2, %v274_v32  ;;  %v282_v61 = vsub.f32 %v250_v57, %v266_v54  ;;  %v281_v62 = vsub.f32 %v248_v58, %v265_v53 }
 0x105   :  { %v1108_v34 = vadd.f32 %v1086_v2, %v272_v28  ;;  %v1140_v60 = vadd.f32 %v1086_v2, %v280_v52 }
 0x106   :  { %v1145_v63 = vadd.f32 %v1086_v2, %v281_v62  ;;  %v1148_v0 = vadd.f32 %v1086_v2, %v282_v61 }
 0x107   :  { %313 = vmin.xlane.f32.xlu0 %v1105_v31  ;;  %315 = vmin.xlane.f32.xlu1 %v1108_v34 }
 0x10b   :  { %317 = vmin.xlane.f32.xlu0 %v1113_v41  ;;  %319 = vmin.xlane.f32.xlu1 %v1116_v42 }
 0x10f   :  { %321 = vmin.xlane.f32.xlu0 %v1121_v45  ;;  %323 = vmin.xlane.f32.xlu1 %v1124_v46 }
 0x113   :  { %325 = vmin.xlane.f32.xlu0 %v1129_v55  ;;  %327 = vmin.xlane.f32.xlu1 %v1132_v56 }
 0x117   :  { %329 = vmin.xlane.f32.xlu0 %v1137_v59  ;;  %331 = vmin.xlane.f32.xlu1 %v1140_v60 }
 0x11b   :  { %333 = vmin.xlane.f32.xlu0 %v1145_v63  ;;  %335 = vmin.xlane.f32.xlu1 %v1148_v0 }
 0x18a   :  { %v306_v4 = vpop.xlane.xlu1 %305 }
 0x18b   :  { %vm339_vm0 = vcmp.le.f32.partialorder %v1089_v8, %v306_v4 }
 0x18c   :  { %v1157_v5 = vsel %vm339_vm0, %v1153_v3, 1073741824  ;;  %v308_v6 = vpop.xlane.xlu0 %307 }
 0x18d   :  { %vm340_vm1 = vcmp.le.f32.partialorder %v1093_v13, %v308_v6  ;;  %v372_v2 = vshra.s32 %v1157_v5, 16 }
 0x18e   :  { %v1162_v7 = vsel %vm340_vm1, %v1153_v3, 1073741824  ;;  %v312_v9 = vpop.xlane.xlu1 %311 }
 0x18f   :  { %vm342_vm2 = vcmp.le.f32.partialorder %v1097_v19, %v312_v9  ;;  %v1165_v10 = vcvt.s32.f32 %v372_v2  ;;  %v386_v11 = vshra.s32 %v1162_v7, 16  ;;  %v371_v2 = vand.u32 65535, %v1157_v5 }
 0x190   :  { %v1169_v8 = vsel %vm342_vm2, %v1153_v3, 1073741824  ;;  %v310_v12 = vpop.xlane.xlu0 %309  ;;  %v385_v9 = vand.u32 65535, %v1162_v7 }
 0x191   :  { %vm341_vm3 = vcmp.le.f32.partialorder %v1100_v22, %v310_v12  ;;  %375 = vmin.xlane.f32.xlu1 %v1165_v10  ;;  %v1173_v13 = vcvt.s32.f32 %v386_v11  ;;  %v414_v14 = vshra.s32 %v1169_v8, 16  ;;  %v413_v11 = vand.u32 65535, %v1169_v8 }
 0x192   :  { %v1177_v15 = vsel %vm341_vm3, %v1153_v3, 1073741824 }
 0x193   :  { %389 = vmin.xlane.f32.xlu0 %v1173_v13  ;;  %v1180_v16 = vcvt.s32.f32 %v414_v14  ;;  %v400_v17 = vshra.s32 %v1177_v15, 16  ;;  %v373_v14 = vcvt.s32.f32 %v371_v2  ;;  %v415_v8 = vcvt.s32.f32 %v413_v11 }
 0x194   :  { %v314_v18 = vpop.xlane.xlu0 %313  ;;  %v316_v19 = vpop.xlane.xlu1 %315 }
 0x195   :  { %vm343_vm4 = vcmp.le.f32.partialorder %v1105_v31, %v314_v18  ;;  %vm344_vm5 = vcmp.le.f32.partialorder %v1108_v34, %v316_v19  ;;  %417 = vmin.xlane.f32.xlu1 %v1180_v16  ;;  %v1186_v20 = vcvt.s32.f32 %v400_v17  ;;  %v399_v17 = vand.u32 65535, %v1177_v15 }
 0x196   :  { %v1189_v21 = vsel %vm343_vm4, %v1153_v3, 1073741824  ;;  %v1192_v22 = vsel %vm344_vm5, %v1153_v3, 1073741824 }
 0x197   :  { %403 = vmin.xlane.f32.xlu0 %v1186_v20  ;;  %v428_v23 = vshra.s32 %v1189_v21, 16  ;;  %v442_v24 = vshra.s32 %v1192_v22, 16  ;;  %v441_v15 = vand.u32 65535, %v1192_v22 }
 0x198   :  { %v318_v25 = vpop.xlane.xlu0 %317  ;;  %v320_v26 = vpop.xlane.xlu1 %319 }
 0x199   :  { %vm345_vm6 = vcmp.le.f32.partialorder %v1113_v41, %v318_v25  ;;  %vm346_vm7 = vcmp.le.f32.partialorder %v1116_v42, %v320_v26  ;;  %v1199_v27 = vcvt.s32.f32 %v428_v23  ;;  %v1201_v28 = vcvt.s32.f32 %v442_v24 }
 0x19a   :  { %v1204_v29 = vsel %vm345_vm6, %v1153_v3, 1073741824  ;;  %v1207_v30 = vsel %vm346_vm7, %v1153_v3, 1073741824  ;;  %v387_v23 = vcvt.s32.f32 %v385_v9  ;;  %v401_v26 = vcvt.s32.f32 %v399_v17 }
 0x19b   :  { %431 = vmin.xlane.f32.xlu0 %v1199_v27  ;;  %445 = vmin.xlane.f32.xlu1 %v1201_v28  ;;  %v456_v31 = vshra.s32 %v1204_v29, 16  ;;  %v470_v32 = vshra.s32 %v1207_v30, 16  ;;  %v443_v22 = vcvt.s32.f32 %v441_v15 }
 0x19c   :  { %v322_v33 = vpop.xlane.xlu0 %321  ;;  %v324_v34 = vpop.xlane.xlu1 %323 }
 0x19d   :  { %vm347_vm8 = vcmp.le.f32.partialorder %v1121_v45, %v322_v33  ;;  %vm348_vm9 = vcmp.le.f32.partialorder %v1124_v46, %v324_v34  ;;  %v1215_v35 = vcvt.s32.f32 %v456_v31  ;;  %v1217_v36 = vcvt.s32.f32 %v470_v32 }
 0x19e   :  { %v1220_v37 = vsel %vm347_vm8, %v1153_v3, 1073741824  ;;  %v1223_v38 = vsel %vm348_vm9, %v1153_v3, 1073741824  ;;  %v455_v31 = vand.u32 65535, %v1204_v29  ;;  %v469_v32 = vand.u32 65535, %v1207_v30 }
 0x19f   :  { %459 = vmin.xlane.f32.xlu0 %v1215_v35  ;;  %473 = vmin.xlane.f32.xlu1 %v1217_v36  ;;  %v484_v39 = vshra.s32 %v1220_v37, 16  ;;  %v498_v40 = vshra.s32 %v1223_v38, 16  ;;  %v483_v29 = vand.u32 65535, %v1220_v37  ;;  %v497_v30 = vand.u32 65535, %v1223_v38 }
 0x1a0   :  { %v326_v41 = vpop.xlane.xlu0 %325  ;;  %v328_v42 = vpop.xlane.xlu1 %327 }
 0x1a1   :  { %vm349_vm10 = vcmp.le.f32.partialorder %v1129_v55, %v326_v41  ;;  %vm350_vm11 = vcmp.le.f32.partialorder %v1132_v56, %v328_v42  ;;  %v1231_v43 = vcvt.s32.f32 %v484_v39  ;;  %v1233_v44 = vcvt.s32.f32 %v498_v40 }
 0x1a2   :  { %v1236_v45 = vsel %vm349_vm10, %v1153_v3, 1073741824  ;;  %v1239_v46 = vsel %vm350_vm11, %v1153_v3, 1073741824  ;;  %v457_v41 = vcvt.s32.f32 %v455_v31  ;;  %v471_v42 = vcvt.s32.f32 %v469_v32 }
 0x1a3   :  { %487 = vmin.xlane.f32.xlu0 %v1231_v43  ;;  %501 = vmin.xlane.f32.xlu1 %v1233_v44  ;;  %v512_v47 = vshra.s32 %v1236_v45, 16  ;;  %v526_v48 = vshra.s32 %v1239_v46, 16  ;;  %v511_v37 = vand.u32 65535, %v1236_v45  ;;  %v525_v38 = vand.u32 65535, %v1239_v46 }
 0x1a4   :  { %v330_v49 = vpop.xlane.xlu0 %329  ;;  %v332_v50 = vpop.xlane.xlu1 %331 }
 0x1a5   :  { %vm351_vm12 = vcmp.le.f32.partialorder %v1137_v59, %v330_v49  ;;  %vm352_vm13 = vcmp.le.f32.partialorder %v1140_v60, %v332_v50  ;;  %v1247_v51 = vcvt.s32.f32 %v512_v47  ;;  %v1249_v52 = vcvt.s32.f32 %v526_v48 }
 0x1a6   :  { %v1252_v53 = vsel %vm351_vm12, %v1153_v3, 1073741824  ;;  %v1255_v54 = vsel %vm352_vm13, %v1153_v3, 1073741824  ;;  %v485_v49 = vcvt.s32.f32 %v483_v29  ;;  %v499_v50 = vcvt.s32.f32 %v497_v30 }
 0x1a7   :  { %515 = vmin.xlane.f32.xlu0 %v1247_v51  ;;  %529 = vmin.xlane.f32.xlu1 %v1249_v52  ;;  %v540_v55 = vshra.s32 %v1252_v53, 16  ;;  %v554_v56 = vshra.s32 %v1255_v54, 16  ;;  %v539_v45 = vand.u32 65535, %v1252_v53  ;;  %v553_v46 = vand.u32 65535, %v1255_v54 }
 0x1a8   :  { %v334_v57 = vpop.xlane.xlu0 %333  ;;  %v336_v58 = vpop.xlane.xlu1 %335 }
 0x1a9   :  { %vm353_vm14 = vcmp.le.f32.partialorder %v1145_v63, %v334_v57  ;;  %vm354_vm15 = vcmp.le.f32.partialorder %v1148_v0, %v336_v58  ;;  %v1263_v59 = vcvt.s32.f32 %v540_v55  ;;  %v1265_v60 = vcvt.s32.f32 %v554_v56 }
 0x1aa   :  { %v1268_v61 = vsel %vm353_vm14, %v1153_v3, 1073741824  ;;  %v1271_v62 = vsel %vm354_vm15, %v1153_v3, 1073741824  ;;  %v513_v57 = vcvt.s32.f32 %v511_v37  ;;  %v527_v58 = vcvt.s32.f32 %v525_v38 }
 0x1ab   :  { %543 = vmin.xlane.f32.xlu0 %v1263_v59  ;;  %557 = vmin.xlane.f32.xlu1 %v1265_v60  ;;  %v568_v4 = vshra.s32 %v1268_v61, 16  ;;  %v582_v63 = vshra.s32 %v1271_v62, 16  ;;  %v567_v53 = vand.u32 65535, %v1268_v61  ;;  %v581_v54 = vand.u32 65535, %v1271_v62 }
 0x1ac   :  { %v541_v2 = vcvt.s32.f32 %v539_v45  ;;  %v555_v9 = vcvt.s32.f32 %v553_v46 }
 0x1ad   :  { %v1277_v6 = vcvt.s32.f32 %v568_v4  ;;  %v1279_v0 = vcvt.s32.f32 %v582_v63  ;;  %v569_v17 = vcvt.s32.f32 %v567_v53 }
 0x1af   :  { %571 = vmin.xlane.f32.xlu0 %v1277_v6  ;;  %585 = vmin.xlane.f32.xlu1 %v1279_v0 }
 0x21e   :  { %v1286_v12 = vpop.xlane.xlu1 %375 }
 0x21f   :  { %vm377_vm0 = vcmp.eq.f32.partialorder %v1165_v10, %v1286_v12  ;;  %v427_v10 = vand.u32 65535, %v1189_v21 }
 0x220   :  { %v1291_v18 = vpop.xlane.xlu0 %389  ;;  %v378_v19 = vsel %vm377_vm0, %v373_v14, inf  ;;  %vm604_vm0 = vcmask 130112  }
 0x221   :  { %379 = vmin.xlane.f32.xlu1 %v378_v19  ;;  %vm391_vm1 = vcmp.eq.f32.partialorder %v1173_v13, %v1291_v18  ;;  %v429_v21 = vcvt.s32.f32 %v427_v10  ;;  %v583_v19 = vcvt.s32.f32 %v581_v54 }
 0x222   :  { %v1295_v5 = vpop.xlane.xlu1 %417  ;;  %v392_v7 = vsel %vm391_vm1, %v387_v23, inf  ;;  %v396_v23 = vcvt.f32.s32 %v1291_v18  ;;  %vm611_vm1 = vcmask 195712  }
 0x223   :  { %393 = vmin.xlane.f32.xlu0 %v392_v7  ;;  %vm419_vm2 = vcmp.eq.f32.partialorder %v1180_v16, %v1295_v5  ;;  %v424_v7 = vcvt.f32.s32 %v1295_v5 }
 0x224   :  { %v1301_v24 = vpop.xlane.xlu0 %403  ;;  %v420_v25 = vsel %vm419_vm2, %v415_v8, inf  ;;  %vm618_vm2 = vcmask 261312  }
 0x225   :  { %421 = vmin.xlane.f32.xlu1 %v420_v25  ;;  %vm405_vm3 = vcmp.eq.f32.partialorder %v1186_v20, %v1301_v24  ;;  %v410_v8 = vcvt.f32.s32 %v1301_v24  ;;  %v425_v18 = vshll.u32 %v424_v7, 16  ;;  %v599_v24 = vadd.s32 4294967288, %v1153_v3 }
 0x226   :  { %v406_v13 = vsel %vm405_vm3, %v401_v26, inf  ;;  %v397_v26 = vshll.u32 %v396_v23, 16  ;;  %v980_v7 = vmov 0.0  }
 0x227   :  { %407 = vmin.xlane.f32.xlu0 %v406_v13  ;;  %v1367_v13 = vshll.u32 %v410_v8, 16 }
 0x228   :  { %v1307_v33 = vpop.xlane.xlu0 %431  ;;  %v1309_v16 = vpop.xlane.xlu1 %445 }
 0x229   :  { %vm433_vm4 = vcmp.eq.f32.partialorder %v1199_v27, %v1307_v33  ;;  %vm447_vm5 = vcmp.eq.f32.partialorder %v1201_v28, %v1309_v16  ;;  %v438_v10 = vcvt.f32.s32 %v1307_v33 }
 0x22a   :  { %v434_v34 = vsel %vm433_vm4, %v429_v21, inf  ;;  %v448_v20 = vsel %vm447_vm5, %v443_v22, inf  ;;  %vm625_vm4 = vcmask 326912  }
 0x22b   :  { %435 = vmin.xlane.f32.xlu0 %v434_v34  ;;  %449 = vmin.xlane.f32.xlu1 %v448_v20  ;;  %v1369_v31 = vshll.u32 %v438_v10, 16  ;;  %v1381_v34 = vadd.s32 4294967272, %v1153_v3 }
 0x22c   :  { %v1317_v39 = vpop.xlane.xlu0 %459  ;;  %v1319_v40 = vpop.xlane.xlu1 %473 }
 0x22d   :  { %vm461_vm6 = vcmp.eq.f32.partialorder %v1215_v35, %v1317_v39  ;;  %vm475_vm7 = vcmp.eq.f32.partialorder %v1217_v36, %v1319_v40  ;;  %v480_v15 = vcvt.f32.s32 %v1319_v40 }
 0x22e   :  { %v462_v27 = vsel %vm461_vm6, %v457_v41, inf  ;;  %v476_v28 = vsel %vm475_vm7, %v471_v42, inf  ;;  %v1391_v42 = vadd.s32 4294967264, %v1153_v3  ;;  %vm632_vm6 = vcmask 392512  }
 0x22f   :  { %463 = vmin.xlane.f32.xlu0 %v462_v27  ;;  %477 = vmin.xlane.f32.xlu1 %v476_v28  ;;  %v1394_v27 = vadd.s32 4294967256, %v1153_v3 }
 0x230   :  { %v1327_v47 = vpop.xlane.xlu0 %487  ;;  %v1329_v48 = vpop.xlane.xlu1 %501 }
 0x231   :  { %vm489_vm8 = vcmp.eq.f32.partialorder %v1231_v43, %v1327_v47  ;;  %vm503_vm9 = vcmp.eq.f32.partialorder %v1233_v44, %v1329_v48  ;;  %v494_v25 = vcvt.f32.s32 %v1327_v47  ;;  %v508_v5 = vcvt.f32.s32 %v1329_v48 }
 0x232   :  { %v490_v35 = vsel %vm489_vm8, %v485_v49, inf  ;;  %v504_v36 = vsel %vm503_vm9, %v499_v50, inf  ;;  %v1397_v47 = vadd.s32 4294967248, %v1153_v3  ;;  %vm639_vm8 = vcmask 458112  }
 0x233   :  { %491 = vmin.xlane.f32.xlu0 %v490_v35  ;;  %505 = vmin.xlane.f32.xlu1 %v504_v36  ;;  %v1377_v21 = vshll.u32 %v494_v25, 16  ;;  %v1387_v40 = vshll.u32 %v508_v5, 16  ;;  %v1404_v35 = vadd.s32 4294967240, %v1153_v3 }
 0x234   :  { %v1337_v55 = vpop.xlane.xlu0 %515  ;;  %v1339_v56 = vpop.xlane.xlu1 %529 }
 0x235   :  { %vm517_vm10 = vcmp.eq.f32.partialorder %v1247_v51, %v1337_v55  ;;  %vm531_vm11 = vcmp.eq.f32.partialorder %v1249_v52, %v1339_v56  ;;  %v522_v22 = vcvt.f32.s32 %v1337_v55  ;;  %v536_v20 = vcvt.f32.s32 %v1339_v56 }
 0x236   :  { %v518_v43 = vsel %vm517_vm10, %v513_v57, inf  ;;  %v532_v44 = vsel %vm531_vm11, %v527_v58, inf  ;;  %vm646_vm10 = vcmask 523712   ;;  %vm653_vm11 = vcmask 589312  }
 0x237   :  { %519 = vmin.xlane.f32.xlu0 %v518_v43  ;;  %533 = vmin.xlane.f32.xlu1 %v532_v44  ;;  %v1399_v48 = vshll.u32 %v522_v22, 16  ;;  %v1406_v36 = vshll.u32 %v536_v20, 16 }
 0x238   :  { %v544_v4 = vpop.xlane.xlu0 %543  ;;  %v558_v63 = vpop.xlane.xlu1 %557 }
 0x239   :  { %vm545_vm12 = vcmp.eq.f32.partialorder %v1263_v59, %v544_v4  ;;  %vm559_vm13 = vcmp.eq.f32.partialorder %v1265_v60, %v558_v63  ;;  %v382_v59 = vcvt.f32.s32 %v1286_v12  ;;  %v1353_v60 = vshrl.u32 %v337_v1, 7 }
 0x23a   :  { %v546_v51 = vsel %vm545_vm12, %v541_v2, inf  ;;  %v560_v11 = vsel %vm559_vm13, %v555_v9, inf  ;;  %v550_v29 = vcvt.f32.s32 %v544_v4  ;;  %v564_v30 = vcvt.f32.s32 %v558_v63 }
 0x23b   :  { %547 = vmin.xlane.f32.xlu0 %v546_v51  ;;  %561 = vmin.xlane.f32.xlu1 %v560_v11  ;;  %v383_v12 = vshll.u32 %v382_v59, 16  ;;  %v597_v1 = vsub.s32 %v1153_v3, %v1353_v60  ;;  %v602_v41 = vsub.s32 %v599_v24, %v1353_v60  ;;  %v616_v50 = vsub.s32 %v1381_v34, %v1353_v60 }
 0x23c   :  { %v572_v52 = vpop.xlane.xlu0 %571  ;;  %v586_v14 = vpop.xlane.xlu1 %585  ;;  %v1408_v45 = vshll.u32 %v550_v29, 16  ;;  %v1410_v46 = vshll.u32 %v564_v30, 16  ;;  %v623_v43 = vsub.s32 %v1391_v42, %v1353_v60  ;;  %v630_v44 = vsub.s32 %v1394_v27, %v1353_v60 }
 0x23d   :  { %vm573_vm14 = vcmp.eq.f32.partialorder %v1277_v6, %v572_v52  ;;  %vm587_vm15 = vcmp.eq.f32.partialorder %v1279_v0, %v586_v14  ;;  %v452_v6 = vcvt.f32.s32 %v1309_v16  ;;  %v466_v0 = vcvt.f32.s32 %v1317_v39 }
 0x23e   :  { %v574_v61 = vsel %vm573_vm14, %v569_v17, inf  ;;  %v588_v62 = vsel %vm587_vm15, %v583_v19, inf  ;;  %v1375_v16 = vshll.u32 %v480_v15, 16  ;;  %v1385_v39 = vadd.s32 4294967280, %v1153_v3 }
 0x23f   :  { %575 = vmin.xlane.f32.xlu0 %v574_v61  ;;  %589 = vmin.xlane.f32.xlu1 %v588_v62  ;;  %v1371_v32 = vshll.u32 %v452_v6, 16  ;;  %v1373_v33 = vshll.u32 %v466_v0, 16  ;;  %v578_v28 = vcvt.f32.s32 %v572_v52  ;;  %v592_v37 = vcvt.f32.s32 %v586_v14 }
 0x240   :  { %v609_v56 = vsub.s32 %v1385_v39, %v1353_v60  ;;  %v637_v63 = vsub.s32 %v1397_v47, %v1353_v60  ;;  %v1425_v2 = vadd.s32 4294967232, %v1153_v3  ;;  %v644_v11 = vsub.s32 %v1404_v35, %v1353_v60 }
 0x241   :  { %v1418_v53 = vshll.u32 %v578_v28, 16  ;;  %v1420_v54 = vshll.u32 %v592_v37, 16  ;;  %v1430_v52 = vadd.s32 4294967224, %v1153_v3  ;;  %v1434_v19 = vadd.s32 4294967216, %v1153_v3 }
 0x242   :  { %v1437_v61 = vadd.s32 4294967208, %v1153_v3  ;;  %v651_v10 = vsub.s32 %v1425_v2, %v1353_v60  ;;  %v1444_v6 = vadd.s32 4294967200, %v1153_v3  ;;  %v1447_v0 = vadd.s32 4294967192, %v1153_v3 }
 0x243   :  { %v665_v24 = vsub.s32 %v1434_v19, %v1353_v60  ;;  %vm660_vm14 = vcmask 654912   ;;  %vm667_vm15 = vcmask 720512  }
 0x244   :  { %v672_v22 = vsub.s32 %v1437_v61, %v1353_v60 }
 0x2ae   :  { %v380_v38 = vpop.xlane.xlu1 %379 }
 0x2af   :  { %v381_v49 = vcvt.f32.s32 %v380_v38 }
 0x2b0   :  { %v394_v55 = vpop.xlane.xlu0 %393 }
 0x2b1   :  { %v384_v57 = vadd.s32 %v383_v12, %v381_v49  ;;  %v395_v58 = vcvt.f32.s32 %v394_v55  ;;  %v658_v12 = vsub.s32 %v1430_v52, %v1353_v60 }
 0x2b2   :  { %v422_v4 = vpop.xlane.xlu1 %421 }
 0x2b3   :  { %v398_v9 = vadd.s32 %v397_v26, %v395_v58  ;;  %v423_v51 = vcvt.f32.s32 %v422_v4  ;;  %v598_v14 = vrot.slane %v384_v57, %v597_v1  ;;  %vm788_vm3 = vcmp.eq.s32.totalorder %v1153_v3, %v384_v57 }
 0x2b4   :  { %v408_v17 = vpop.xlane.xlu0 %407  ;;  %v891_v1 = vsel %vm788_vm3, 1.0, %v980_v7  ;;  %v1472_v58 = vadd.s32 4294967184, %v1153_v3  ;;  %vm681_vm3 = vcmask 851712  }
 0x2b5   :  { %v603_v62 = vrot.slane %v398_v9, %v602_v41  ;;  %vm789_vm5 = vcmp.eq.s32.totalorder %v1153_v3, %v398_v9  ;;  %v426_v59 = vadd.s32 %v425_v18, %v423_v51  ;;  %v409_v23 = vcvt.f32.s32 %v408_v17 }
 0x2b6   :  { %v892_v8 = vsel %vm789_vm5, 1.0, %v980_v7  ;;  %v686_v41 = vsub.s32 %v1447_v0, %v1353_v60  ;;  %vm688_vm5 = vcmask 917312  }
 0x2b7   :  { %v605_v15 = vsel %vm604_vm0, %v603_v62, %v598_v14  ;;  %v837_v25 = vmul.f32 0.0, %v892_v8  ;;  %vm791_vm7 = vcmp.eq.s32.totalorder %v1153_v3, %v426_v59  ;;  %v412_v26 = vadd.s32 %v1367_v13, %v409_v23 }
 0x2b8   :  { %v436_v18 = vpop.xlane.xlu0 %435  ;;  %v450_v5 = vpop.xlane.xlu1 %449  ;;  %v894_v20 = vsel %vm791_vm7, 1.0, %v980_v7  ;;  %v679_v13 = vsub.s32 %v1444_v6, %v1353_v60  ;;  %v617_v42 = vrot.slane %v426_v59, %v616_v50 }
 0x2b9   :  { %v852_v34 = vadd.f32 %v891_v1, %v837_v25  ;;  %v437_v29 = vcvt.f32.s32 %v436_v18  ;;  %v451_v30 = vcvt.f32.s32 %v450_v5  ;;  %v610_v39 = vrot.slane %v412_v26, %v609_v56 }
 0x2ba   :  { %vm790_vm9 = vcmp.eq.s32.totalorder %v1153_v3, %v412_v26  ;;  %v839_v38 = vmul.f32 0.0, %v894_v20  ;;  %v1483_v25 = vadd.s32 4294967176, %v1153_v3  ;;  %v693_v5 = vsub.s32 %v1472_v58, %v1353_v60 }
 0x2bb   :  { %v893_v27 = vsel %vm790_vm9, 1.0, %v980_v7  ;;  %v440_v28 = vadd.s32 %v1369_v31, %v437_v29  ;;  %v454_v37 = vadd.s32 %v1371_v32, %v451_v30  ;;  %v612_v49 = vsel %vm611_vm1, %v610_v39, %v605_v15 }
 0x2bc   :  { %v838_v55 = vmul.f32 0.0, %v893_v27  ;;  %v464_v56 = vpop.xlane.xlu0 %463  ;;  %v478_v57 = vpop.xlane.xlu1 %477  ;;  %v619_v4 = vsel %vm618_vm2, %v617_v42, %v612_v49  ;;  %vm674_vm1 = vcmask 786112   ;;  %vm695_vm9 = vcmask 982912  }
 0x2bd   :  { %v624_v9 = vrot.slane %v440_v28, %v623_v43  ;;  %vm792_vm12 = vcmp.eq.s32.totalorder %v1153_v3, %v440_v28  ;;  %v631_v50 = vrot.slane %v454_v37, %v630_v44  ;;  %vm793_vm13 = vcmp.eq.s32.totalorder %v1153_v3, %v454_v37 }
 0x2be   :  { %v853_v51 = vadd.f32 %v852_v34, %v838_v55  ;;  %v895_v31 = vsel %vm792_vm12, 1.0, %v980_v7  ;;  %v465_v32 = vcvt.f32.s32 %v464_v56  ;;  %v896_v62 = vsel %vm793_vm13, 1.0, %v980_v7 }
 0x2bf   :  { %v626_v14 = vsel %vm625_vm4, %v624_v9, %v619_v4  ;;  %v840_v17 = vmul.f32 0.0, %v895_v31  ;;  %v479_v59 = vcvt.f32.s32 %v478_v57  ;;  %v841_v1 = vmul.f32 0.0, %v896_v62 }
 0x2c0   :  { %v854_v23 = vadd.f32 %v853_v51, %v839_v38  ;;  %v633_v8 = vsel %vm632_vm6, %v631_v50, %v626_v14  ;;  %v468_v43 = vadd.s32 %v1373_v33, %v465_v32  ;;  %v492_v15 = vpop.xlane.xlu0 %491  ;;  %v506_v44 = vpop.xlane.xlu1 %505  ;;  %v700_v9 = vsub.s32 %v1483_v25, %v1353_v60 }
 0x2c1   :  { %v482_v26 = vadd.s32 %v1375_v16, %v479_v59  ;;  %v493_v18 = vcvt.f32.s32 %v492_v15  ;;  %v507_v33 = vcvt.f32.s32 %v506_v44  ;;  %vm702_vm12 = vcmask 1048512  }
 0x2c2   :  { %v855_v34 = vadd.f32 %v854_v23, %v840_v17  ;;  %v638_v20 = vrot.slane %v468_v43, %v637_v63  ;;  %vm794_vm0 = vcmp.eq.s32.totalorder %v1153_v3, %v468_v43 }
 0x2c3   :  { %v897_v29 = vsel %vm794_vm0, 1.0, %v980_v7  ;;  %v645_v16 = vrot.slane %v482_v26, %v644_v11  ;;  %vm795_vm2 = vcmp.eq.s32.totalorder %v1153_v3, %v482_v26  ;;  %v496_v30 = vadd.s32 %v1377_v21, %v493_v18 }
 0x2c4   :  { %v856_v39 = vadd.f32 %v855_v34, %v841_v1  ;;  %v640_v42 = vsel %vm639_vm8, %v638_v20, %v633_v8  ;;  %v842_v27 = vmul.f32 0.0, %v897_v29  ;;  %v898_v47 = vsel %vm795_vm2, 1.0, %v980_v7  ;;  %v520_v63 = vpop.xlane.xlu0 %519  ;;  %v534_v28 = vpop.xlane.xlu1 %533 }
 0x2c5   :  { %v647_v37 = vsel %vm646_vm10, %v645_v16, %v640_v42  ;;  %v843_v38 = vmul.f32 0.0, %v898_v47  ;;  %v652_v35 = vrot.slane %v496_v30, %v651_v10  ;;  %vm796_vm4 = vcmp.eq.s32.totalorder %v1153_v3, %v496_v30 }
 0x2c6   :  { %v857_v11 = vadd.f32 %v856_v39, %v842_v27  ;;  %v899_v21 = vsel %vm796_vm4, 1.0, %v980_v7  ;;  %v510_v49 = vadd.s32 %v1387_v40, %v507_v33  ;;  %v521_v55 = vcvt.f32.s32 %v520_v63 }
 0x2c7   :  { %v654_v56 = vsel %vm653_vm11, %v652_v35, %v647_v37  ;;  %v844_v57 = vmul.f32 0.0, %v899_v21  ;;  %v535_v4 = vcvt.f32.s32 %v534_v28 }
 0x2c8   :  { %v858_v50 = vadd.f32 %v857_v11, %v843_v38  ;;  %v659_v2 = vrot.slane %v510_v49, %v658_v12  ;;  %vm797_vm6 = vcmp.eq.s32.totalorder %v1153_v3, %v510_v49  ;;  %v524_v10 = vadd.s32 %v1399_v48, %v521_v55  ;;  %v548_v51 = vpop.xlane.xlu0 %547  ;;  %v562_v40 = vpop.xlane.xlu1 %561 }
 0x2c9   :  { %v900_v31 = vsel %vm797_vm6, 1.0, %v980_v7  ;;  %v538_v32 = vadd.s32 %v1406_v36, %v535_v4  ;;  %v549_v14 = vcvt.f32.s32 %v548_v51  ;;  %v563_v17 = vcvt.f32.s32 %v562_v40 }
 0x2ca   :  { %v859_v62 = vadd.f32 %v858_v50, %v844_v57  ;;  %v661_v59 = vsel %vm660_vm14, %v659_v2, %v654_v56  ;;  %v845_v23 = vmul.f32 0.0, %v900_v31  ;;  %v666_v52 = vrot.slane %v524_v10, %v665_v24 }
 0x2cb   :  { %vm798_vm7 = vcmp.eq.s32.totalorder %v1153_v3, %v524_v10  ;;  %v673_v48 = vrot.slane %v538_v32, %v672_v22  ;;  %vm799_vm8 = vcmp.eq.s32.totalorder %v1153_v3, %v538_v32  ;;  %v552_v36 = vadd.s32 %v1408_v45, %v549_v14 }
 0x2cc   :  { %v860_v12 = vadd.f32 %v859_v62, %v845_v23  ;;  %v668_v8 = vsel %vm667_vm15, %v666_v52, %v661_v59  ;;  %v901_v43 = vsel %vm798_vm7, 1.0, %v980_v7  ;;  %v902_v15 = vsel %vm799_vm8, 1.0, %v980_v7  ;;  %v576_v44 = vpop.xlane.xlu0 %575  ;;  %v590_v19 = vpop.xlane.xlu1 %589 }
 0x2cd   :  { %v846_v24 = vmul.f32 0.0, %v901_v43  ;;  %v675_v25 = vsel %vm674_vm1, %v673_v48, %v668_v8  ;;  %v680_v61 = vrot.slane %v552_v36, %v679_v13  ;;  %vm800_vm10 = vcmp.eq.s32.totalorder %v1153_v3, %v552_v36 }
 0x2ce   :  { %v566_v45 = vadd.s32 %v1410_v46, %v563_v17  ;;  %v577_v22 = vcvt.f32.s32 %v576_v44  ;;  %v591_v1 = vcvt.f32.s32 %v590_v19  ;;  %v847_v18 = vmul.f32 0.0, %v902_v15 }
 0x2cf   :  { %v861_v26 = vadd.f32 %v860_v12, %v846_v24  ;;  %v682_v34 = vsel %vm681_vm3, %v680_v61, %v675_v25  ;;  %v903_v20 = vsel %vm800_vm10, 1.0, %v980_v7 }
 0x2d0   :  { %v848_v33 = vmul.f32 0.0, %v903_v20  ;;  %v687_v29 = vrot.slane %v566_v45, %v686_v41  ;;  %vm801_vm11 = vcmp.eq.s32.totalorder %v1153_v3, %v566_v45  ;;  %v580_v6 = vadd.s32 %v1418_v53, %v577_v22 }
 0x2d1   :  { %v862_v13 = vadd.f32 %v861_v26, %v847_v18  ;;  %v904_v46 = vsel %vm801_vm11, 1.0, %v980_v7  ;;  %v594_v16 = vadd.s32 %v1420_v54, %v591_v1 }
 0x2d2   :  { %v689_v30 = vsel %vm688_vm5, %v687_v29, %v682_v34  ;;  %v849_v39 = vmul.f32 0.0, %v904_v46  ;;  %v694_v42 = vrot.slane %v580_v6, %v693_v5  ;;  %vm802_vm13 = vcmp.eq.s32.totalorder %v1153_v3, %v580_v6 }
 0x2d3   :  { %v863_v0 = vadd.f32 %v862_v13, %v848_v33  ;;  %v905_v41 = vsel %vm802_vm13, 1.0, %v980_v7  ;;  %v701_v27 = vrot.slane %v594_v16, %v700_v9  ;;  %vm803_vm14 = vcmp.eq.s32.totalorder %v1153_v3, %v594_v16 }
 0x2d4   :  { %v696_v53 = vsel %vm695_vm9, %v694_v42, %v689_v30  ;;  %v850_v47 = vmul.f32 0.0, %v905_v41  ;;  %v906_v54 = vsel %vm803_vm14, 1.0, %v980_v7 }
 0x2d5   :  { %v864_v63 = vadd.f32 %v863_v0, %v849_v39  ;;  %v703_v28 = vsel %vm702_vm12, %v701_v27, %v696_v53  ;;  %v851_v58 = vmul.f32 0.0, %v906_v54 }
 0x2d6   :  { %704 = vst [vmem:[%s1563_s3] sm:$0x1] %v703_v28 }
 0x2d7   :  { %v865_v60 = vadd.f32 %v864_v63, %v850_v47 }
 0x2d9   :  { %v866_v5 = vadd.f32 %v865_v60, %v851_v58 }
 0x2db   :  { %v867_v37 = vrot.slane %v866_v5, 4 }
 0x2dd   :  { %v868_v38 = vadd.f32 %v867_v37, %v866_v5 }
 0x2df   :  { %v869_v35 = vrot.slane %v868_v38, 2 }
 0x2e1   :  { %v870_v11 = vadd.f32 %v869_v35, %v868_v38 }
 0x2e3   :  { %v871_v21 = vrot.slane %v870_v11, 1 }
 0x2e5   :  { %v872_v3 = vadd.f32 %v871_v21, %v870_v11 }
 0x2e7   :  { %873 = vst [vmem:[%s1564_s4] sm:$0x1] %v872_v3 }

// kernel: forward.27
= control target key start
LH: loop header
LB: loop body
LE: loop exit
PB: predicated region body
PF: predicated region fallthrough
CT: control target
= control target key end

     0   :  { %s737_s12 = smov 0   ;;  %s739_s13 = smov 0   ;;  %s853_s0 = inlined_call_operand.vmem [shape: bf16[2,6,128], index: 0, kind: input, shape index: {}]   ;;  %s854_s1 = inlined_call_operand.vmem [shape: bf16[384,128], index: 1, kind: input, shape index: {}]   ;;  %s855_s2 = inlined_call_operand.vmem [shape: f32[1,128], index: 2, kind: input, shape index: {}]   ;;  %s856_s3 = inlined_call_operand.vmem [shape: bf16[2,4,128], index: 3, kind: output, shape index: {}]  }
   0x1   :  { %s741_s14 = smov 0  }
   0x2 LB: > { %s25_s15 = sadd.s32 1, %s709_s13  ;;  %p558_p0 = scmp.ge.s32.totalorder %s713_s14, 1  ;;  %s713_s14 = sphi %s741_s14, %s13_s14   ;;  %s709_s13 = sphi %s739_s13, %s858_s13   ;;  %s705_s12 = sphi %s737_s12, %s857_s12  }
   0x3   : > { %p27_p1 = scmp.ge.s32.totalorder %s25_s15, 2  ;;  %p150_p2 = scmp.lt.s32.totalorder %s713_s14, 3 }
   0x5   : > { %s860_s15 = smov (%p27_p1, %s25_s15), 0  ;;  %p151_p3 = pnand %p558_p0, %p150_p2 }
   0x6   : > { %v666_v0 = vld [vmem:[%s854_s1 + $0x40] sm:$0xff] (!%p151_p3)   ;;  %v715_v2 = vmov (!%p151_p3), 0.0   ;;  %v669_v4 = vld [vmem:[%s854_s1 + $0x48] sm:$0xff] (!%p151_p3)   ;;  %vm716_vm0 = vmmov (!%p151_p3), 0   ;;  %v672_v7 = vld [vmem:[%s854_s1 + $0x50] sm:$0xff] (!%p151_p3)   ;;  %p175_p4 = scmp.lt.s32.totalorder (!%p151_p3), %s705_s12, 1 }
   0x7   : > { %154 = sbr.rel (%p151_p3) target bundleno = 263 (0x107), region = 32  ;;  %v667_v1 = vld [vmem:[%s854_s1] sm:$0xff] (!%p151_p3)   ;;  %620 = vmatprep.subr.bf16.mxu1 (!%p151_p3), %v715_v2  ;;  %589 = vmatprep.subr.bf16.mxu0 (!%p151_p3), %v666_v0  ;;  %v670_v5 = vld [vmem:[%s854_s1 + $0x8] sm:$0xff] (!%p151_p3)   ;;  %v673_v8 = vld [vmem:[%s854_s1 + $0x10] sm:$0xff] (!%p151_p3)  }
   0x8   : > { %v668_v3 = vld [vmem:[%s854_s1 + $0x80] sm:$0xff] (!%p151_p3)   ;;  %590 = vmatpush3.bf16.msra.mxu0 (!%p151_p3), %v667_v1  ;;  %636 = vmatprep.mubr.msk.bf16.mxu1 (!%p151_p3), %vm716_vm0, %v715_v2  ;;  %v671_v6 = vld [vmem:[%s854_s1 + $0x88] sm:$0xff] (!%p151_p3)   ;;  %v674_v9 = vld [vmem:[%s854_s1 + $0x90] sm:$0xff] (!%p151_p3)  }
   0x9   : > { %621 = vmatpush3.bf16.msra.mxu1 (!%p151_p3), %v668_v3  ;;  %591 = vmatprep.subr.bf16.mxu0 (!%p151_p3), %v669_v4  ;;  %v675_v10 = vld [vmem:[%s854_s1 + $0x58] sm:$0xff] (!%p151_p3)   ;;  %v678_v13 = vld [vmem:[%s854_s1 + $0x60] sm:$0xff] (!%p151_p3)   ;;  %v681_v16 = vld [vmem:[%s854_s1 + $0x68] sm:$0xff] (!%p151_p3)  }
   0xa   : > { %622 = vmatprep.subr.bf16.mxu1 (!%p151_p3), %v715_v2  ;;  %v676_v11 = vld [vmem:[%s854_s1 + $0x18] sm:$0xff] (!%p151_p3)   ;;  %v679_v14 = vld [vmem:[%s854_s1 + $0x20] sm:$0xff] (!%p151_p3)   ;;  %v682_v17 = vld [vmem:[%s854_s1 + $0x28] sm:$0xff] (!%p151_p3)  }
   0xb   : > { %v677_v12 = vld [vmem:[%s854_s1 + $0x98] sm:$0xff] (!%p151_p3)   ;;  %v680_v15 = vld [vmem:[%s854_s1 + $0xa0] sm:$0xff] (!%p151_p3)   ;;  %v683_v18 = vld [vmem:[%s854_s1 + $0xa8] sm:$0xff] (!%p151_p3)  }
   0xc   : > { %592 = vmatpush3.bf16.msra.mxu0 (!%p151_p3), %v670_v5  ;;  %v684_v19 = vld [vmem:[%s854_s1 + $0x70] sm:$0xff] (!%p151_p3)   ;;  %v687_v23 = vld [vmem:[%s854_s1 + $0x78] sm:$0xff] (!%p151_p3)   ;;  %v562_v34 = vld [vmem:[%s855_s2] ss:$0 sm:$0xff] (!%p151_p3) }
   0xd   : > { %623 = vmatpush3.bf16.msra.mxu1 (!%p151_p3), %v671_v6  ;;  %593 = vmatprep.subr.bf16.mxu0 (!%p151_p3), %v672_v7  ;;  %v685_v20 = vld [vmem:[%s854_s1 + $0x30] sm:$0xff] (!%p151_p3)   ;;  %v688_v27 = vld [vmem:[%s854_s1 + $0x38] sm:$0xff] (!%p151_p3)  }
   0xe   : > { %624 = vmatprep.subr.bf16.mxu1 %v715_v2  ;;  %s862_s12 = smov (!%p175_p4, %s705_s12), 1  ;;  %v686_v22 = vld [vmem:[%s854_s1 + $0xb0] sm:$0xff]   ;;  %v690_v29 = vld [vmem:[%s854_s1 + $0xb8] sm:$0xff]  }
   0xf   : > { %s559_s25 = sshll.u32 %s862_s12, 2  ;;  %s560_s24 = sshll.u32 %s862_s12, 1 }
  0x10   : > { %594 = vmatpush3.bf16.msra.mxu0 %v673_v8  ;;  %s178_s7 = scalar_lea.vmem %s853_s0, %s559_s25  ;;  %s185_s27 = scalar_lea.vmem %s856_s3, %s560_s24 }
  0x11   : > { %625 = vmatpush3.bf16.msra.mxu1 %v674_v9  ;;  %595 = vmatprep.subr.bf16.mxu0 %v675_v10  ;;  %v187_v21 = vld [vmem:[%s178_s7] sm:$0x7] }
  0x12   : > { %626 = vmatprep.subr.bf16.mxu1 %v715_v2  ;;  %v561_v24 = vcombine.low %v187_v21, %v187_v21 }
  0x14   : > { %596 = vmatpush3.bf16.msra.mxu0 %v676_v11  ;;  %v192_v25 = vshrl.u32 %v561_v24, 16  ;;  %v194_v26 = vshll.u32 %v561_v24, 16  ;;  %v199_v31 = vrot.slane %v561_v24, 1 }
  0x15   : > { %627 = vmatpush3.bf16.msra.mxu1 %v677_v12  ;;  %597 = vmatprep.subr.bf16.mxu0 %v678_v13 }
  0x16   : > { %628 = vmatprep.subr.bf16.mxu1 %v715_v2  ;;  %v196_v28 = vrot.slane %v194_v26, 1 }
  0x18   : > { %598 = vmatpush3.bf16.msra.mxu0 %v679_v14  ;;  %v197_v30 = vor.u32 %v196_v28, %v192_v25 }
  0x19   : > { %629 = vmatpush3.bf16.msra.mxu1 %v680_v15  ;;  %599 = vmatprep.subr.bf16.mxu0 %v681_v16 }
  0x1a   : > { %630 = vmatprep.subr.bf16.mxu1 %v715_v2  ;;  %432 = vmatprep.mubr.bf16.mxu0 %v197_v30 }
  0x1c   : > { %600 = vmatpush3.bf16.msra.mxu0 %v682_v17 }
  0x1d   : > { %631 = vmatpush3.bf16.msra.mxu1 %v683_v18  ;;  %601 = vmatprep.subr.bf16.mxu0 %v684_v19 }
  0x1e   : > { %632 = vmatprep.subr.bf16.mxu1 %v715_v2 }
  0x20   : > { %602 = vmatpush3.bf16.msra.mxu0 %v685_v20 }
  0x21   : > { %633 = vmatpush3.bf16.msra.mxu1 %v686_v22  ;;  %603 = vmatprep.subr.bf16.mxu0 %v687_v23 }
  0x22   : > { %634 = vmatprep.subr.bf16.mxu1 %v715_v2 }
  0x24   : > { %604 = vmatpush3.bf16.msra.mxu0 %v688_v27 }
  0x25   : > { %635 = vmatpush3.bf16.msra.mxu1 %v690_v29 }
  0x27   : > { %433 = vmatmul.mubr.bf16.vlgmr.msra.gmra.mrb[0].mxu0 %v187_v21 }
  0x28   : > { %637 = vmatmul.mubr.bf16.vlgmr.msra.gmra.mrb[0].mxu1 %v199_v31 }
  0xfa   : > { %v605_v32 = vpop.f32.mrb[0].mxu0 }
  0xfb   : > { %v606_v33 = vpop.f32.mrb[1].mxu0  ;;  %v474_v35 = vpop.f32.mrb[0].mxu1 }
  0xfc   : > { %v607_v36 = vadd.f32 %v606_v33, %v605_v32  ;;  %v608_v37 = vpop.f32.mrb[2].mxu0  ;;  %v638_v38 = vpop.f32.mrb[1].mxu1 }
  0xfd   : > { %v609_v39 = vpop.f32.mrb[3].mxu0  ;;  %v477_v40 = vpop.f32.mrb[2].mxu1 }
  0xfe   : > { %v435_v41 = vadd.f32 %v607_v36, %v562_v34  ;;  %v639_v42 = vpop.f32.mrb[3].mxu1 }
 0x100   : > { %v475_v43 = vadd.f32 %v474_v35, %v435_v41 }
 0x102   : > { %v480_v44 = vmax.f32 %v475_v43, 0.0 }
 0x104   : > { %v481_v45 = vpack.c.bf16 %v480_v44, %v480_v44 }
 0x106   : > { %482 = vst [vmem:[%s185_s27] sm:$0x3] %v481_v45 }
 0x107 PF: > { %s13_s14 = sadd.s32 1, %s713_s14   ;;  %s857_s12 = smov %s709_s13 }
 0x108   : > { %p10_p5 = scmp.ge.s32.totalorder %s13_s14, 4   ;;  %s858_s13 = smov %s860_s15 }
 0x10a   :  { %12 = sbr.rel (!%p10_p5) target bundleno = 2 (0x2), region = 62 }

// kernel: forward.30
= control target key start
LH: loop header
LB: loop body
LE: loop exit
PB: predicated region body
PF: predicated region fallthrough
CT: control target
= control target key end

     0   :  { %s893_s12 = smov 0   ;;  %s895_s13 = smov 0   ;;  %s1084_s0 = inlined_call_operand.vmem [shape: bf16[2,6,128], index: 0, kind: input, shape index: {}]   ;;  %s1085_s1 = inlined_call_operand.vmem [shape: bf16[384,256], index: 1, kind: input, shape index: {}]   ;;  %s1086_s2 = inlined_call_operand.vmem [shape: f32[1,256], index: 2, kind: input, shape index: {}]   ;;  %s1087_s3 = inlined_call_operand.vmem [shape: bf16[2,4,256], index: 3, kind: output, shape index: {}]  }
   0x1   :  { %s897_s14 = smov 0  }
   0x2 LB: > { %s25_s15 = sadd.s32 1, %s866_s13  ;;  %p688_p0 = scmp.ge.s32.totalorder %s870_s14, 1  ;;  %s870_s14 = sphi %s897_s14, %s13_s14   ;;  %s866_s13 = sphi %s895_s13, %s1089_s13   ;;  %s862_s12 = sphi %s893_s12, %s1088_s12  }
   0x3   : > { %p27_p1 = scmp.ge.s32.totalorder %s25_s15, 2  ;;  %p150_p2 = scmp.lt.s32.totalorder %s870_s14, 3 }
   0x5   : > { %s1091_s15 = smov (%p27_p1, %s25_s15), 0  ;;  %p151_p3 = pnand %p688_p0, %p150_p2 }
   0x6   : > { %v775_v0 = vld [vmem:[%s1085_s1 + $0x4] ss:$8 sps:$4 sm:$0xff] (!%p151_p3)   ;;  %v777_v1 = vld [vmem:[%s1085_s1] ss:$8 sps:$4 sm:$0xff] (!%p151_p3)   ;;  %v872_v2 = vmov (!%p151_p3), 0   ;;  %p177_p4 = scmp.lt.s32.totalorder (!%p151_p3), %s862_s12, 1  ;;  %v255_v60 = vlaneseq (!%p151_p3) }
   0x7   : > { %154 = sbr.rel (%p151_p3) target bundleno = 291 (0x123), region = 32  ;;  %578 = vmatprep.mubr.bf16.mxu0 (!%p151_p3), %v872_v2  ;;  %505 = vmatprep.subr.bf16.mxu1 (!%p151_p3), %v775_v0  ;;  %v778_v3 = vld [vmem:[%s1085_s1 + $0x14] ss:$8 sps:$4 sm:$0xff] (!%p151_p3)   ;;  %v780_v4 = vld [vmem:[%s1085_s1 + $0x10] ss:$8 sps:$4 sm:$0xff] (!%p151_p3)  }
   0x8   : > { %506 = vmatpush1.bf16.msra.mxu1 (!%p151_p3), %v777_v1  ;;  %v781_v5 = vld [vmem:[%s1085_s1 + $0x24] ss:$8 sps:$4 sm:$0xff] (!%p151_p3)   ;;  %v783_v6 = vld [vmem:[%s1085_s1 + $0x20] ss:$8 sps:$4 sm:$0xff] (!%p151_p3)   ;;  %v784_v7 = vld [vmem:[%s1085_s1 + $0x34] ss:$8 sps:$4 sm:$0xff] (!%p151_p3)  }
   0x9   : > { %507 = vmatprep.subr.bf16.mxu1 (!%p151_p3), %v778_v3  ;;  %v786_v8 = vld [vmem:[%s1085_s1 + $0x30] ss:$8 sps:$4 sm:$0xff] (!%p151_p3)   ;;  %v799_v9 = vld [vmem:[%s1085_s1 + $0x104] ss:$8 sps:$4 sm:$0xff] (!%p151_p3)   ;;  %v803_v11 = vld [vmem:[%s1085_s1 + $0x100] ss:$8 sps:$4 sm:$0xff] (!%p151_p3)  }
   0xa   : > { %v787_v10 = vld [vmem:[%s1085_s1 + $0x44] ss:$8 sps:$4 sm:$0xff] (!%p151_p3)   ;;  %546 = vmatprep.subr.bf16.mxu0 (!%p151_p3), %v799_v9  ;;  %v805_v12 = vld [vmem:[%s1085_s1 + $0x114] ss:$8 sps:$4 sm:$0xff] (!%p151_p3)   ;;  %v789_v13 = vld [vmem:[%s1085_s1 + $0x40] ss:$8 sps:$4 sm:$0xff] (!%p151_p3)  }
   0xb   : > { %547 = vmatpush1.bf16.msra.mxu0 (!%p151_p3), %v803_v11  ;;  %v790_v14 = vld [vmem:[%s1085_s1 + $0x54] ss:$8 sps:$4 sm:$0xff] (!%p151_p3)   ;;  %v809_v15 = vld [vmem:[%s1085_s1 + $0x110] ss:$8 sps:$4 sm:$0xff] (!%p151_p3)   ;;  %v811_v16 = vld [vmem:[%s1085_s1 + $0x124] ss:$8 sps:$4 sm:$0xff] (!%p151_p3)  }
   0xc   : > { %508 = vmatpush1.bf16.msra.mxu1 (!%p151_p3), %v780_v4  ;;  %548 = vmatprep.subr.bf16.mxu0 (!%p151_p3), %v805_v12  ;;  %v792_v17 = vld [vmem:[%s1085_s1 + $0x50] ss:$8 sps:$4 sm:$0xff] (!%p151_p3)   ;;  %v815_v18 = vld [vmem:[%s1085_s1 + $0x120] ss:$8 sps:$4 sm:$0xff] (!%p151_p3)   ;;  %v817_v19 = vld [vmem:[%s1085_s1 + $0x134] ss:$8 sps:$4 sm:$0xff] (!%p151_p3)  }
   0xd   : > { %509 = vmatprep.subr.bf16.mxu1 (!%p151_p3), %v781_v5  ;;  %v793_v20 = vld [vmem:[%s1085_s1 + $0x64] ss:$8 sps:$4 sm:$0xff] (!%p151_p3)   ;;  %v821_v21 = vld [vmem:[%s1085_s1 + $0x130] ss:$8 sps:$4 sm:$0xff] (!%p151_p3)   ;;  %v795_v22 = vld [vmem:[%s1085_s1 + $0x60] ss:$8 sps:$4 sm:$0xff] (!%p151_p3)  }
   0xe   : > { %s1093_s12 = smov (!%p177_p4, %s862_s12), 1  ;;  %v823_v23 = vld [vmem:[%s1085_s1 + $0x144] ss:$8 sps:$4 sm:$0xff]   ;;  %v796_v24 = vld [vmem:[%s1085_s1 + $0x74] ss:$8 sps:$4 sm:$0xff]   ;;  %v256_v61 = vshrl.u32 %v255_v60, 7 }
   0xf   : > { %549 = vmatpush1.bf16.msra.mxu0 %v809_v15  ;;  %v798_v25 = vld [vmem:[%s1085_s1 + $0x70] ss:$8 sps:$4 sm:$0xff]   ;;  %v827_v26 = vld [vmem:[%s1085_s1 + $0x140] ss:$8 sps:$4 sm:$0xff]   ;;  %s689_s22 = sshll.u32 %s1093_s12, 2 }
  0x10   : > { %510 = vmatpush1.bf16.msra.mxu1 %v783_v6  ;;  %550 = vmatprep.subr.bf16.mxu0 %v811_v16  ;;  %v829_v27 = vld [vmem:[%s1085_s1 + $0x154] ss:$8 sps:$4 sm:$0xff]   ;;  %v801_v28 = vld [vmem:[%s1085_s1 + $0x84] ss:$8 sps:$4 sm:$0xff]   ;;  %s180_s29 = scalar_lea.vmem %s1084_s0, %s689_s22  ;;  %v833_v29 = vld [vmem:[%s1085_s1 + $0x150] ss:$8 sps:$4 sm:$0xff]   ;;  %s189_s30 = scalar_lea.vmem %s1087_s3, %s689_s22 }
  0x11   : > { %511 = vmatprep.subr.bf16.mxu1 %v784_v7  ;;  %v804_v30 = vld [vmem:[%s1085_s1 + $0x80] ss:$8 sps:$4 sm:$0xff]   ;;  %v835_v31 = vld [vmem:[%s1085_s1 + $0x164] ss:$8 sps:$4 sm:$0xff]   ;;  %v807_v32 = vld [vmem:[%s1085_s1 + $0x94] ss:$8 sps:$4 sm:$0xff]  }
  0x12   : > { %v191_v33 = vld [vmem:[%s180_s29] sm:$0x7]  ;;  %v810_v36 = vld [vmem:[%s1085_s1 + $0x90] ss:$8 sps:$4 sm:$0xff]   ;;  %v841_v37 = vld [vmem:[%s1085_s1 + $0x174] ss:$8 sps:$4 sm:$0xff]  }
  0x13   : > { %551 = vmatpush1.bf16.msra.mxu0 %v815_v18  ;;  %v692_v34 = vcombine.low %v191_v33, %v191_v33  ;;  %v839_v35 = vld [vmem:[%s1085_s1 + $0x160] ss:$8 sps:$4 sm:$0xff]   ;;  %v813_v40 = vld [vmem:[%s1085_s1 + $0xa4] ss:$8 sps:$4 sm:$0xff]   ;;  %v845_v42 = vld [vmem:[%s1085_s1 + $0x170] ss:$8 sps:$4 sm:$0xff]  }
  0x14   : > { %512 = vmatpush1.bf16.msra.mxu1 %v786_v8  ;;  %552 = vmatprep.subr.bf16.mxu0 %v817_v19  ;;  %v816_v43 = vld [vmem:[%s1085_s1 + $0xa0] ss:$8 sps:$4 sm:$0xff]   ;;  %v819_v45 = vld [vmem:[%s1085_s1 + $0xb4] ss:$8 sps:$4 sm:$0xff]   ;;  %v822_v47 = vld [vmem:[%s1085_s1 + $0xb0] ss:$8 sps:$4 sm:$0xff]  }
  0x15   : > { %513 = vmatprep.subr.bf16.mxu1 %v787_v10  ;;  %v196_v38 = vshrl.u32 %v692_v34, 16  ;;  %v198_v39 = vshll.u32 %v692_v34, 16  ;;  %v203_v46 = vrot.slane %v692_v34, 1  ;;  %v825_v48 = vld [vmem:[%s1085_s1 + $0xc4] ss:$8 sps:$4 sm:$0xff]   ;;  %v257_v62 = vsub.s32 0, %v256_v61 }
  0x16   : > { %v828_v49 = vld [vmem:[%s1085_s1 + $0xc0] ss:$8 sps:$4 sm:$0xff]   ;;  %v831_v50 = vld [vmem:[%s1085_s1 + $0xd4] ss:$8 sps:$4 sm:$0xff]   ;;  %v834_v51 = vld [vmem:[%s1085_s1 + $0xd0] ss:$8 sps:$4 sm:$0xff]  }
  0x17   : > { %553 = vmatpush1.bf16.msra.mxu0 %v821_v21  ;;  %v200_v41 = vrot.slane %v198_v39, 1  ;;  %v837_v52 = vld [vmem:[%s1085_s1 + $0xe4] ss:$8 sps:$4 sm:$0xff]   ;;  %v840_v53 = vld [vmem:[%s1085_s1 + $0xe0] ss:$8 sps:$4 sm:$0xff]   ;;  %v261_v0 = vsub.s32 1, %v256_v61 }
  0x18   : > { %514 = vmatpush1.bf16.msra.mxu1 %v789_v13  ;;  %554 = vmatprep.subr.bf16.mxu0 %v823_v23  ;;  %v843_v54 = vld [vmem:[%s1085_s1 + $0xf4] ss:$8 sps:$4 sm:$0xff]   ;;  %v846_v55 = vld [vmem:[%s1085_s1 + $0xf0] ss:$8 sps:$4 sm:$0xff]   ;;  %v253_v63 = vld [vmem:[%s1086_s2] sm:$0x3] }
  0x19   : > { %515 = vmatprep.subr.bf16.mxu1 %v790_v14  ;;  %v201_v44 = vor.u32 %v200_v41, %v196_v38  ;;  %v258_v1 = vrot.slane %v253_v63, %v257_v62  ;;  %v262_v2 = vrot.slane %v253_v63, %v261_v0 }
  0x1b   : > { %555 = vmatpush1.bf16.msra.mxu0 %v827_v26  ;;  %537 = vmatprep.mubr.bf16.mxu1 %v201_v44 }
  0x1c   : > { %516 = vmatpush1.bf16.msra.mxu1 %v792_v17  ;;  %556 = vmatprep.subr.bf16.mxu0 %v829_v27 }
  0x1d   : > { %517 = vmatprep.subr.bf16.mxu1 %v793_v20 }
  0x1f   : > { %557 = vmatpush1.bf16.msra.mxu0 %v833_v29 }
  0x20   : > { %518 = vmatpush1.bf16.msra.mxu1 %v795_v22  ;;  %558 = vmatprep.subr.bf16.mxu0 %v835_v31 }
  0x21   : > { %519 = vmatprep.subr.bf16.mxu1 %v796_v24 }
  0x23   : > { %559 = vmatpush1.bf16.msra.mxu0 %v839_v35 }
  0x24   : > { %520 = vmatpush1.bf16.msra.mxu1 %v798_v25  ;;  %560 = vmatprep.subr.bf16.mxu0 %v841_v37 }
  0x25   : > { %521 = vmatprep.subr.bf16.mxu1 %v801_v28 }
  0x27   : > { %561 = vmatpush1.bf16.msra.mxu0 %v845_v42 }
  0x28   : > { %522 = vmatpush1.bf16.msra.mxu1 %v804_v30 }
  0x29   : > { %523 = vmatprep.subr.bf16.mxu1 %v807_v32 }
  0x2a   : > { %579 = vmatmul.mubr.bf16.vlgmr.msra.gmra.mrb[0].mxu0 %v203_v46 }
  0x2c   : > { %524 = vmatpush1.bf16.msra.mxu1 %v810_v36 }
  0x2d   : > { %525 = vmatprep.subr.bf16.mxu1 %v813_v40 }
  0x30   : > { %526 = vmatpush1.bf16.msra.mxu1 %v816_v43 }
  0x31   : > { %527 = vmatprep.subr.bf16.mxu1 %v819_v45 }
  0x34   : > { %528 = vmatpush1.bf16.msra.mxu1 %v822_v47 }
  0x35   : > { %529 = vmatprep.subr.bf16.mxu1 %v825_v48 }
  0x38   : > { %530 = vmatpush1.bf16.msra.mxu1 %v828_v49 }
  0x39   : > { %531 = vmatprep.subr.bf16.mxu1 %v831_v50 }
  0x3c   : > { %532 = vmatpush1.bf16.msra.mxu1 %v834_v51 }
  0x3d   : > { %533 = vmatprep.subr.bf16.mxu1 %v837_v52 }
  0x40   : > { %534 = vmatpush1.bf16.msra.mxu1 %v840_v53 }
  0x41   : > { %535 = vmatprep.subr.bf16.mxu1 %v843_v54 }
  0x44   : > { %536 = vmatpush1.bf16.msra.mxu1 %v846_v55 }
  0x47   : > { %538 = vmatmul.mubr.bf16.vlgmr.msra.gmra.mrb[0].mxu1 %v191_v33 }
  0xfd   : > { %v580_v56 = vpop.f32.mrb[0].mxu0 }
  0xfe   : > { %v582_v57 = vpop.f32.mrb[1].mxu0 }
  0xff   : > { %v584_v58 = vpop.f32.mrb[2].mxu0 }
 0x100   : > { %v585_v59 = vpop.f32.mrb[3].mxu0 }
 0x11a   : > { %v539_v3 = vpop.f32.mrb[0].mxu1 }
 0x11b   : > { %v540_v4 = vadd.f32 %v539_v3, %v258_v1  ;;  %v541_v5 = vpop.f32.mrb[1].mxu1 }
 0x11c   : > { %v542_v6 = vadd.f32 %v541_v5, %v262_v2  ;;  %v543_v7 = vpop.f32.mrb[2].mxu1 }
 0x11d   : > { %v581_v8 = vadd.f32 %v580_v56, %v540_v4  ;;  %v544_v9 = vpop.f32.mrb[3].mxu1 }
 0x11e   : > { %v583_v10 = vadd.f32 %v582_v57, %v542_v6 }
 0x120   : > { %v741_v11 = vpack.c.bf16 %v583_v10, %v581_v8 }
 0x122   : > { %742 = vst.sshfl [vmem:[%s189_s30] sm:$0x33 pattern:$0x76325410] %v741_v11 }
 0x123 PF: > { %s13_s14 = sadd.s32 1, %s870_s14   ;;  %s1088_s12 = smov %s866_s13 }
 0x124   : > { %p10_p5 = scmp.ge.s32.totalorder %s13_s14, 4   ;;  %s1089_s13 = smov %s1091_s15 }
 0x126   :  { %12 = sbr.rel (!%p10_p5) target bundleno = 2 (0x2), region = 62 }

// kernel: forward.33
= control target key start
LH: loop header
LB: loop body
LE: loop exit
PB: predicated region body
PF: predicated region fallthrough
CT: control target
= control target key end

     0   :  { %s896_s12 = smov 0   ;;  %s898_s13 = smov 0   ;;  %s1087_s0 = inlined_call_operand.vmem [shape: bf16[2,10,128], index: 0, kind: input, shape index: {}]   ;;  %s1088_s1 = inlined_call_operand.vmem [shape: bf16[384,256], index: 1, kind: input, shape index: {}]   ;;  %s1089_s2 = inlined_call_operand.vmem [shape: f32[1,256], index: 2, kind: input, shape index: {}]   ;;  %s1090_s3 = inlined_call_operand.vmem [shape: bf16[2,8,256], index: 3, kind: output, shape index: {}]  }
   0x1   :  { %s900_s14 = smov 0  }
   0x2 LB: > { %s25_s15 = sadd.s32 1, %s869_s13  ;;  %p689_p0 = scmp.ge.s32.totalorder %s873_s14, 1  ;;  %s873_s14 = sphi %s900_s14, %s13_s14   ;;  %s869_s13 = sphi %s898_s13, %s1092_s13   ;;  %s865_s12 = sphi %s896_s12, %s1091_s12  }
   0x3   : > { %p27_p1 = scmp.ge.s32.totalorder %s25_s15, 2  ;;  %p151_p2 = scmp.lt.s32.totalorder %s873_s14, 3 }
   0x5   : > { %s1094_s15 = smov (%p27_p1, %s25_s15), 0  ;;  %p152_p3 = pnand %p689_p0, %p151_p2 }
   0x6   : > { %v778_v0 = vld [vmem:[%s1088_s1 + $0x4] ss:$8 sps:$4 sm:$0xff] (!%p152_p3)   ;;  %v780_v1 = vld [vmem:[%s1088_s1] ss:$8 sps:$4 sm:$0xff] (!%p152_p3)   ;;  %v875_v2 = vmov (!%p152_p3), 0   ;;  %p179_p4 = scmp.lt.s32.totalorder (!%p152_p3), %s865_s12, 1  ;;  %v261_v61 = vlaneseq (!%p152_p3) }
   0x7   : > { %155 = sbr.rel (%p152_p3) target bundleno = 291 (0x123), region = 32  ;;  %584 = vmatprep.mubr.bf16.mxu0 (!%p152_p3), %v875_v2  ;;  %511 = vmatprep.subr.bf16.mxu1 (!%p152_p3), %v778_v0  ;;  %v781_v3 = vld [vmem:[%s1088_s1 + $0x14] ss:$8 sps:$4 sm:$0xff] (!%p152_p3)   ;;  %v783_v4 = vld [vmem:[%s1088_s1 + $0x10] ss:$8 sps:$4 sm:$0xff] (!%p152_p3)  }
   0x8   : > { %512 = vmatpush1.bf16.msra.mxu1 (!%p152_p3), %v780_v1  ;;  %v784_v5 = vld [vmem:[%s1088_s1 + $0x24] ss:$8 sps:$4 sm:$0xff] (!%p152_p3)   ;;  %v786_v6 = vld [vmem:[%s1088_s1 + $0x20] ss:$8 sps:$4 sm:$0xff] (!%p152_p3)   ;;  %v787_v7 = vld [vmem:[%s1088_s1 + $0x34] ss:$8 sps:$4 sm:$0xff] (!%p152_p3)  }
   0x9   : > { %513 = vmatprep.subr.bf16.mxu1 (!%p152_p3), %v781_v3  ;;  %v789_v8 = vld [vmem:[%s1088_s1 + $0x30] ss:$8 sps:$4 sm:$0xff] (!%p152_p3)   ;;  %v802_v9 = vld [vmem:[%s1088_s1 + $0x104] ss:$8 sps:$4 sm:$0xff] (!%p152_p3)   ;;  %v806_v11 = vld [vmem:[%s1088_s1 + $0x100] ss:$8 sps:$4 sm:$0xff] (!%p152_p3)  }
   0xa   : > { %v790_v10 = vld [vmem:[%s1088_s1 + $0x44] ss:$8 sps:$4 sm:$0xff] (!%p152_p3)   ;;  %552 = vmatprep.subr.bf16.mxu0 (!%p152_p3), %v802_v9  ;;  %v808_v12 = vld [vmem:[%s1088_s1 + $0x114] ss:$8 sps:$4 sm:$0xff] (!%p152_p3)   ;;  %v792_v13 = vld [vmem:[%s1088_s1 + $0x40] ss:$8 sps:$4 sm:$0xff] (!%p152_p3)  }
   0xb   : > { %553 = vmatpush1.bf16.msra.mxu0 (!%p152_p3), %v806_v11  ;;  %v793_v14 = vld [vmem:[%s1088_s1 + $0x54] ss:$8 sps:$4 sm:$0xff] (!%p152_p3)   ;;  %v812_v15 = vld [vmem:[%s1088_s1 + $0x110] ss:$8 sps:$4 sm:$0xff] (!%p152_p3)   ;;  %v814_v16 = vld [vmem:[%s1088_s1 + $0x124] ss:$8 sps:$4 sm:$0xff] (!%p152_p3)  }
   0xc   : > { %514 = vmatpush1.bf16.msra.mxu1 (!%p152_p3), %v783_v4  ;;  %554 = vmatprep.subr.bf16.mxu0 (!%p152_p3), %v808_v12  ;;  %v795_v17 = vld [vmem:[%s1088_s1 + $0x50] ss:$8 sps:$4 sm:$0xff] (!%p152_p3)   ;;  %v818_v18 = vld [vmem:[%s1088_s1 + $0x120] ss:$8 sps:$4 sm:$0xff] (!%p152_p3)   ;;  %v820_v19 = vld [vmem:[%s1088_s1 + $0x134] ss:$8 sps:$4 sm:$0xff] (!%p152_p3)  }
   0xd   : > { %515 = vmatprep.subr.bf16.mxu1 (!%p152_p3), %v784_v5  ;;  %v796_v20 = vld [vmem:[%s1088_s1 + $0x64] ss:$8 sps:$4 sm:$0xff] (!%p152_p3)   ;;  %v824_v21 = vld [vmem:[%s1088_s1 + $0x130] ss:$8 sps:$4 sm:$0xff] (!%p152_p3)   ;;  %v798_v22 = vld [vmem:[%s1088_s1 + $0x60] ss:$8 sps:$4 sm:$0xff] (!%p152_p3)  }
   0xe   : > { %s1096_s12 = smov (!%p179_p4, %s865_s12), 1  ;;  %v826_v23 = vld [vmem:[%s1088_s1 + $0x144] ss:$8 sps:$4 sm:$0xff]   ;;  %v799_v24 = vld [vmem:[%s1088_s1 + $0x74] ss:$8 sps:$4 sm:$0xff]   ;;  %v262_v62 = vshrl.u32 %v261_v61, 7 }
   0xf   : > { %555 = vmatpush1.bf16.msra.mxu0 %v812_v15  ;;  %v801_v25 = vld [vmem:[%s1088_s1 + $0x70] ss:$8 sps:$4 sm:$0xff]   ;;  %v830_v26 = vld [vmem:[%s1088_s1 + $0x140] ss:$8 sps:$4 sm:$0xff]   ;;  %s746_s22 = sshll.u32 %s1096_s12, 3 }
  0x10   : > { %516 = vmatpush1.bf16.msra.mxu1 %v786_v6  ;;  %556 = vmatprep.subr.bf16.mxu0 %v814_v16  ;;  %v832_v27 = vld [vmem:[%s1088_s1 + $0x154] ss:$8 sps:$4 sm:$0xff]   ;;  %v804_v28 = vld [vmem:[%s1088_s1 + $0x84] ss:$8 sps:$4 sm:$0xff]   ;;  %s183_s29 = scalar_lea.vmem %s1087_s0, %s746_s22  ;;  %v836_v29 = vld [vmem:[%s1088_s1 + $0x150] ss:$8 sps:$4 sm:$0xff]   ;;  %s192_s30 = scalar_lea.vmem %s1090_s3, %s746_s22 }
  0x11   : > { %517 = vmatprep.subr.bf16.mxu1 %v787_v7  ;;  %v807_v30 = vld [vmem:[%s1088_s1 + $0x80] ss:$8 sps:$4 sm:$0xff]   ;;  %v838_v31 = vld [vmem:[%s1088_s1 + $0x164] ss:$8 sps:$4 sm:$0xff]   ;;  %v810_v32 = vld [vmem:[%s1088_s1 + $0x94] ss:$8 sps:$4 sm:$0xff]  }
  0x12   : > { %v194_v33 = vld [vmem:[%s183_s29] sm:$0xf]  ;;  %v195_v34 = vld [vmem:[%s183_s29 + $0x4] sm:$0x1]  ;;  %v813_v37 = vld [vmem:[%s1088_s1 + $0x90] ss:$8 sps:$4 sm:$0xff]  }
  0x13   : > { %557 = vmatpush1.bf16.msra.mxu0 %v818_v18  ;;  %v694_v35 = vcombine.low %v194_v33, %v195_v34  ;;  %v842_v36 = vld [vmem:[%s1088_s1 + $0x160] ss:$8 sps:$4 sm:$0xff]   ;;  %v844_v38 = vld [vmem:[%s1088_s1 + $0x174] ss:$8 sps:$4 sm:$0xff]   ;;  %v816_v41 = vld [vmem:[%s1088_s1 + $0xa4] ss:$8 sps:$4 sm:$0xff]  }
  0x14   : > { %518 = vmatpush1.bf16.msra.mxu1 %v789_v8  ;;  %558 = vmatprep.subr.bf16.mxu0 %v820_v19  ;;  %v848_v43 = vld [vmem:[%s1088_s1 + $0x170] ss:$8 sps:$4 sm:$0xff]   ;;  %v819_v44 = vld [vmem:[%s1088_s1 + $0xa0] ss:$8 sps:$4 sm:$0xff]   ;;  %v822_v46 = vld [vmem:[%s1088_s1 + $0xb4] ss:$8 sps:$4 sm:$0xff]  }
  0x15   : > { %519 = vmatprep.subr.bf16.mxu1 %v790_v10  ;;  %v202_v39 = vshrl.u32 %v694_v35, 16  ;;  %v204_v40 = vshll.u32 %v694_v35, 16  ;;  %v209_v47 = vrot.slane %v694_v35, 1  ;;  %v825_v48 = vld [vmem:[%s1088_s1 + $0xb0] ss:$8 sps:$4 sm:$0xff]   ;;  %v263_v63 = vsub.s32 0, %v262_v62 }
  0x16   : > { %v828_v49 = vld [vmem:[%s1088_s1 + $0xc4] ss:$8 sps:$4 sm:$0xff]   ;;  %v831_v50 = vld [vmem:[%s1088_s1 + $0xc0] ss:$8 sps:$4 sm:$0xff]   ;;  %v834_v51 = vld [vmem:[%s1088_s1 + $0xd4] ss:$8 sps:$4 sm:$0xff]  }
  0x17   : > { %559 = vmatpush1.bf16.msra.mxu0 %v824_v21  ;;  %v206_v42 = vrot.slane %v204_v40, 1  ;;  %v837_v52 = vld [vmem:[%s1088_s1 + $0xd0] ss:$8 sps:$4 sm:$0xff]   ;;  %v840_v53 = vld [vmem:[%s1088_s1 + $0xe4] ss:$8 sps:$4 sm:$0xff]   ;;  %v267_v1 = vsub.s32 1, %v262_v62 }
  0x18   : > { %520 = vmatpush1.bf16.msra.mxu1 %v792_v13  ;;  %560 = vmatprep.subr.bf16.mxu0 %v826_v23  ;;  %v843_v54 = vld [vmem:[%s1088_s1 + $0xe0] ss:$8 sps:$4 sm:$0xff]   ;;  %v846_v55 = vld [vmem:[%s1088_s1 + $0xf4] ss:$8 sps:$4 sm:$0xff]   ;;  %v849_v56 = vld [vmem:[%s1088_s1 + $0xf0] ss:$8 sps:$4 sm:$0xff]  }
  0x19   : > { %521 = vmatprep.subr.bf16.mxu1 %v793_v14  ;;  %v207_v45 = vor.u32 %v206_v42, %v202_v39  ;;  %v259_v0 = vld [vmem:[%s1089_s2] sm:$0x3] }
  0x1a   : > { %v264_v2 = vrot.slane %v259_v0, %v263_v63  ;;  %v268_v3 = vrot.slane %v259_v0, %v267_v1 }
  0x1b   : > { %561 = vmatpush1.bf16.msra.mxu0 %v830_v26  ;;  %543 = vmatprep.mubr.bf16.mxu1 %v207_v45 }
  0x1c   : > { %522 = vmatpush1.bf16.msra.mxu1 %v795_v17  ;;  %562 = vmatprep.subr.bf16.mxu0 %v832_v27 }
  0x1d   : > { %523 = vmatprep.subr.bf16.mxu1 %v796_v20 }
  0x1f   : > { %563 = vmatpush1.bf16.msra.mxu0 %v836_v29 }
  0x20   : > { %524 = vmatpush1.bf16.msra.mxu1 %v798_v22  ;;  %564 = vmatprep.subr.bf16.mxu0 %v838_v31 }
  0x21   : > { %525 = vmatprep.subr.bf16.mxu1 %v799_v24 }
  0x23   : > { %565 = vmatpush1.bf16.msra.mxu0 %v842_v36 }
  0x24   : > { %526 = vmatpush1.bf16.msra.mxu1 %v801_v25  ;;  %566 = vmatprep.subr.bf16.mxu0 %v844_v38 }
  0x25   : > { %527 = vmatprep.subr.bf16.mxu1 %v804_v28 }
  0x27   : > { %567 = vmatpush1.bf16.msra.mxu0 %v848_v43 }
  0x28   : > { %528 = vmatpush1.bf16.msra.mxu1 %v807_v30 }
  0x29   : > { %529 = vmatprep.subr.bf16.mxu1 %v810_v32 }
  0x2a   : > { %585 = vmatmul.mubr.bf16.vlgmr.msra.gmra.mrb[0].mxu0 %v209_v47 }
  0x2c   : > { %530 = vmatpush1.bf16.msra.mxu1 %v813_v37 }
  0x2d   : > { %531 = vmatprep.subr.bf16.mxu1 %v816_v41 }
  0x30   : > { %532 = vmatpush1.bf16.msra.mxu1 %v819_v44 }
  0x31   : > { %533 = vmatprep.subr.bf16.mxu1 %v822_v46 }
  0x34   : > { %534 = vmatpush1.bf16.msra.mxu1 %v825_v48 }
  0x35   : > { %535 = vmatprep.subr.bf16.mxu1 %v828_v49 }
  0x38   : > { %536 = vmatpush1.bf16.msra.mxu1 %v831_v50 }
  0x39   : > { %537 = vmatprep.subr.bf16.mxu1 %v834_v51 }
  0x3c   : > { %538 = vmatpush1.bf16.msra.mxu1 %v837_v52 }
  0x3d   : > { %539 = vmatprep.subr.bf16.mxu1 %v840_v53 }
  0x40   : > { %540 = vmatpush1.bf16.msra.mxu1 %v843_v54 }
  0x41   : > { %541 = vmatprep.subr.bf16.mxu1 %v846_v55 }
  0x44   : > { %542 = vmatpush1.bf16.msra.mxu1 %v849_v56 }
  0x47   : > { %544 = vmatmul.mubr.bf16.vlgmr.msra.gmra.mrb[0].mxu1 %v194_v33 }
  0xfd   : > { %v586_v57 = vpop.f32.mrb[0].mxu0 }
  0xfe   : > { %v588_v58 = vpop.f32.mrb[1].mxu0 }
  0xff   : > { %v590_v59 = vpop.f32.mrb[2].mxu0 }
 0x100   : > { %v591_v60 = vpop.f32.mrb[3].mxu0 }
 0x11a   : > { %v545_v4 = vpop.f32.mrb[0].mxu1 }
 0x11b   : > { %v546_v5 = vadd.f32 %v545_v4, %v264_v2  ;;  %v547_v6 = vpop.f32.mrb[1].mxu1 }
 0x11c   : > { %v548_v7 = vadd.f32 %v547_v6, %v268_v3  ;;  %v549_v8 = vpop.f32.mrb[2].mxu1 }
 0x11d   : > { %v587_v9 = vadd.f32 %v586_v57, %v546_v5  ;;  %v550_v10 = vpop.f32.mrb[3].mxu1 }
 0x11e   : > { %v589_v11 = vadd.f32 %v588_v58, %v548_v7 }
 0x120   : > { %v748_v12 = vpack.c.bf16 %v589_v11, %v587_v9 }
 0x122   : > { %601 = vst [vmem:[%s192_s30] sm:$0xff] %v748_v12 }
 0x123 PF: > { %s13_s14 = sadd.s32 1, %s873_s14   ;;  %s1091_s12 = smov %s869_s13 }
 0x124   : > { %p10_p5 = scmp.ge.s32.totalorder %s13_s14, 4   ;;  %s1092_s13 = smov %s1094_s15 }
 0x126   :  { %12 = sbr.rel (!%p10_p5) target bundleno = 2 (0x2), region = 62 }

// kernel: forward.35
= control target key start
LH: loop header
LB: loop body
LE: loop exit
PB: predicated region body
PF: predicated region fallthrough
CT: control target
= control target key end

     0   :  { %s778_s12 = smov 0   ;;  %s780_s13 = smov 0   ;;  %s903_s0 = inlined_call_operand.vmem [shape: bf16[2,18,128], index: 0, kind: input, shape index: {}]   ;;  %s904_s1 = inlined_call_operand.vmem [shape: bf16[384,128], index: 1, kind: input, shape index: {}]   ;;  %s905_s2 = inlined_call_operand.vmem [shape: f32[1,128], index: 2, kind: input, shape index: {}]   ;;  %s906_s3 = inlined_call_operand.vmem [shape: f32[2,16,128], index: 3, kind: output, shape index: {}]  }
   0x1   :  { %s782_s14 = smov 0  }
   0x2 LB: > { %s25_s15 = sadd.s32 1, %s750_s13  ;;  %p594_p0 = scmp.ge.s32.totalorder %s754_s14, 1  ;;  %s754_s14 = sphi %s782_s14, %s13_s14   ;;  %s750_s13 = sphi %s780_s13, %s908_s13   ;;  %s746_s12 = sphi %s778_s12, %s907_s12  }
   0x3   : > { %p27_p1 = scmp.ge.s32.totalorder %s25_s15, 2  ;;  %p151_p2 = scmp.lt.s32.totalorder %s754_s14, 3 }
   0x5   : > { %s910_s15 = smov (%p27_p1, %s25_s15), 0  ;;  %p152_p3 = pnand %p594_p0, %p151_p2 }
   0x6   : > { %v706_v0 = vld [vmem:[%s904_s1 + $0x40] sm:$0xff] (!%p152_p3)   ;;  %v756_v2 = vmov (!%p152_p3), 0.0   ;;  %v709_v4 = vld [vmem:[%s904_s1 + $0x48] sm:$0xff] (!%p152_p3)   ;;  %vm757_vm0 = vmmov (!%p152_p3), 0   ;;  %v712_v7 = vld [vmem:[%s904_s1 + $0x50] sm:$0xff] (!%p152_p3)   ;;  %p179_p4 = scmp.lt.s32.totalorder (!%p152_p3), %s746_s12, 1 }
   0x7   : > { %155 = sbr.rel (%p152_p3) target bundleno = 261 (0x105), region = 32  ;;  %v707_v1 = vld [vmem:[%s904_s1] sm:$0xff] (!%p152_p3)   ;;  %659 = vmatprep.subr.bf16.mxu1 (!%p152_p3), %v756_v2  ;;  %628 = vmatprep.subr.bf16.mxu0 (!%p152_p3), %v706_v0  ;;  %v710_v5 = vld [vmem:[%s904_s1 + $0x8] sm:$0xff] (!%p152_p3)   ;;  %v713_v8 = vld [vmem:[%s904_s1 + $0x10] sm:$0xff] (!%p152_p3)   ;;  %vm207_vm1 = vsmask.f32 (!%p152_p3), 7424 }
   0x8   : > { %v708_v3 = vld [vmem:[%s904_s1 + $0x80] sm:$0xff] (!%p152_p3)   ;;  %629 = vmatpush3.bf16.msra.mxu0 (!%p152_p3), %v707_v1  ;;  %675 = vmatprep.mubr.msk.bf16.mxu1 (!%p152_p3), %vm757_vm0, %v756_v2  ;;  %v711_v6 = vld [vmem:[%s904_s1 + $0x88] sm:$0xff] (!%p152_p3)   ;;  %v714_v9 = vld [vmem:[%s904_s1 + $0x90] sm:$0xff] (!%p152_p3)   ;;  %vm221_vm2 = vcmask (!%p152_p3), 1046528  }
   0x9   : > { %660 = vmatpush3.bf16.msra.mxu1 (!%p152_p3), %v708_v3  ;;  %630 = vmatprep.subr.bf16.mxu0 (!%p152_p3), %v709_v4  ;;  %v715_v10 = vld [vmem:[%s904_s1 + $0x58] sm:$0xff] (!%p152_p3)   ;;  %v718_v13 = vld [vmem:[%s904_s1 + $0x60] sm:$0xff] (!%p152_p3)   ;;  %v721_v16 = vld [vmem:[%s904_s1 + $0x68] sm:$0xff] (!%p152_p3)  }
   0xa   : > { %661 = vmatprep.subr.bf16.mxu1 (!%p152_p3), %v756_v2  ;;  %v716_v11 = vld [vmem:[%s904_s1 + $0x18] sm:$0xff] (!%p152_p3)   ;;  %v719_v14 = vld [vmem:[%s904_s1 + $0x20] sm:$0xff] (!%p152_p3)   ;;  %v722_v17 = vld [vmem:[%s904_s1 + $0x28] sm:$0xff] (!%p152_p3)  }
   0xb   : > { %v717_v12 = vld [vmem:[%s904_s1 + $0x98] sm:$0xff] (!%p152_p3)   ;;  %v720_v15 = vld [vmem:[%s904_s1 + $0xa0] sm:$0xff] (!%p152_p3)   ;;  %v723_v18 = vld [vmem:[%s904_s1 + $0xa8] sm:$0xff] (!%p152_p3)  }
   0xc   : > { %631 = vmatpush3.bf16.msra.mxu0 (!%p152_p3), %v710_v5  ;;  %v724_v19 = vld [vmem:[%s904_s1 + $0x70] sm:$0xff] (!%p152_p3)   ;;  %v727_v22 = vld [vmem:[%s904_s1 + $0x78] sm:$0xff] (!%p152_p3)   ;;  %v600_v39 = vld [vmem:[%s905_s2] ss:$0 sm:$0xff] (!%p152_p3) }
   0xd   : > { %662 = vmatpush3.bf16.msra.mxu1 (!%p152_p3), %v711_v6  ;;  %632 = vmatprep.subr.bf16.mxu0 (!%p152_p3), %v712_v7  ;;  %v725_v20 = vld [vmem:[%s904_s1 + $0x30] sm:$0xff] (!%p152_p3)   ;;  %v728_v28 = vld [vmem:[%s904_s1 + $0x38] sm:$0xff] (!%p152_p3)  }
   0xe   : > { %663 = vmatprep.subr.bf16.mxu1 %v756_v2  ;;  %s912_s12 = smov (!%p179_p4, %s746_s12), 1  ;;  %v726_v21 = vld [vmem:[%s904_s1 + $0xb0] sm:$0xff]   ;;  %v731_v31 = vld [vmem:[%s904_s1 + $0xb8] sm:$0xff]  }
   0xf   : > { %s679_s25 = smul.u32 12, %s912_s12  ;;  %s627_s24 = sshll.u32 %s912_s12, 4 }
  0x10   : > { %633 = vmatpush3.bf16.msra.mxu0 %v713_v8  ;;  %s192_s27 = scalar_lea.vmem %s906_s3, %s627_s24 }
  0x11   : > { %664 = vmatpush3.bf16.msra.mxu1 %v714_v9  ;;  %634 = vmatprep.subr.bf16.mxu0 %v715_v10  ;;  %s183_s9 = scalar_lea.vmem %s903_s0, %s679_s25 }
  0x12   : > { %665 = vmatprep.subr.bf16.mxu1 %v756_v2  ;;  %v729_v23 = vld [vmem:[%s183_s9] sm:$0xff]   ;;  %v730_v24 = vld [vmem:[%s183_s9 + $0x8] ss:$0 sps:$4 sm:$0x11]  }
  0x13   : > { %v209_v25 = vshrl.u32 %v729_v23, 16  ;;  %v211_v26 = vshll.u32 %v729_v23, 16  ;;  %v216_v27 = vshll.u32 %v730_v24, 16  ;;  %v222_v32 = vrot.slane %v729_v23, 1 }
  0x14   : > { %635 = vmatpush3.bf16.msra.mxu0 %v716_v11  ;;  %v223_v33 = vrot.slane %v730_v24, 1 }
  0x15   : > { %666 = vmatpush3.bf16.msra.mxu1 %v717_v12  ;;  %636 = vmatprep.subr.bf16.mxu0 %v718_v13  ;;  %v213_v29 = vrot.slane %v211_v26, 1  ;;  %v218_v30 = vrot.slane %v216_v27, 1 }
  0x16   : > { %667 = vmatprep.subr.bf16.mxu1 %v756_v2  ;;  %v224_v36 = vsel %vm221_vm2, %v222_v32, %v223_v33 }
  0x17   : > { %v214_v34 = vor.u32 %v213_v29, %v209_v25 }
  0x18   : > { %637 = vmatpush3.bf16.msra.mxu0 %v719_v14 }
  0x19   : > { %668 = vmatpush3.bf16.msra.mxu1 %v720_v15  ;;  %638 = vmatprep.subr.bf16.mxu0 %v721_v16  ;;  %v219_v35 = vsel %vm207_vm1, %v214_v34, %v218_v30 }
  0x1a   : > { %669 = vmatprep.subr.bf16.mxu1 %v756_v2  ;;  %457 = vmatprep.mubr.bf16.mxu0 %v219_v35 }
  0x1c   : > { %639 = vmatpush3.bf16.msra.mxu0 %v722_v17 }
  0x1d   : > { %670 = vmatpush3.bf16.msra.mxu1 %v723_v18  ;;  %640 = vmatprep.subr.bf16.mxu0 %v724_v19 }
  0x1e   : > { %671 = vmatprep.subr.bf16.mxu1 %v756_v2 }
  0x20   : > { %641 = vmatpush3.bf16.msra.mxu0 %v725_v20 }
  0x21   : > { %672 = vmatpush3.bf16.msra.mxu1 %v726_v21  ;;  %642 = vmatprep.subr.bf16.mxu0 %v727_v22 }
  0x22   : > { %673 = vmatprep.subr.bf16.mxu1 %v756_v2 }
  0x24   : > { %643 = vmatpush3.bf16.msra.mxu0 %v728_v28 }
  0x25   : > { %674 = vmatpush3.bf16.msra.mxu1 %v731_v31 }
  0x27   : > { %458 = vmatmul.mubr.bf16.vlgmr.msra.gmra.mrb[0].mxu0 %v729_v23 }
  0x28   : > { %676 = vmatmul.mubr.bf16.vlgmr.msra.gmra.mrb[0].mxu1 %v224_v36 }
  0xfa   : > { %v644_v37 = vpop.f32.mrb[0].mxu0 }
  0xfb   : > { %v645_v38 = vpop.f32.mrb[1].mxu0  ;;  %v500_v40 = vpop.f32.mrb[0].mxu1 }
  0xfc   : > { %v646_v41 = vadd.f32 %v645_v38, %v644_v37  ;;  %v647_v42 = vpop.f32.mrb[2].mxu0  ;;  %v677_v43 = vpop.f32.mrb[1].mxu1 }
  0xfd   : > { %v648_v44 = vpop.f32.mrb[3].mxu0  ;;  %v503_v45 = vpop.f32.mrb[2].mxu1 }
  0xfe   : > { %v460_v46 = vadd.f32 %v646_v41, %v600_v39  ;;  %v649_v47 = vadd.f32 %v648_v44, %v647_v42  ;;  %v678_v48 = vpop.f32.mrb[3].mxu1 }
 0x100   : > { %v501_v49 = vadd.f32 %v500_v40, %v460_v46  ;;  %v463_v50 = vadd.f32 %v649_v47, %v600_v39 }
 0x102   : > { %507 = vst [vmem:[%s192_s27] sm:$0xff] %v501_v49  ;;  %v504_v51 = vadd.f32 %v503_v45, %v463_v50 }
 0x104   : > { %508 = vst [vmem:[%s192_s27 + $0x8] sm:$0xff] %v504_v51 }
 0x105 PF: > { %s13_s14 = sadd.s32 1, %s754_s14   ;;  %s907_s12 = smov %s750_s13 }
 0x106   : > { %p10_p5 = scmp.ge.s32.totalorder %s13_s14, 4   ;;  %s908_s13 = smov %s910_s15 }
 0x108   :  { %12 = sbr.rel (!%p10_p5) target bundleno = 2 (0x2), region = 62 }

</bundles_post_ra>
